<compile_context>
chip_gen: v5e
topology: v5e:2x2
jax: 0.10.0
libtpu: 0.0.40
codegen_flags: <defaults>
</compile_context>

<pallas_src>
import functools

import jax
import jax.numpy as jnp
from jax.experimental import pallas as pl
from jax.experimental.pallas import tpu as pltpu


def _round_up(n: int, m: int) -> int:
    return (n + m - 1) // m * m


def se_block_kernel(x_ref, w1_ref, b1_ref, w2_ref, b2_ref, o_ref):
    x = x_ref[...]                                   # activation dtype (f32 or bf16)
    # MXU operands in the weights' dtype (bf16 by default), f32 accumulation.
    xm = x.astype(w1_ref.dtype)
    h = jnp.dot(xm, w1_ref[...], preferred_element_type=jnp.float32)
    h = jnp.maximum(h + b1_ref[...], 0.0)            # bias + ReLU in f32
    g = jnp.dot(h.astype(w2_ref.dtype), w2_ref[...],
                preferred_element_type=jnp.float32)
    g = jax.nn.sigmoid(g + b2_ref[...])              # sigmoid in f32 (EUP)
    # SE gating in the activation dtype: f32 tail for f32 inputs (v5e-safe),
    # bf16 multiply for bf16 inputs (v6e/v7x bf16 VALUs) — no f32 upcast of x.
    o_ref[...] = (x * g.astype(x.dtype)).astype(o_ref.dtype)


def make_se_params(w1, b1, w2, b2, *, param_dtype=jnp.bfloat16):
    """One-time parameter prep (model init, NOT per forward): transpose the
    PyTorch [out, in] weights to [in, out], zero-pad the feature dim to a
    multiple of 128 lanes, and cast weights to bf16 (default) for the MXU.
    Biases stay f32 (they feed the f32 elementwise tail)."""
    d = w1.shape[0]
    dp = _round_up(d, 128)
    pad = dp - d
    w1_t = jnp.asarray(w1, jnp.float32).T
    w2_t = jnp.asarray(w2, jnp.float32).T
    if pad:
        w1_t = jnp.pad(w1_t, ((0, pad), (0, pad)))
        w2_t = jnp.pad(w2_t, ((0, pad), (0, pad)))
    b1_r = jnp.pad(jnp.asarray(b1, jnp.float32), (0, pad)).reshape(1, dp)
    b2_r = jnp.pad(jnp.asarray(b2, jnp.float32), (0, pad)).reshape(1, dp)
    if param_dtype is not None:
        w1_t = w1_t.astype(param_dtype)
        w2_t = w2_t.astype(param_dtype)
    return w1_t, b1_r, w2_t, b2_r


def _pick_row_tile(rows: int) -> int:
    if rows >= 2048:
        return 512
    if rows >= 512:
        return 256
    if rows >= 16:
        return 128            # keeps >=2 row tiles for rows in [129, 511]
    return _round_up(max(rows, 1), 8)


@functools.partial(jax.jit, static_argnames=("row_tile",))
def se_block(x, w1_t, b1_r, w2_t, b2_r, *, row_tile=None):
    """x: [rows, D] in f32 or bf16; params from make_se_params."""
    r, d = x.shape
    dp = w1_t.shape[0]

    # Feature padding only when D is not lane-aligned (the module's 768 is, so
    # the common path has NO wrapper pad/slice copies of x / out).
    xp = x if dp == d else jnp.pad(x, ((0, 0), (0, dp - d)))

    if row_tile is None:
        row_tile = _pick_row_tile(r)
    row_tile = min(row_tile, _round_up(r, 8))
    num_tiles = pl.cdiv(r, row_tile)

    # Weight-DMA-bound at small batch: sharding the grid across v7x's two
    # TensorCores would duplicate the resident-weight DMA into each core's
    # VMEM; only mark the row axis parallel once compute dominates.
    dims = ("parallel",) if r >= 1024 else ("arbitrary",)

    row_spec = pl.BlockSpec((row_tile, dp), lambda i: (i, 0))

    def resident(shape):
        # Loop-invariant operand: constant index_map keeps it VMEM-resident;
        # single-buffering (Buffered(1)) halves its VMEM footprint.
        return pl.BlockSpec(shape, lambda i: (0,) * len(shape),
                            pipeline_mode=pl.Buffered(1))

    out = pl.pallas_call(
        se_block_kernel,
        out_shape=jax.ShapeDtypeStruct((r, dp), x.dtype),
        grid=(num_tiles,),
        in_specs=[
            row_spec,                # x: streamed per row tile (partial last tile OK)
            resident((dp, dp)),      # W1^T (bf16 by default)
            resident((1, dp)),       # b1 (f32)
            resident((dp, dp)),      # W2^T
            resident((1, dp)),       # b2
        ],
        out_specs=row_spec,
        compiler_params=pltpu.CompilerParams(
            dimension_semantics=dims,
            vmem_limit_bytes=32 << 20,   # > v5e 16 MiB default, < ~48 MiB v7x ceiling
        ),
    )(xp, w1_t, b1_r, w2_t, b2_r)

    return out if dp == d else out[:, :d]


def se_block_ref(x, w1, b1, w2, b2):
    x = x.astype(jnp.float32)
    h = jnp.maximum(x @ w1.T + b1, 0.0)
    g = jax.nn.sigmoid(h @ w2.T + b2)
    return x * g


if __name__ == "__main__":
    # SE_block gates the [B, embed_dim=768] cls-token features of the ViT.
    # Small batch for the primary check; D=768 is fixed by the module.
    B, D = 8, 768

    key = jax.random.PRNGKey(0)
    kx, kw1, kb1, kw2, kb2 = jax.random.split(key, 5)

    x = jax.random.normal(kx, (B, D), dtype=jnp.float32)
    bound = 1.0 / (D ** 0.5)
    w1 = jax.random.uniform(kw1, (D, D), jnp.float32, -bound, bound)
    b1 = jax.random.uniform(kb1, (D,), jnp.float32, -bound, bound)
    w2 = jax.random.uniform(kw2, (D, D), jnp.float32, -bound, bound)
    b2 = jax.random.uniform(kb2, (D,), jnp.float32, -bound, bound)

    ref = se_block_ref(x, w1, b1, w2, b2)

    # --- default path: bf16 weights / MXU, f32 tail ---
    params_bf16 = make_se_params(w1, b1, w2, b2)
    out = jax.block_until_ready(se_block(x, *params_bf16))
    assert out.shape == (B, D) and out.dtype == x.dtype
    assert jnp.allclose(out, ref, atol=5e-2, rtol=5e-2), "bf16-weight mismatch"

    # --- exact f32 path ---
    params_f32 = make_se_params(w1, b1, w2, b2, param_dtype=jnp.float32)
    out_f32 = jax.block_until_ready(se_block(x, *params_f32))
    assert jnp.allclose(out_f32, ref, atol=2e-3, rtol=2e-3), "f32 mismatch"

    # --- bf16 activations end-to-end (bf16 gating multiply on v6e/v7x) ---
    x_bf16 = x.astype(jnp.bfloat16)
    out_bf16 = jax.block_until_ready(se_block(x_bf16, *params_bf16))
    ref_bf16 = se_block_ref(x_bf16.astype(jnp.float32), w1, b1, w2, b2)
    assert out_bf16.dtype == jnp.bfloat16
    assert jnp.allclose(out_bf16.astype(jnp.float32), ref_bf16,
                        atol=5e-2, rtol=5e-2), "bf16 activation mismatch"

    # --- ragged rows: grid > 1, partial last row tile handled by masked writes,
    #     no wrapper pad/slice since D % 128 == 0 ---
    B2 = 200
    x2 = jax.random.normal(kx, (B2, D), dtype=jnp.float32)
    out2 = jax.block_until_ready(se_block(x2, *params_f32))
    ref2 = se_block_ref(x2, w1, b1, w2, b2)
    assert out2.shape == (B2, D)
    assert jnp.allclose(out2, ref2, atol=2e-3, rtol=2e-3), "ragged-row mismatch"

    # --- tiny, non-lane-aligned feature dim still correct (feature-pad path) ---
    Bs, Ds = 8, 32
    xs = jax.random.normal(kx, (Bs, Ds), dtype=jnp.float32)
    ws1 = jax.random.uniform(kw1, (Ds, Ds), jnp.float32, -1.0, 1.0) * (Ds ** -0.5)
    bs1 = jnp.zeros((Ds,), jnp.float32)
    ws2 = jax.random.uniform(kw2, (Ds, Ds), jnp.float32, -1.0, 1.0) * (Ds ** -0.5)
    bs2 = jnp.zeros((Ds,), jnp.float32)
    outs = jax.block_until_ready(
        se_block(xs, *make_se_params(ws1, bs1, ws2, bs2, param_dtype=jnp.float32)))
    refs = se_block_ref(xs, ws1, bs1, ws2, bs2)
    assert outs.shape == (Bs, Ds)
    assert jnp.allclose(outs, refs, atol=1e-4, rtol=1e-4), "padded-path mismatch"

    print("KERNEL_OK")
</pallas_src>

<mosaic_0001>
module attributes {stable_mosaic.version = 11 : i64} {
  func.func @se_block_kernel(%arg0: i32, %arg1: memref<8x768xf32, #tpu.memory_space<vmem>>, %arg2: memref<768x768xbf16, #tpu.memory_space<vmem>>, %arg3: memref<1x768xf32, #tpu.memory_space<vmem>>, %arg4: memref<768x768xbf16, #tpu.memory_space<vmem>>, %arg5: memref<1x768xf32, #tpu.memory_space<vmem>>, %arg6: memref<8x768xf32, #tpu.memory_space<vmem>>) attributes {dimension_semantics = [#tpu.dimension_semantics<arbitrary>], iteration_bounds = array<i64: 1>, scalar_prefetch = 0 : i64, scratch_operands = 0 : i64, tpu.core_type = #tpu.core_type<tc>, window_params = [{transform_indices = @transform_0, window_bounds = array<i64: 8, 768>}, {pipeline_mode = #tpu.pipeline_mode<synchronous>, transform_indices = @transform_1, window_bounds = array<i64: 768, 768>}, {pipeline_mode = #tpu.pipeline_mode<synchronous>, transform_indices = @transform_2, window_bounds = array<i64: 1, 768>}, {pipeline_mode = #tpu.pipeline_mode<synchronous>, transform_indices = @transform_3, window_bounds = array<i64: 768, 768>}, {pipeline_mode = #tpu.pipeline_mode<synchronous>, transform_indices = @transform_4, window_bounds = array<i64: 1, 768>}, {transform_indices = @transform_5, window_bounds = array<i64: 8, 768>}]} {
    %c0 = arith.constant 0 : index
    %c0_0 = arith.constant 0 : index
    %0 = vector.load %arg1[%c0, %c0_0] : memref<8x768xf32, #tpu.memory_space<vmem>>, vector<8x768xf32>
    %1 = arith.truncf %0 : vector<8x768xf32> to vector<8x768xbf16>
    %c0_1 = arith.constant 0 : index
    %c0_2 = arith.constant 0 : index
    %2 = vector.load %arg2[%c0_1, %c0_2] : memref<768x768xbf16, #tpu.memory_space<vmem>>, vector<768x768xbf16>
    %cst = arith.constant dense<0.000000e+00> : vector<8x768xf32>
    %3 = tpu.matmul %1, %2, %cst {dimension_numbers = #tpu.dot_dimension_numbers<[1], [0], [0], [1], [0, 0, 1, 1], [], []>} : vector<8x768xbf16>, vector<768x768xbf16>, vector<8x768xf32> -> vector<8x768xf32>
    %c0_3 = arith.constant 0 : index
    %c0_4 = arith.constant 0 : index
    %4 = vector.load %arg3[%c0_3, %c0_4] : memref<1x768xf32, #tpu.memory_space<vmem>>, vector<1x768xf32>
    %5 = vector.broadcast %4 : vector<1x768xf32> to vector<8x768xf32>
    %6 = arith.addf %3, %5 : vector<8x768xf32>
    %cst_5 = arith.constant 0.000000e+00 : f32
    %7 = vector.broadcast %cst_5 : f32 to vector<8x768xf32>
    %8 = arith.maximumf %6, %7 : vector<8x768xf32>
    %9 = arith.truncf %8 : vector<8x768xf32> to vector<8x768xbf16>
    %c0_6 = arith.constant 0 : index
    %c0_7 = arith.constant 0 : index
    %10 = vector.load %arg4[%c0_6, %c0_7] : memref<768x768xbf16, #tpu.memory_space<vmem>>, vector<768x768xbf16>
    %cst_8 = arith.constant dense<0.000000e+00> : vector<8x768xf32>
    %11 = tpu.matmul %9, %10, %cst_8 {dimension_numbers = #tpu.dot_dimension_numbers<[1], [0], [0], [1], [0, 0, 1, 1], [], []>} : vector<8x768xbf16>, vector<768x768xbf16>, vector<8x768xf32> -> vector<8x768xf32>
    %c0_9 = arith.constant 0 : index
    %c0_10 = arith.constant 0 : index
    %12 = vector.load %arg5[%c0_9, %c0_10] : memref<1x768xf32, #tpu.memory_space<vmem>>, vector<1x768xf32>
    %13 = vector.broadcast %12 : vector<1x768xf32> to vector<8x768xf32>
    %14 = arith.addf %11, %13 : vector<8x768xf32>
    %15 = arith.negf %14 : vector<8x768xf32>
    %16 = math.exp %15 : vector<8x768xf32>
    %cst_11 = arith.constant 1.000000e+00 : f32
    %17 = vector.broadcast %cst_11 : f32 to vector<8x768xf32>
    %18 = arith.addf %17, %16 : vector<8x768xf32>
    %19 = arith.divf %17, %18 : vector<8x768xf32>
    %20 = arith.mulf %0, %19 : vector<8x768xf32>
    %c0_12 = arith.constant 0 : index
    %c0_13 = arith.constant 0 : index
    %21 = vector.load %arg6[%c0_12, %c0_13] : memref<8x768xf32, #tpu.memory_space<vmem>>, vector<8x768xf32>
    tpu.vector_store %arg6[%c0_12, %c0_13], %20 {strides = array<i32>} : memref<8x768xf32, #tpu.memory_space<vmem>>, vector<8x768xf32>,
    return
  }
  func.func @transform_0(%arg0: i32) -> (i32, i32) {
    %c0_i32 = arith.constant 0 : i32
    %c0_i32_0 = arith.constant 0 : i32
    return %arg0, %c0_i32 : i32, i32
  }
  func.func @transform_1(%arg0: i32) -> (i32, i32) {
    %c0_i32 = arith.constant 0 : i32
    %c0_i32_0 = arith.constant 0 : i32
    %c0_i32_1 = arith.constant 0 : i32
    return %c0_i32, %c0_i32_0 : i32, i32
  }
  func.func @transform_2(%arg0: i32) -> (i32, i32) {
    %c0_i32 = arith.constant 0 : i32
    %c0_i32_0 = arith.constant 0 : i32
    %c0_i32_1 = arith.constant 0 : i32
    return %c0_i32, %c0_i32_0 : i32, i32
  }
  func.func @transform_3(%arg0: i32) -> (i32, i32) {
    %c0_i32 = arith.constant 0 : i32
    %c0_i32_0 = arith.constant 0 : i32
    %c0_i32_1 = arith.constant 0 : i32
    return %c0_i32, %c0_i32_0 : i32, i32
  }
  func.func @transform_4(%arg0: i32) -> (i32, i32) {
    %c0_i32 = arith.constant 0 : i32
    %c0_i32_0 = arith.constant 0 : i32
    %c0_i32_1 = arith.constant 0 : i32
    return %c0_i32, %c0_i32_0 : i32, i32
  }
  func.func @transform_5(%arg0: i32) -> (i32, i32) {
    %c0_i32 = arith.constant 0 : i32
    %c0_i32_0 = arith.constant 0 : i32
    return %arg0, %c0_i32 : i32, i32
  }
}

</mosaic_0001>

<bundles_post_ra>
// kernel: se_block.1
= control target key start
LH: loop header
LB: loop body
LE: loop exit
PB: predicated region body
PF: predicated region fallthrough
CT: control target
= control target key end

     0   :  { %10 = vsyncpa [#allocation3], 0  ;;  %s8025_s0 = inlined_call_operand.hbm [shape: f32[8,768], index: 0, kind: input, shape index: {}]   ;;  %s8026_s1 = inlined_call_operand.hbm [shape: bf16[768,768], index: 1, kind: input, shape index: {}]   ;;  %s8027_s2 = inlined_call_operand.hbm [shape: f32[1,768], index: 2, kind: input, shape index: {}]   ;;  %s8028_s3 = inlined_call_operand.hbm [shape: bf16[768,768], index: 3, kind: input, shape index: {}]   ;;  %s8029_s4 = inlined_call_operand.hbm [shape: f32[1,768], index: 4, kind: input, shape index: {}]   ;;  %s8030_s5 = inlined_call_operand.hbm [shape: f32[8,768], index: 5, kind: output, shape index: {}]  }
   0x1   :  { %11 = vsyncpa [#allocation6], 0 }
   0x2   :  { %12 = vsyncpa [#allocation9], 0  ;;  %s29_s20 = sshll.u32 %s8026_s1, 4  ;;  %s30_s20 = int_to_ptr.hbm [resolvable:$true] %s29_s20 }
   0x3   :  { %13 = vsyncpa [#allocation4], 0  ;;  %s7761_s21 = smov [#allocation5]   ;;  %s53_s25 = sshll.u32 %s8028_s3, 4  ;;  %s54_s25 = int_to_ptr.hbm [resolvable:$true] %s53_s25 }
   0x4   :  { %s31_s22 = sshll.u32 %s7761_s21, 4  ;;  %s7762_s26 = smov 384   ;;  %s32_s22 = int_to_ptr.vmem [resolvable:$true] %s31_s22 }
   0x5   :  { %s7763_s27 = smov 24   ;;  %s7764_s28 = smov [#allocation8]  }
   0x6   :  { %37 = dma.hbm_to_vmem [thread:$0]  %s30_s20, 36864, %s32_s22, [#allocation6], %s7762_s26, %s7762_s26, %s7763_s27  }
   0x7   :  { %s55_s29 = sshll.u32 %s7764_s28, 4  ;;  %s19_s7 = sshll.u32 %s8025_s0, 4  ;;  %s56_s29 = int_to_ptr.vmem [resolvable:$true] %s55_s29  ;;  %s20_s7 = int_to_ptr.hbm [resolvable:$true] %s19_s7 }
   0x8   :  { %61 = dma.hbm_to_vmem [thread:$0]  %s54_s25, 36864, %s56_s29, [#allocation9], %s7762_s26, %s7762_s26, %s7763_s27  }
   0x9   :  { %s43_s9 = sshll.u32 %s8027_s2, 4  ;;  %s7765_s10 = smov [#allocation2]   ;;  %s44_s9 = int_to_ptr.hbm [resolvable:$true] %s43_s9 }
   0xa   :  { %s21_s11 = sshll.u32 %s7765_s10, 4  ;;  %s7766_s3 = smov [#allocation7]   ;;  %s22_s11 = int_to_ptr.vmem [resolvable:$true] %s21_s11 }
   0xb   :  { %24 = dma.hbm_to_vmem [thread:$0]  %s20_s7, 768, %s22_s11, [#allocation3]  }
   0xc   :  { %s45_s12 = sshll.u32 %s7766_s3, 4  ;;  %s67_s15 = sshll.u32 %s8029_s4, 4  ;;  %s46_s12 = int_to_ptr.vmem [resolvable:$true] %s45_s12  ;;  %s68_s15 = int_to_ptr.hbm [resolvable:$true] %s67_s15 }
   0xd   :  { %48 = dma.hbm_to_vmem [thread:$0]  %s44_s9, 96, %s46_s12, [#allocation6]  }
   0xe   :  { %s7767_s0 = smov [#allocation10]  }
   0xf   :  { %s69_s16 = sshll.u32 %s7767_s0, 4  ;;  %s70_s16 = int_to_ptr.vmem [resolvable:$true] %s69_s16 }
  0x10   :  { %72 = dma.hbm_to_vmem [thread:$0]  %s68_s15, 96, %s70_s16, [#allocation9]  }
  0x11   :  { %7753 = dma.done.wait [#allocation3], 768  }
  0x12   :  { %7754 = vsyncadd [#allocation3], 4294966528 }
  0x13   :  { %7755 = dma.done.wait [#allocation6], 36960  }
  0x14   :  { %7756 = vsyncadd [#allocation6], 4294930336 }
  0x15   :  { %7757 = dma.done.wait [#allocation9], 36960  }
  0x16   :  { %7758 = vsyncadd [#allocation9], 4294930336  ;;  %v4852_v0 = vld [vmem:[#allocation5 + $0x150] sm:$0xf]  ;;  %v7037_v1 = vld [vmem:[#allocation5 + $0x164] sm:$0xf0] }
  0x17   :  { %v5044_v2 = vld [vmem:[#allocation5 + $0x2d0] sm:$0xf]  ;;  %v4853_v3 = vor.u32 %v7037_v1, %v4852_v0  ;;  %v7085_v4 = vld [vmem:[#allocation5 + $0x2e4] sm:$0xf0]  ;;  %v4828_v11 = vld [vmem:[#allocation5 + $0x120] sm:$0xf] }
  0x18   :  { %v5236_v5 = vld [vmem:[#allocation5 + $0x450] sm:$0xf]  ;;  %v7133_v6 = vld [vmem:[#allocation5 + $0x464] sm:$0xf0]  ;;  %v5045_v7 = vor.u32 %v7085_v4, %v5044_v2  ;;  %v7031_v13 = vld [vmem:[#allocation5 + $0x134] sm:$0xf0] }
  0x19   :  { %v5237_v8 = vor.u32 %v7133_v6, %v5236_v5  ;;  %v5428_v9 = vld [vmem:[#allocation5 + $0x5d0] sm:$0xf]  ;;  %v7181_v10 = vld [vmem:[#allocation5 + $0x5e4] sm:$0xf0]  ;;  %1847 = vmatpush.bf16.msra.mxu0 %v4853_v3  ;;  %v5020_v14 = vld [vmem:[#allocation5 + $0x2a0] sm:$0xf]  ;;  %v4829_v16 = vor.u32 %v7031_v13, %v4828_v11 }
  0x1a   :  { %v5429_v12 = vor.u32 %v7181_v10, %v5428_v9  ;;  %v7079_v15 = vld [vmem:[#allocation5 + $0x2b4] sm:$0xf0]  ;;  %1860 = vmatpush.bf16.msra.mxu1 %v5045_v7  ;;  %v5212_v18 = vld [vmem:[#allocation5 + $0x420] sm:$0xf]  ;;  %v4804_v23 = vld [vmem:[#allocation5 + $0xf0] sm:$0xf] }
  0x1b   :  { %1873 = vmatpush.bf16.msra.mxu2 %v5237_v8  ;;  %v5021_v17 = vor.u32 %v7079_v15, %v5020_v14  ;;  %v7127_v19 = vld [vmem:[#allocation5 + $0x434] sm:$0xf0]  ;;  %v5404_v20 = vld [vmem:[#allocation5 + $0x5a0] sm:$0xf]  ;;  %v7025_v24 = vld [vmem:[#allocation5 + $0x104] sm:$0xf0] }
  0x1c   :  { %1886 = vmatpush.bf16.msra.mxu3 %v5429_v12  ;;  %v5213_v21 = vor.u32 %v7127_v19, %v5212_v18  ;;  %v7175_v22 = vld [vmem:[#allocation5 + $0x5b4] sm:$0xf0]  ;;  %v4996_v26 = vld [vmem:[#allocation5 + $0x270] sm:$0xf]  ;;  %v7073_v27 = vld [vmem:[#allocation5 + $0x284] sm:$0xf0]  ;;  %v4805_v29 = vor.u32 %v7025_v24, %v4804_v23 }
  0x1d   :  { %v5405_v25 = vor.u32 %v7175_v22, %v5404_v20  ;;  %v5188_v28 = vld [vmem:[#allocation5 + $0x3f0] sm:$0xf]  ;;  %1848 = vmatpush.bf16.msra.mxu0 %v4829_v16  ;;  %v7121_v30 = vld [vmem:[#allocation5 + $0x404] sm:$0xf0]  ;;  %v4997_v33 = vor.u32 %v7073_v27, %v4996_v26  ;;  %v4780_v35 = vld [vmem:[#allocation5 + $0xc0] sm:$0xf] }
  0x1e   :  { %v5380_v31 = vld [vmem:[#allocation5 + $0x570] sm:$0xf]  ;;  %v7169_v32 = vld [vmem:[#allocation5 + $0x584] sm:$0xf0]  ;;  %1861 = vmatpush.bf16.msra.mxu1 %v5021_v17  ;;  %v5189_v34 = vor.u32 %v7121_v30, %v5188_v28  ;;  %v7019_v36 = vld [vmem:[#allocation5 + $0xd4] sm:$0xf0] }
  0x1f   :  { %1874 = vmatpush.bf16.msra.mxu2 %v5213_v21  ;;  %v4972_v37 = vld [vmem:[#allocation5 + $0x240] sm:$0xf]  ;;  %v5381_v38 = vor.u32 %v7169_v32, %v5380_v31  ;;  %v7067_v39 = vld [vmem:[#allocation5 + $0x254] sm:$0xf0]  ;;  %v4781_v44 = vor.u32 %v7019_v36, %v4780_v35  ;;  %v4756_v47 = vld [vmem:[#allocation5 + $0x90] sm:$0xf] }
  0x20   :  { %1887 = vmatpush.bf16.msra.mxu3 %v5405_v25  ;;  %v5164_v40 = vld [vmem:[#allocation5 + $0x3c0] sm:$0xf]  ;;  %v7115_v41 = vld [vmem:[#allocation5 + $0x3d4] sm:$0xf0]  ;;  %v4973_v45 = vor.u32 %v7067_v39, %v4972_v37  ;;  %v7013_v48 = vld [vmem:[#allocation5 + $0xa4] sm:$0xf0] }
  0x21   :  { %v5356_v42 = vld [vmem:[#allocation5 + $0x540] sm:$0xf]  ;;  %v7163_v43 = vld [vmem:[#allocation5 + $0x554] sm:$0xf0]  ;;  %1849 = vmatpush.bf16.msra.mxu0 %v4805_v29  ;;  %v5165_v46 = vor.u32 %v7115_v41, %v5164_v40  ;;  %v4948_v49 = vld [vmem:[#allocation5 + $0x210] sm:$0xf]  ;;  %v4757_v56 = vor.u32 %v7013_v48, %v4756_v47 }
  0x22   :  { %1862 = vmatpush.bf16.msra.mxu1 %v4997_v33  ;;  %v5357_v50 = vor.u32 %v7163_v43, %v5356_v42  ;;  %v7061_v51 = vld [vmem:[#allocation5 + $0x224] sm:$0xf0]  ;;  %v5140_v52 = vld [vmem:[#allocation5 + $0x390] sm:$0xf]  ;;  %v4732_v59 = vld [vmem:[#allocation5 + $0x60] sm:$0xf] }
  0x23   :  { %1875 = vmatpush.bf16.msra.mxu2 %v5189_v34  ;;  %v7109_v53 = vld [vmem:[#allocation5 + $0x3a4] sm:$0xf0]  ;;  %v5332_v54 = vld [vmem:[#allocation5 + $0x510] sm:$0xf]  ;;  %v4949_v57 = vor.u32 %v7061_v51, %v4948_v49  ;;  %v7007_v60 = vld [vmem:[#allocation5 + $0x74] sm:$0xf0] }
  0x24   :  { %1888 = vmatpush.bf16.msra.mxu3 %v5381_v38  ;;  %v7157_v55 = vld [vmem:[#allocation5 + $0x524] sm:$0xf0]  ;;  %v5141_v58 = vor.u32 %v7109_v53, %v5140_v52  ;;  %v4924_v61 = vld [vmem:[#allocation5 + $0x1e0] sm:$0xf]  ;;  %v7055_v63 = vld [vmem:[#allocation5 + $0x1f4] sm:$0xf0]  ;;  %v4733_v4 = vor.u32 %v7007_v60, %v4732_v59 }
  0x25   :  { %1850 = vmatpush.bf16.msra.mxu0 %v4781_v44  ;;  %v5333_v62 = vor.u32 %v7157_v55, %v5332_v54  ;;  %v5116_v0 = vld [vmem:[#allocation5 + $0x360] sm:$0xf]  ;;  %v7103_v1 = vld [vmem:[#allocation5 + $0x374] sm:$0xf0]  ;;  %v4925_v5 = vor.u32 %v7055_v63, %v4924_v61  ;;  %v4708_v7 = vld [vmem:[#allocation5 + $0x30] sm:$0xf] }
  0x26   :  { %1863 = vmatpush.bf16.msra.mxu1 %v4973_v45  ;;  %v5308_v2 = vld [vmem:[#allocation5 + $0x4e0] sm:$0xf]  ;;  %v7151_v3 = vld [vmem:[#allocation5 + $0x4f4] sm:$0xf0]  ;;  %v5117_v6 = vor.u32 %v7103_v1, %v5116_v0  ;;  %v7001_v8 = vld [vmem:[#allocation5 + $0x44] sm:$0xf0] }
  0x27   :  { %1876 = vmatpush.bf16.msra.mxu2 %v5165_v46  ;;  %v4900_v9 = vld [vmem:[#allocation5 + $0x1b0] sm:$0xf]  ;;  %v5309_v10 = vor.u32 %v7151_v3, %v5308_v2  ;;  %v7049_v11 = vld [vmem:[#allocation5 + $0x1c4] sm:$0xf0]  ;;  %v4709_v16 = vor.u32 %v7001_v8, %v4708_v7  ;;  %v4684_v17 = vld [vmem:[#allocation5] sm:$0xf] }
  0x28   :  { %1889 = vmatpush.bf16.msra.mxu3 %v5357_v50  ;;  %v5092_v12 = vld [vmem:[#allocation5 + $0x330] sm:$0xf]  ;;  %v7097_v13 = vld [vmem:[#allocation5 + $0x344] sm:$0xf0]  ;;  %v6995_v18 = vld [vmem:[#allocation5 + $0x14] sm:$0xf0]  ;;  %v4901_v19 = vor.u32 %v7049_v11, %v4900_v9 }
  0x29   :  { %1851 = vmatpush.bf16.msra.mxu0 %v4757_v56  ;;  %v5284_v14 = vld [vmem:[#allocation5 + $0x4b0] sm:$0xf]  ;;  %v7145_v15 = vld [vmem:[#allocation5 + $0x4c4] sm:$0xf0]  ;;  %v5093_v20 = vor.u32 %v7097_v13, %v5092_v12  ;;  %v4876_v21 = vld [vmem:[#allocation5 + $0x180] sm:$0xf]  ;;  %v4685_v31 = vor.u32 %v6995_v18, %v4684_v17 }
  0x2a   :  { %1864 = vmatpush.bf16.msra.mxu1 %v4949_v57  ;;  %v7043_v22 = vld [vmem:[#allocation5 + $0x194] sm:$0xf0]  ;;  %v5068_v23 = vld [vmem:[#allocation5 + $0x300] sm:$0xf]  ;;  %v5285_v24 = vor.u32 %v7145_v15, %v5284_v14  ;;  %v5620_v28 = vld [vmem:[#allocation5 + $0x750] sm:$0xf] }
  0x2b   :  { %1877 = vmatpush.bf16.msra.mxu2 %v5141_v58  ;;  %v7091_v25 = vld [vmem:[#allocation5 + $0x314] sm:$0xf0]  ;;  %v5260_v26 = vld [vmem:[#allocation5 + $0x480] sm:$0xf]  ;;  %v7229_v29 = vld [vmem:[#allocation5 + $0x764] sm:$0xf0]  ;;  %v4877_v35 = vor.u32 %v7043_v22, %v4876_v21 }
  0x2c   :  { %1890 = vmatpush.bf16.msra.mxu3 %v5333_v62  ;;  %v7139_v27 = vld [vmem:[#allocation5 + $0x494] sm:$0xf0]  ;;  %v5812_v30 = vld [vmem:[#allocation5 + $0x8d0] sm:$0xf]  ;;  %v7277_v32 = vld [vmem:[#allocation5 + $0x8e4] sm:$0xf0]  ;;  %v5069_v36 = vor.u32 %v7091_v25, %v5068_v23  ;;  %v5621_v40 = vor.u32 %v7229_v29, %v5620_v28 }
  0x2d   :  { %1852 = vmatpush.bf16.msra.mxu0 %v4733_v4  ;;  %v7034_v33 = vld [vmem:[#allocation5 + $0x154] sm:$0xf]  ;;  %v4854_v34 = vld [vmem:[#allocation5 + $0x168] sm:$0xf0]  ;;  %v5261_v39 = vor.u32 %v7139_v27, %v5260_v26  ;;  %v5813_v41 = vor.u32 %v7277_v32, %v5812_v30  ;;  %v5596_v43 = vld [vmem:[#allocation5 + $0x720] sm:$0xf] }
  0x2e   :  { %1865 = vmatpush.bf16.msra.mxu1 %v4925_v5  ;;  %v7082_v37 = vld [vmem:[#allocation5 + $0x2d4] sm:$0xf]  ;;  %v5046_v38 = vld [vmem:[#allocation5 + $0x2e8] sm:$0xf0]  ;;  %v4857_v42 = vor.u32 %v7034_v33, %v4854_v34  ;;  %v7223_v44 = vld [vmem:[#allocation5 + $0x734] sm:$0xf0] }
  0x2f   :  { %1878 = vmatpush.bf16.msra.mxu2 %v5117_v6  ;;  %v5788_v45 = vld [vmem:[#allocation5 + $0x8a0] sm:$0xf]  ;;  %v5049_v46 = vor.u32 %v7082_v37, %v5046_v38  ;;  %v7271_v47 = vld [vmem:[#allocation5 + $0x8b4] sm:$0xf0]  ;;  %v7028_v48 = vld [vmem:[#allocation5 + $0x124] sm:$0xf]  ;;  %v5597_v52 = vor.u32 %v7223_v44, %v5596_v43 }
  0x30   :  { %1891 = vmatpush.bf16.msra.mxu3 %v5309_v10  ;;  %v4830_v49 = vld [vmem:[#allocation5 + $0x138] sm:$0xf0]  ;;  %v7076_v50 = vld [vmem:[#allocation5 + $0x2a4] sm:$0xf]  ;;  %v5572_v53 = vld [vmem:[#allocation5 + $0x6f0] sm:$0xf]  ;;  %v5789_v54 = vor.u32 %v7271_v47, %v5788_v45 }
  0x31   :  { %1853 = vmatpush.bf16.msra.mxu0 %v4709_v16  ;;  %v5022_v51 = vld [vmem:[#allocation5 + $0x2b8] sm:$0xf0]  ;;  %v4833_v55 = vor.u32 %v7028_v48, %v4830_v49  ;;  %v7217_v56 = vld [vmem:[#allocation5 + $0x704] sm:$0xf0]  ;;  %v5764_v57 = vld [vmem:[#allocation5 + $0x870] sm:$0xf] }
  0x32   :  { %1866 = vmatpush.bf16.msra.mxu1 %v4901_v19  ;;  %v7265_v58 = vld [vmem:[#allocation5 + $0x884] sm:$0xf0]  ;;  %v5025_v59 = vor.u32 %v7076_v50, %v5022_v51  ;;  %v7022_v60 = vld [vmem:[#allocation5 + $0xf4] sm:$0xf]  ;;  %v4806_v61 = vld [vmem:[#allocation5 + $0x108] sm:$0xf0]  ;;  %v5573_v0 = vor.u32 %v7217_v56, %v5572_v53 }
  0x33   :  { %1879 = vmatpush.bf16.msra.mxu2 %v5093_v20  ;;  %v7070_v62 = vld [vmem:[#allocation5 + $0x274] sm:$0xf]  ;;  %v4998_v63 = vld [vmem:[#allocation5 + $0x288] sm:$0xf0]  ;;  %v5765_v1 = vor.u32 %v7265_v58, %v5764_v57  ;;  %v5548_v2 = vld [vmem:[#allocation5 + $0x6c0] sm:$0xf]  ;;  %v4809_v5 = vor.u32 %v7022_v60, %v4806_v61 }
  0x34   :  { %1892 = vmatpush.bf16.msra.mxu3 %v5285_v24  ;;  %v95_v3 = vld [vmem:[#allocation2 + $0x10] sm:$0xff]  ;;  %v93_v4 = vld [vmem:[#allocation2] sm:$0xff]  ;;  %v7211_v6 = vld [vmem:[#allocation5 + $0x6d4] sm:$0xf0]  ;;  %v5001_v11 = vor.u32 %v7070_v62, %v4998_v63  ;;  %s7768_s2 = smov [#allocation11]   ;;  %s4670_s19 = sshll.u32 %s8030_s5, 4  ;;  %s4671_s19 = int_to_ptr.hbm [resolvable:$true] %s4670_s19 }
  0x35   :  { %1854 = vmatpush.bf16.msra.mxu0 %v4685_v31  ;;  %v5740_v7 = vld [vmem:[#allocation5 + $0x840] sm:$0xf]  ;;  %v7814_v8 = vpack.c.bf16 %v95_v3, %v95_v3  ;;  %v7816_v9 = vpack.c.bf16 %v93_v4, %v93_v4  ;;  %v96_v10 = vld [vmem:[#allocation2 + $0x18] sm:$0xff]  ;;  %v7259_v12 = vld [vmem:[#allocation5 + $0x854] sm:$0xf0]  ;;  %v5549_v18 = vor.u32 %v7211_v6, %v5548_v2  ;;  %s4668_s4 = sshll.u32 %s7768_s2, 4  ;;  %s4669_s4 = int_to_ptr.vmem [resolvable:$true] %s4668_s4 }
  0x36   :  { %1867 = vmatpush.bf16.msra.mxu1 %v4877_v35  ;;  %v7016_v13 = vld [vmem:[#allocation5 + $0xc4] sm:$0xf]  ;;  %v4782_v14 = vld [vmem:[#allocation5 + $0xd8] sm:$0xf0]  ;;  %v7818_v15 = vpack.c.bf16 %v96_v10, %v96_v10  ;;  %v5741_v20 = vor.u32 %v7259_v12, %v5740_v7  ;;  %v5524_v22 = vld [vmem:[#allocation5 + $0x690] sm:$0xf] }
  0x37   :  { %1880 = vmatpush.bf16.msra.mxu2 %v5069_v36  ;;  %v7064_v16 = vld [vmem:[#allocation5 + $0x244] sm:$0xf]  ;;  %v4974_v17 = vld [vmem:[#allocation5 + $0x258] sm:$0xf0]  ;;  %v4785_v21 = vor.u32 %v7016_v13, %v4782_v14  ;;  %v7205_v23 = vld [vmem:[#allocation5 + $0x6a4] sm:$0xf0] }
  0x38   :  { %1893 = vmatpush.bf16.msra.mxu3 %v5261_v39  ;;  %1855 = vmatmul.bf16.vlgmr.msra.gmra.mxu0 %v7816_v9  ;;  %v94_v19 = vld [vmem:[#allocation2 + $0x8] sm:$0xff]  ;;  %v5716_v24 = vld [vmem:[#allocation5 + $0x810] sm:$0xf]  ;;  %v4977_v26 = vor.u32 %v7064_v16, %v4974_v17  ;;  %v7253_v27 = vld [vmem:[#allocation5 + $0x824] sm:$0xf0]  ;;  %v5525_v32 = vor.u32 %v7205_v23, %v5524_v22 }
  0x39   :  { %1899 = vmatpush.bf16.msrb.mxu0 %v5621_v40  ;;  %v7823_v25 = vpack.c.bf16 %v94_v19, %v94_v19  ;;  %v7010_v28 = vld [vmem:[#allocation5 + $0x94] sm:$0xf]  ;;  %v4758_v29 = vld [vmem:[#allocation5 + $0xa8] sm:$0xf0]  ;;  %v5717_v33 = vor.u32 %v7253_v27, %v5716_v24  ;;  %v5500_v35 = vld [vmem:[#allocation5 + $0x660] sm:$0xf] }
  0x3a   :  { %1912 = vmatpush.bf16.msrb.mxu1 %v5813_v41  ;;  %1881 = vmatmul.bf16.vlgmr.msra.gmra.mxu2 %v7814_v8  ;;  %v7058_v30 = vld [vmem:[#allocation5 + $0x214] sm:$0xf]  ;;  %v4950_v31 = vld [vmem:[#allocation5 + $0x228] sm:$0xf0]  ;;  %v4761_v34 = vor.u32 %v7010_v28, %v4758_v29  ;;  %v7199_v36 = vld [vmem:[#allocation5 + $0x674] sm:$0xf0] }
  0x3b   :  { %1925 = vmatpush.bf16.msrb.mxu2 %v4857_v42  ;;  %1894 = vmatmul.bf16.vlgmr.msra.gmra.mxu3 %v7818_v15  ;;  %v5692_v37 = vld [vmem:[#allocation5 + $0x7e0] sm:$0xf]  ;;  %v4953_v38 = vor.u32 %v7058_v30, %v4950_v31  ;;  %v7247_v39 = vld [vmem:[#allocation5 + $0x7f4] sm:$0xf0]  ;;  %v7004_v40 = vld [vmem:[#allocation5 + $0x64] sm:$0xf]  ;;  %v5501_v44 = vor.u32 %v7199_v36, %v5500_v35 }
  0x3c   :  { %1938 = vmatpush.bf16.msrb.mxu3 %v5049_v46  ;;  %1868 = vmatmul.bf16.vlgmr.msra.gmra.mxu1 %v7823_v25  ;;  %v4734_v41 = vld [vmem:[#allocation5 + $0x78] sm:$0xf0]  ;;  %v7052_v42 = vld [vmem:[#allocation5 + $0x1e4] sm:$0xf]  ;;  %v5693_v45 = vor.u32 %v7247_v39, %v5692_v37  ;;  %v5476_v47 = vld [vmem:[#allocation5 + $0x630] sm:$0xf] }
  0x3d   :  { %1900 = vmatpush.bf16.msrb.mxu0 %v5597_v52  ;;  %v4926_v43 = vld [vmem:[#allocation5 + $0x1f8] sm:$0xf0]  ;;  %v4737_v46 = vor.u32 %v7004_v40, %v4734_v41  ;;  %v7193_v48 = vld [vmem:[#allocation5 + $0x644] sm:$0xf0]  ;;  %v5668_v49 = vld [vmem:[#allocation5 + $0x7b0] sm:$0xf] }
  0x3e   :  { %1913 = vmatpush.bf16.msrb.mxu1 %v5789_v54  ;;  %v4929_v50 = vor.u32 %v7052_v42, %v4926_v43  ;;  %v7241_v51 = vld [vmem:[#allocation5 + $0x7c4] sm:$0xf0]  ;;  %v6998_v52 = vld [vmem:[#allocation5 + $0x34] sm:$0xf]  ;;  %v4710_v53 = vld [vmem:[#allocation5 + $0x48] sm:$0xf0]  ;;  %v5477_v56 = vor.u32 %v7193_v48, %v5476_v47 }
  0x3f   :  { %1926 = vmatpush.bf16.msrb.mxu2 %v4833_v55  ;;  %v7046_v54 = vld [vmem:[#allocation5 + $0x1b4] sm:$0xf]  ;;  %v4902_v55 = vld [vmem:[#allocation5 + $0x1c8] sm:$0xf0]  ;;  %v5452_v57 = vld [vmem:[#allocation5 + $0x600] sm:$0xf]  ;;  %v4713_v60 = vor.u32 %v6998_v52, %v4710_v53 }
  0x40   :  { %1939 = vmatpush.bf16.msrb.mxu3 %v5025_v59  ;;  %v7187_v58 = vld [vmem:[#allocation5 + $0x614] sm:$0xf0]  ;;  %v5669_v59 = vor.u32 %v7241_v51, %v5668_v49  ;;  %v5644_v61 = vld [vmem:[#allocation5 + $0x780] sm:$0xf]  ;;  %v6992_v63 = vld [vmem:[#allocation5 + $0x4] sm:$0xf] }
  0x41   :  { %1901 = vmatpush.bf16.msrb.mxu0 %v5573_v0  ;;  %v7235_v62 = vld [vmem:[#allocation5 + $0x794] sm:$0xf0]  ;;  %v4905_v0 = vor.u32 %v7046_v54, %v4902_v55  ;;  %v7040_v2 = vld [vmem:[#allocation5 + $0x184] sm:$0xf]  ;;  %v4878_v3 = vld [vmem:[#allocation5 + $0x198] sm:$0xf0]  ;;  %v5453_v7 = vor.u32 %v7187_v58, %v5452_v57 }
  0x42   :  { %1914 = vmatpush.bf16.msrb.mxu1 %v5765_v1  ;;  %v4686_v1 = vld [vmem:[#allocation5 + $0x18] sm:$0xf0]  ;;  %v7130_v4 = vld [vmem:[#allocation5 + $0x454] sm:$0xf]  ;;  %v5430_v10 = vld [vmem:[#allocation5 + $0x5e8] sm:$0xf0]  ;;  %v5645_v13 = vor.u32 %v7235_v62, %v5644_v61  ;;  %v4881_v19 = vor.u32 %v7040_v2, %v4878_v3 }
  0x43   :  { %1927 = vmatpush.bf16.msrb.mxu2 %v4809_v5  ;;  %v5238_v5 = vld [vmem:[#allocation5 + $0x468] sm:$0xf0]  ;;  %v7178_v6 = vld [vmem:[#allocation5 + $0x5d4] sm:$0xf]  ;;  %v4689_v14 = vor.u32 %v6992_v63, %v4686_v1  ;;  %v7124_v24 = vld [vmem:[#allocation5 + $0x424] sm:$0xf] }
  0x44   :  { %1940 = vmatpush.bf16.msrb.mxu3 %v5001_v11  ;;  %v7226_v11 = vld [vmem:[#allocation5 + $0x754] sm:$0xf]  ;;  %v5622_v12 = vld [vmem:[#allocation5 + $0x768] sm:$0xf0]  ;;  %v5433_v22 = vor.u32 %v7178_v6, %v5430_v10  ;;  %v7172_v27 = vld [vmem:[#allocation5 + $0x5a4] sm:$0xf] }
  0x45   :  { %1902 = vmatpush.bf16.msrb.mxu0 %v5549_v18  ;;  %v7274_v16 = vld [vmem:[#allocation5 + $0x8d4] sm:$0xf]  ;;  %v5814_v17 = vld [vmem:[#allocation5 + $0x8e8] sm:$0xf0]  ;;  %v5625_v23 = vor.u32 %v7226_v11, %v5622_v12  ;;  %v5406_v29 = vld [vmem:[#allocation5 + $0x5b8] sm:$0xf0] }
  0x46   :  { %1915 = vmatpush.bf16.msrb.mxu1 %v5741_v20  ;;  %v97_v18 = vld [vmem:[#allocation2 + $0x20] sm:$0xff]  ;;  %v5241_v20 = vor.u32 %v7130_v4, %v5238_v5  ;;  %v5817_v28 = vor.u32 %v7274_v16, %v5814_v17  ;;  %v7220_v30 = vld [vmem:[#allocation5 + $0x724] sm:$0xf]  ;;  %v5598_v31 = vld [vmem:[#allocation5 + $0x738] sm:$0xf0]  ;;  %v5409_v37 = vor.u32 %v7172_v27, %v5406_v29 }
  0x47   :  { %1928 = vmatpush.bf16.msrb.mxu2 %v4785_v21  ;;  %v98_v21 = vld [vmem:[#allocation2 + $0x28] sm:$0xff]  ;;  %v7118_v39 = vld [vmem:[#allocation5 + $0x3f4] sm:$0xf]  ;;  %v5190_v40 = vld [vmem:[#allocation5 + $0x408] sm:$0xf0] }
  0x48   :  { %1941 = vmatpush.bf16.msrb.mxu3 %v4977_v26  ;;  %v5214_v26 = vld [vmem:[#allocation5 + $0x438] sm:$0xf0]  ;;  %v7828_v35 = vpack.c.bf16 %v98_v21, %v98_v21  ;;  %v7166_v41 = vld [vmem:[#allocation5 + $0x574] sm:$0xf]  ;;  %v5382_v43 = vld [vmem:[#allocation5 + $0x588] sm:$0xf0]  ;;  %v5193_v48 = vor.u32 %v7118_v39, %v5190_v40 }
  0x49   :  { %1903 = vmatpush.bf16.msrb.mxu0 %v5525_v32  ;;  %v7826_v32 = vpack.c.bf16 %v97_v18, %v97_v18  ;;  %v5217_v36 = vor.u32 %v7124_v24, %v5214_v26  ;;  %v5766_v47 = vld [vmem:[#allocation5 + $0x888] sm:$0xf0]  ;;  %v5385_v49 = vor.u32 %v7166_v41, %v5382_v43  ;;  %v7112_v51 = vld [vmem:[#allocation5 + $0x3c4] sm:$0xf]  ;;  %v5166_v52 = vld [vmem:[#allocation5 + $0x3d8] sm:$0xf0] }
  0x4a   :  { %1916 = vmatpush.bf16.msrb.mxu1 %v5717_v33  ;;  %v7268_v33 = vld [vmem:[#allocation5 + $0x8a4] sm:$0xf]  ;;  %v5358_v55 = vld [vmem:[#allocation5 + $0x558] sm:$0xf0]  ;;  %v7106_v63 = vld [vmem:[#allocation5 + $0x394] sm:$0xf] }
  0x4b   :  { %1929 = vmatpush.bf16.msrb.mxu2 %v4761_v34  ;;  %v5790_v34 = vld [vmem:[#allocation5 + $0x8b8] sm:$0xf0]  ;;  %v7160_v53 = vld [vmem:[#allocation5 + $0x544] sm:$0xf]  ;;  %v7154_v1 = vld [vmem:[#allocation5 + $0x514] sm:$0xf] }
  0x4c   :  { %1942 = vmatpush.bf16.msrb.mxu3 %v4953_v38  ;;  %v5601_v38 = vor.u32 %v7220_v30, %v5598_v31  ;;  %v5793_v42 = vor.u32 %v7268_v33, %v5790_v34  ;;  %v5550_v57 = vld [vmem:[#allocation5 + $0x6d8] sm:$0xf0]  ;;  %v7256_v58 = vld [vmem:[#allocation5 + $0x844] sm:$0xf]  ;;  %v5361_v61 = vor.u32 %v7160_v53, %v5358_v55  ;;  %v5334_v3 = vld [vmem:[#allocation5 + $0x528] sm:$0xf0] }
  0x4d   :  { %1904 = vmatpush.bf16.msrb.mxu0 %v5501_v44  ;;  %v7214_v44 = vld [vmem:[#allocation5 + $0x6f4] sm:$0xf]  ;;  %v5526_v5 = vld [vmem:[#allocation5 + $0x6a8] sm:$0xf0]  ;;  %v5337_v11 = vor.u32 %v7154_v1, %v5334_v3  ;;  %v7148_v16 = vld [vmem:[#allocation5 + $0x4e4] sm:$0xf] }
  0x4e   :  { %1917 = vmatpush.bf16.msrb.mxu1 %v5693_v45  ;;  %v5574_v45 = vld [vmem:[#allocation5 + $0x708] sm:$0xf0]  ;;  %v7202_v4 = vld [vmem:[#allocation5 + $0x694] sm:$0xf]  ;;  %v5310_v18 = vld [vmem:[#allocation5 + $0x4f8] sm:$0xf0] }
  0x4f   :  { %1930 = vmatpush.bf16.msrb.mxu2 %v4737_v46  ;;  %v7262_v46 = vld [vmem:[#allocation5 + $0x874] sm:$0xf]  ;;  %v5529_v12 = vor.u32 %v7202_v4, %v5526_v5  ;;  %v7244_v21 = vld [vmem:[#allocation5 + $0x7e4] sm:$0xf]  ;;  %v5313_v24 = vor.u32 %v7148_v16, %v5310_v18  ;;  %v5286_v31 = vld [vmem:[#allocation5 + $0x4c8] sm:$0xf0] }
  0x50   :  { %1943 = vmatpush.bf16.msrb.mxu3 %v4929_v50  ;;  %v5577_v50 = vor.u32 %v7214_v44, %v5574_v45  ;;  %v5769_v54 = vor.u32 %v7262_v46, %v5766_v47  ;;  %v7250_v6 = vld [vmem:[#allocation5 + $0x814] sm:$0xf]  ;;  %v5478_v34 = vld [vmem:[#allocation5 + $0x648] sm:$0xf0]  ;;  %v7088_v39 = vld [vmem:[#allocation5 + $0x304] sm:$0xf] }
  0x51   :  { %1905 = vmatpush.bf16.msrb.mxu0 %v5477_v56  ;;  %v7208_v56 = vld [vmem:[#allocation5 + $0x6c4] sm:$0xf]  ;;  %v7094_v27 = vld [vmem:[#allocation5 + $0x334] sm:$0xf]  ;;  %v5070_v40 = vld [vmem:[#allocation5 + $0x318] sm:$0xf0] }
  0x52   :  { %1918 = vmatpush.bf16.msrb.mxu1 %v5669_v59  ;;  %v5742_v59 = vld [vmem:[#allocation5 + $0x858] sm:$0xf0]  ;;  %v5553_v62 = vor.u32 %v7208_v56, %v5550_v57  ;;  %v7142_v29 = vld [vmem:[#allocation5 + $0x4b4] sm:$0xf]  ;;  %v7136_v43 = vld [vmem:[#allocation5 + $0x484] sm:$0xf]  ;;  %v5073_v53 = vor.u32 %v7088_v39, %v5070_v40 }
  0x53   :  { %1931 = vmatpush.bf16.msrb.mxu2 %v4713_v60  ;;  %v5169_v60 = vor.u32 %v7112_v51, %v5166_v52  ;;  %v5745_v2 = vor.u32 %v7256_v58, %v5742_v59  ;;  %v7190_v33 = vld [vmem:[#allocation5 + $0x634] sm:$0xf]  ;;  %v5289_v41 = vor.u32 %v7142_v29, %v5286_v31  ;;  %v5262_v44 = vld [vmem:[#allocation5 + $0x498] sm:$0xf0]  ;;  %v7184_v45 = vld [vmem:[#allocation5 + $0x604] sm:$0xf] }
  0x54   :  { %1944 = vmatpush.bf16.msrb.mxu3 %v4905_v0  ;;  %v5142_v0 = vld [vmem:[#allocation5 + $0x3a8] sm:$0xf0]  ;;  %v5454_v47 = vld [vmem:[#allocation5 + $0x618] sm:$0xf0]  ;;  %v7038_v51 = vld [vmem:[#allocation5 + $0x16c] sm:$0xf0]  ;;  %v5265_v57 = vor.u32 %v7136_v43, %v5262_v44 }
  0x55   :  { %1906 = vmatpush.bf16.msrb.mxu0 %v5453_v7  ;;  %v5718_v7 = vld [vmem:[#allocation5 + $0x828] sm:$0xf0]  ;;  %v5145_v10 = vor.u32 %v7106_v63, %v5142_v0  ;;  %v5052_v52 = vld [vmem:[#allocation5 + $0x2d8] sm:$0xf]  ;;  %v7134_v56 = vld [vmem:[#allocation5 + $0x46c] sm:$0xf0]  ;;  %v5457_v58 = vor.u32 %v7184_v45, %v5454_v47 }
  0x56   :  { %1919 = vmatpush.bf16.msrb.mxu1 %v5645_v13  ;;  %v7100_v13 = vld [vmem:[#allocation5 + $0x364] sm:$0xf]  ;;  %v5721_v17 = vor.u32 %v7250_v6, %v5718_v7  ;;  %v5244_v55 = vld [vmem:[#allocation5 + $0x458] sm:$0xf]  ;;  %v4836_v1 = vld [vmem:[#allocation5 + $0x128] sm:$0xf] }
  0x57   :  { %1932 = vmatpush.bf16.msrb.mxu2 %v4689_v14  ;;  %v5118_v14 = vld [vmem:[#allocation5 + $0x378] sm:$0xf0]  ;;  %v5436_v59 = vld [vmem:[#allocation5 + $0x5d8] sm:$0xf]  ;;  %v5245_v0 = vor.u32 %v7134_v56, %v5244_v55  ;;  %v5028_v3 = vld [vmem:[#allocation5 + $0x2a8] sm:$0xf] }
  0x58   :  { %1945 = vmatpush.bf16.msrb.mxu3 %v4881_v19  ;;  %1907 = vmatmul.bf16.vlgmr.msrb.gmra.mxu0 %v7826_v32  ;;  %v7196_v19 = vld [vmem:[#allocation5 + $0x664] sm:$0xf]  ;;  %v7080_v5 = vld [vmem:[#allocation5 + $0x2bc] sm:$0xf0]  ;;  %v5220_v6 = vld [vmem:[#allocation5 + $0x428] sm:$0xf] }
  0x59   :  { %1951 = vmatpush.bf16.msra.mxu0 %v5241_v20  ;;  %1920 = vmatmul.bf16.vlgmr.msrb.gmra.mxu1 %v7828_v35  ;;  %v5502_v20 = vld [vmem:[#allocation5 + $0x678] sm:$0xf0]  ;;  %v7128_v7 = vld [vmem:[#allocation5 + $0x43c] sm:$0xf0]  ;;  %v4812_v16 = vld [vmem:[#allocation5 + $0xf8] sm:$0xf] }
  0x5a   :  { %1964 = vmatpush.bf16.msra.mxu1 %v5433_v22  ;;  %1933 = vmatmul.bf16.vlgmr.msrb.gmra.mxu2 %v7816_v9  ;;  %v5694_v22 = vld [vmem:[#allocation5 + $0x7f8] sm:$0xf0]  ;;  %v5505_v26 = vor.u32 %v7196_v19, %v5502_v20  ;;  %v5004_v18 = vld [vmem:[#allocation5 + $0x278] sm:$0xf]  ;;  %v7074_v20 = vld [vmem:[#allocation5 + $0x28c] sm:$0xf0] }
  0x5b   :  { %1977 = vmatpush.bf16.msra.mxu2 %v5625_v23  ;;  %1946 = vmatmul.bf16.vlgmr.msrb.gmra.mxu3 %v7823_v25  ;;  %v5121_v23 = vor.u32 %v7100_v13, %v5118_v14  ;;  %v5697_v30 = vor.u32 %v7244_v21, %v5694_v22  ;;  %v5029_v13 = vor.u32 %v7080_v5, %v5028_v3  ;;  %v5196_v21 = vld [vmem:[#allocation5 + $0x3f8] sm:$0xf]  ;;  %v7122_v22 = vld [vmem:[#allocation5 + $0x40c] sm:$0xf0]  ;;  %v4788_v29 = vld [vmem:[#allocation5 + $0xc8] sm:$0xf] }
  0x5c   :  { %1990 = vmatpush.bf16.msra.mxu3 %v5817_v28  ;;  %v5094_v28 = vld [vmem:[#allocation5 + $0x348] sm:$0xf0]  ;;  %v5221_v14 = vor.u32 %v7128_v7, %v5220_v6  ;;  %v4980_v31 = vld [vmem:[#allocation5 + $0x248] sm:$0xf]  ;;  %v7164_v39 = vld [vmem:[#allocation5 + $0x55c] sm:$0xf0] }
  0x5d   :  { %1952 = vmatpush.bf16.msra.mxu0 %v5217_v36  ;;  %v7238_v36 = vld [vmem:[#allocation5 + $0x7b4] sm:$0xf]  ;;  %v4764_v43 = vld [vmem:[#allocation5 + $0x98] sm:$0xf]  ;;  %v7014_v44 = vld [vmem:[#allocation5 + $0xac] sm:$0xf0] }
  0x5e   :  { %1965 = vmatpush.bf16.msra.mxu1 %v5409_v37  ;;  %v5670_v37 = vld [vmem:[#allocation5 + $0x7c8] sm:$0xf0]  ;;  %v4956_v45 = vld [vmem:[#allocation5 + $0x218] sm:$0xf]  ;;  %v7062_v47 = vld [vmem:[#allocation5 + $0x22c] sm:$0xf0] }
  0x5f   :  { %1978 = vmatpush.bf16.msra.mxu2 %v5601_v38  ;;  %v5097_v38 = vor.u32 %v7094_v27, %v5094_v28  ;;  %v5673_v46 = vor.u32 %v7238_v36, %v5670_v37  ;;  %v5005_v27 = vor.u32 %v7074_v20, %v5004_v18  ;;  %v5197_v28 = vor.u32 %v7122_v22, %v5196_v21  ;;  %v5172_v36 = vld [vmem:[#allocation5 + $0x3c8] sm:$0xf]  ;;  %v7116_v37 = vld [vmem:[#allocation5 + $0x3dc] sm:$0xf0]  ;;  %v4716_v3 = vld [vmem:[#allocation5 + $0x38] sm:$0xf] }
  0x60   :  { %1991 = vmatpush.bf16.msra.mxu3 %v5793_v42  ;;  %v5481_v42 = vor.u32 %v7190_v33, %v5478_v34  ;;  %v7068_v34 = vld [vmem:[#allocation5 + $0x25c] sm:$0xf0]  ;;  %v4740_v55 = vld [vmem:[#allocation5 + $0x68] sm:$0xf]  ;;  %v4908_v5 = vld [vmem:[#allocation5 + $0x1b8] sm:$0xf] }
  0x61   :  { %1953 = vmatpush.bf16.msra.mxu0 %v5193_v48  ;;  %v7232_v48 = vld [vmem:[#allocation5 + $0x784] sm:$0xf]  ;;  %v7008_v56 = vld [vmem:[#allocation5 + $0x7c] sm:$0xf0]  ;;  %v7050_v7 = vld [vmem:[#allocation5 + $0x1cc] sm:$0xf0] }
  0x62   :  { %1966 = vmatpush.bf16.msra.mxu1 %v5385_v49  ;;  %v5646_v49 = vld [vmem:[#allocation5 + $0x798] sm:$0xf0]  ;;  %v4909_v18 = vor.u32 %v7050_v7, %v4908_v5  ;;  %v4884_v20 = vld [vmem:[#allocation5 + $0x188] sm:$0xf]  ;;  %v7044_v21 = vld [vmem:[#allocation5 + $0x19c] sm:$0xf0] }
  0x63   :  { %1979 = vmatpush.bf16.msra.mxu2 %v5577_v50  ;;  %v4860_v50 = vld [vmem:[#allocation5 + $0x158] sm:$0xf]  ;;  %v5076_v22 = vld [vmem:[#allocation5 + $0x308] sm:$0xf] }
  0x64   :  { %1992 = vmatpush.bf16.msra.mxu3 %v5769_v54  ;;  %v7086_v54 = vld [vmem:[#allocation5 + $0x2ec] sm:$0xf0]  ;;  %v5556_v5 = vld [vmem:[#allocation5 + $0x6c8] sm:$0xf] }
  0x65   :  { %1954 = vmatpush.bf16.msra.mxu0 %v5169_v60  ;;  %v7182_v60 = vld [vmem:[#allocation5 + $0x5ec] sm:$0xf0]  ;;  %v5053_v63 = vor.u32 %v7086_v54, %v5052_v52  ;;  %v4765_v52 = vor.u32 %v7014_v44, %v4764_v43  ;;  %v5748_v7 = vld [vmem:[#allocation5 + $0x848] sm:$0xf] }
  0x66   :  { %1967 = vmatpush.bf16.msra.mxu1 %v5361_v61  ;;  %v5649_v61 = vor.u32 %v7232_v48, %v5646_v49  ;;  %v5437_v4 = vor.u32 %v7182_v60, %v5436_v59  ;;  %v5148_v48 = vld [vmem:[#allocation5 + $0x398] sm:$0xf]  ;;  %v7110_v49 = vld [vmem:[#allocation5 + $0x3ac] sm:$0xf0]  ;;  %v7056_v59 = vld [vmem:[#allocation5 + $0x1fc] sm:$0xf0] }
  0x67   :  { %1980 = vmatpush.bf16.msra.mxu2 %v5553_v62  ;;  %v4861_v62 = vor.u32 %v7038_v51, %v4860_v50  ;;  %v5340_v50 = vld [vmem:[#allocation5 + $0x518] sm:$0xf]  ;;  %v7158_v51 = vld [vmem:[#allocation5 + $0x52c] sm:$0xf0]  ;;  %v5149_v54 = vor.u32 %v7110_v49, %v5148_v48  ;;  %v5124_v60 = vld [vmem:[#allocation5 + $0x368] sm:$0xf] }
  0x68   :  { %1993 = vmatpush.bf16.msra.mxu3 %v5745_v2  ;;  %v7032_v2 = vld [vmem:[#allocation5 + $0x13c] sm:$0xf0] }
  0x69   :  { %1955 = vmatpush.bf16.msra.mxu0 %v5145_v10  ;;  %v5412_v10 = vld [vmem:[#allocation5 + $0x5a8] sm:$0xf]  ;;  %v7272_v49 = vld [vmem:[#allocation5 + $0x8bc] sm:$0xf0] }
  0x6a   :  { %1968 = vmatpush.bf16.msra.mxu1 %v5337_v11  ;;  %v7176_v11 = vld [vmem:[#allocation5 + $0x5bc] sm:$0xf0] }
  0x6b   :  { %1981 = vmatpush.bf16.msra.mxu2 %v5529_v12  ;;  %v4837_v12 = vor.u32 %v7032_v2, %v4836_v1  ;;  %v5413_v19 = vor.u32 %v7176_v11, %v5412_v10  ;;  %v5100_v10 = vld [vmem:[#allocation5 + $0x338] sm:$0xf]  ;;  %v7098_v11 = vld [vmem:[#allocation5 + $0x34c] sm:$0xf0] }
  0x6c   :  { %1994 = vmatpush.bf16.msra.mxu3 %v5721_v17  ;;  %v7026_v17 = vld [vmem:[#allocation5 + $0x10c] sm:$0xf0] }
  0x6d   :  { %1956 = vmatpush.bf16.msra.mxu0 %v5121_v23  ;;  %v5388_v23 = vld [vmem:[#allocation5 + $0x578] sm:$0xf] }
  0x6e   :  { %1969 = vmatpush.bf16.msra.mxu1 %v5313_v24  ;;  %v7170_v24 = vld [vmem:[#allocation5 + $0x58c] sm:$0xf0] }
  0x6f   :  { %1982 = vmatpush.bf16.msra.mxu2 %v5505_v26  ;;  %v4813_v26 = vor.u32 %v7026_v17, %v4812_v16  ;;  %v5389_v33 = vor.u32 %v7170_v24, %v5388_v23  ;;  %v4692_v16 = vld [vmem:[#allocation5 + $0x8] sm:$0xf]  ;;  %v6996_v17 = vld [vmem:[#allocation5 + $0x1c] sm:$0xf0] }
  0x70   :  { %1995 = vmatpush.bf16.msra.mxu3 %v5697_v30  ;;  %v7020_v30 = vld [vmem:[#allocation5 + $0xdc] sm:$0xf0] }
  0x71   :  { %1957 = vmatpush.bf16.msra.mxu0 %v5097_v38  ;;  %v5364_v38 = vld [vmem:[#allocation5 + $0x548] sm:$0xf]  ;;  %v4789_v40 = vor.u32 %v7020_v30, %v4788_v29  ;;  %v7092_v24 = vld [vmem:[#allocation5 + $0x31c] sm:$0xf0]  ;;  %v7230_v29 = vld [vmem:[#allocation5 + $0x76c] sm:$0xf0] }
  0x72   :  { %1970 = vmatpush.bf16.msra.mxu1 %v5289_v41  ;;  %v4981_v41 = vor.u32 %v7068_v34, %v4980_v31  ;;  %v5820_v30 = vld [vmem:[#allocation5 + $0x8d8] sm:$0xf]  ;;  %v4693_v31 = vor.u32 %v6996_v17, %v4692_v16  ;;  %v7035_v34 = vld [vmem:[#allocation5 + $0x15c] sm:$0xf]  ;;  %v4982_v16 = vld [vmem:[#allocation5 + $0x260] sm:$0xf0] }
  0x73   :  { %1983 = vmatpush.bf16.msra.mxu2 %v5481_v42  ;;  %v5173_v42 = vor.u32 %v7116_v37, %v5172_v36  ;;  %v4862_v36 = vld [vmem:[#allocation5 + $0x170] sm:$0xf0]  ;;  %v4885_v37 = vor.u32 %v7044_v21, %v4884_v20  ;;  %v5532_v20 = vld [vmem:[#allocation5 + $0x698] sm:$0xf]  ;;  %v7206_v21 = vld [vmem:[#allocation5 + $0x6ac] sm:$0xf0] }
  0x74   :  { %1996 = vmatpush.bf16.msra.mxu3 %v5673_v46  ;;  %v5365_v46 = vor.u32 %v7164_v39, %v5364_v38  ;;  %v5077_v38 = vor.u32 %v7092_v24, %v5076_v22  ;;  %v7083_v39 = vld [vmem:[#allocation5 + $0x2dc] sm:$0xf]  ;;  %v4865_v44 = vor.u32 %v7035_v34, %v4862_v36  ;;  %v5724_v22 = vld [vmem:[#allocation5 + $0x818] sm:$0xf]  ;;  %v7254_v24 = vld [vmem:[#allocation5 + $0x82c] sm:$0xf0] }
  0x75   :  { %1958 = vmatpush.bf16.msra.mxu0 %v5073_v53  ;;  %v4957_v53 = vor.u32 %v7062_v47, %v4956_v45  ;;  %v5604_v45 = vld [vmem:[#allocation5 + $0x728] sm:$0xf]  ;;  %v7200_v36 = vld [vmem:[#allocation5 + $0x67c] sm:$0xf0] }
  0x76   :  { %1971 = vmatpush.bf16.msra.mxu1 %v5265_v57  ;;  %v4932_v57 = vld [vmem:[#allocation5 + $0x1e8] sm:$0xf] }
  0x77   :  { %1984 = vmatpush.bf16.msra.mxu2 %v5457_v58  ;;  %v5341_v58 = vor.u32 %v7158_v51, %v5340_v50  ;;  %v4933_v1 = vor.u32 %v7056_v59, %v4932_v57  ;;  %v5796_v47 = vld [vmem:[#allocation5 + $0x8a8] sm:$0xf]  ;;  %v7029_v50 = vld [vmem:[#allocation5 + $0x12c] sm:$0xf]  ;;  %v4838_v51 = vld [vmem:[#allocation5 + $0x140] sm:$0xf0] }
  0x78   :  { %1997 = vmatpush.bf16.msra.mxu3 %v5649_v61  ;;  %1959 = vmatmul.bf16.vlgmr.msra.gmra.mxu0 %v7814_v8  ;;  %v7104_v61 = vld [vmem:[#allocation5 + $0x37c] sm:$0xf0]  ;;  %v5580_v57 = vld [vmem:[#allocation5 + $0x6f8] sm:$0xf]  ;;  %v5508_v34 = vld [vmem:[#allocation5 + $0x668] sm:$0xf] }
  0x79   :  { %2003 = vmatpush.bf16.msrb.mxu0 %v4861_v62  ;;  %1972 = vmatmul.bf16.vlgmr.msra.gmra.mxu1 %v7818_v15  ;;  %v5316_v62 = vld [vmem:[#allocation5 + $0x4e8] sm:$0xf]  ;;  %v5125_v2 = vor.u32 %v7104_v61, %v5124_v60  ;;  %v5772_v59 = vld [vmem:[#allocation5 + $0x878] sm:$0xf]  ;;  %v7266_v61 = vld [vmem:[#allocation5 + $0x88c] sm:$0xf0] }
  0x7a   :  { %2016 = vmatpush.bf16.msrb.mxu1 %v5053_v63  ;;  %1985 = vmatmul.bf16.vlgmr.msra.gmra.mxu2 %v7826_v32  ;;  %v7152_v63 = vld [vmem:[#allocation5 + $0x4fc] sm:$0xf0] }
  0x7b   :  { %2029 = vmatpush.bf16.msrb.mxu2 %v5245_v0  ;;  %1998 = vmatmul.bf16.vlgmr.msra.gmra.mxu3 %v7828_v35  ;;  %v4741_v0 = vor.u32 %v7008_v56, %v4740_v55  ;;  %v5317_v6 = vor.u32 %v7152_v63, %v5316_v62  ;;  %v5797_v55 = vor.u32 %v7272_v49, %v5796_v47  ;;  %v7023_v62 = vld [vmem:[#allocation5 + $0xfc] sm:$0xf]  ;;  %v4814_v63 = vld [vmem:[#allocation5 + $0x110] sm:$0xf0]  ;;  %v5484_v47 = vld [vmem:[#allocation5 + $0x638] sm:$0xf] }
  0x7c   :  { %2042 = vmatpush.bf16.msrb.mxu3 %v5437_v4  ;;  %v7002_v4 = vld [vmem:[#allocation5 + $0x4c] sm:$0xf0]  ;;  %v4841_v56 = vor.u32 %v7029_v50, %v4838_v51  ;;  %v5676_v49 = vld [vmem:[#allocation5 + $0x7b8] sm:$0xf] }
  0x7d   :  { %2004 = vmatpush.bf16.msrb.mxu0 %v4837_v12  ;;  %v5292_v12 = vld [vmem:[#allocation5 + $0x4b8] sm:$0xf]  ;;  %v7242_v51 = vld [vmem:[#allocation5 + $0x7cc] sm:$0xf0] }
  0x7e   :  { %2017 = vmatpush.bf16.msrb.mxu1 %v5029_v13  ;;  %v7146_v13 = vld [vmem:[#allocation5 + $0x4cc] sm:$0xf0] }
  0x7f   :  { %2030 = vmatpush.bf16.msrb.mxu2 %v5221_v14  ;;  %v4717_v14 = vor.u32 %v7002_v4, %v4716_v3  ;;  %v5293_v23 = vor.u32 %v7146_v13, %v5292_v12  ;;  %v5773_v3 = vor.u32 %v7266_v61, %v5772_v59  ;;  %v4817_v4 = vor.u32 %v7023_v62, %v4814_v63  ;;  %v7017_v12 = vld [vmem:[#allocation5 + $0xcc] sm:$0xf]  ;;  %v4790_v13 = vld [vmem:[#allocation5 + $0xe0] sm:$0xf0]  ;;  %v5652_v61 = vld [vmem:[#allocation5 + $0x788] sm:$0xf] }
  0x80   :  { %2043 = vmatpush.bf16.msrb.mxu3 %v5413_v19  ;;  %v5101_v19 = vor.u32 %v7098_v11, %v5100_v10  ;;  %v7260_v11 = vld [vmem:[#allocation5 + $0x85c] sm:$0xf0]  ;;  %v5677_v59 = vor.u32 %v7242_v51, %v5676_v49  ;;  %v6993_v63 = vld [vmem:[#allocation5 + $0xc] sm:$0xf] }
  0x81   :  { %2005 = vmatpush.bf16.msrb.mxu0 %v4813_v26  ;;  %v5268_v26 = vld [vmem:[#allocation5 + $0x488] sm:$0xf]  ;;  %v7236_v62 = vld [vmem:[#allocation5 + $0x79c] sm:$0xf0]  ;;  %v7161_v51 = vld [vmem:[#allocation5 + $0x54c] sm:$0xf] }
  0x82   :  { %2018 = vmatpush.bf16.msrb.mxu1 %v5005_v27  ;;  %v7140_v27 = vld [vmem:[#allocation5 + $0x49c] sm:$0xf0] }
  0x83   :  { %2031 = vmatpush.bf16.msrb.mxu2 %v5197_v28  ;;  %v5628_v28 = vld [vmem:[#allocation5 + $0x758] sm:$0xf] }
  0x84   :  { %2044 = vmatpush.bf16.msrb.mxu3 %v5389_v33  ;;  %v7278_v33 = vld [vmem:[#allocation5 + $0x8ec] sm:$0xf0] }
  0x85   :  { %2006 = vmatpush.bf16.msrb.mxu0 %v4789_v40  ;;  %v5054_v40 = vld [vmem:[#allocation5 + $0x2f0] sm:$0xf0]  ;;  %v5821_v43 = vor.u32 %v7278_v33, %v5820_v30  ;;  %v5533_v30 = vor.u32 %v7206_v21, %v5532_v20 }
  0x86   :  { %2019 = vmatpush.bf16.msrb.mxu1 %v4981_v41  ;;  %v5269_v41 = vor.u32 %v7140_v27, %v5268_v26  ;;  %v5057_v48 = vor.u32 %v7083_v39, %v5054_v40  ;;  %v7011_v26 = vld [vmem:[#allocation5 + $0x9c] sm:$0xf]  ;;  %v4766_v27 = vld [vmem:[#allocation5 + $0xb0] sm:$0xf0]  ;;  %v7248_v39 = vld [vmem:[#allocation5 + $0x7fc] sm:$0xf0] }
  0x87   :  { %2032 = vmatpush.bf16.msrb.mxu2 %v5173_v42  ;;  %v5629_v42 = vor.u32 %v7230_v29, %v5628_v28  ;;  %v7059_v28 = vld [vmem:[#allocation5 + $0x21c] sm:$0xf]  ;;  %v4958_v29 = vld [vmem:[#allocation5 + $0x230] sm:$0xf0]  ;;  %v4769_v33 = vor.u32 %v7011_v26, %v4766_v27  ;;  %v7005_v40 = vld [vmem:[#allocation5 + $0x6c] sm:$0xf] }
  0x88   :  { %2045 = vmatpush.bf16.msrb.mxu3 %v5365_v46  ;;  %v7224_v46 = vld [vmem:[#allocation5 + $0x73c] sm:$0xf0]  ;;  %v5414_v27 = vld [vmem:[#allocation5 + $0x5c0] sm:$0xf0] }
  0x89   :  { %2007 = vmatpush.bf16.msrb.mxu0 %v4765_v52  ;;  %v7077_v52 = vld [vmem:[#allocation5 + $0x2ac] sm:$0xf] }
  0x8a   :  { %2020 = vmatpush.bf16.msrb.mxu1 %v4957_v53  ;;  %v5030_v53 = vld [vmem:[#allocation5 + $0x2c0] sm:$0xf0] }
  0x8b   :  { %2033 = vmatpush.bf16.msrb.mxu2 %v5149_v54  ;;  %v5605_v54 = vor.u32 %v7224_v46, %v5604_v45  ;;  %v5033_v60 = vor.u32 %v7077_v52, %v5030_v53  ;;  %v6999_v52 = vld [vmem:[#allocation5 + $0x3c] sm:$0xf]  ;;  %v4718_v53 = vld [vmem:[#allocation5 + $0x50] sm:$0xf0] }
  0x8c   :  { %2046 = vmatpush.bf16.msrb.mxu3 %v5341_v58  ;;  %v7218_v58 = vld [vmem:[#allocation5 + $0x70c] sm:$0xf0] }
  0x8d   :  { %2008 = vmatpush.bf16.msrb.mxu0 %v4741_v0  ;;  %v7071_v0 = vld [vmem:[#allocation5 + $0x27c] sm:$0xf] }
  0x8e   :  { %2021 = vmatpush.bf16.msrb.mxu1 %v4933_v1  ;;  %v5006_v1 = vld [vmem:[#allocation5 + $0x290] sm:$0xf0] }
  0x8f   :  { %2034 = vmatpush.bf16.msrb.mxu2 %v5125_v2  ;;  %v5581_v2 = vor.u32 %v7218_v58, %v5580_v57  ;;  %v5009_v10 = vor.u32 %v7071_v0, %v5006_v1  ;;  %v5460_v57 = vld [vmem:[#allocation5 + $0x608] sm:$0xf]  ;;  %v7188_v58 = vld [vmem:[#allocation5 + $0x61c] sm:$0xf0]  ;;  %v4694_v1 = vld [vmem:[#allocation5 + $0x20] sm:$0xf0] }
  0x90   :  { %2047 = vmatpush.bf16.msrb.mxu3 %v5317_v6  ;;  %v7212_v6 = vld [vmem:[#allocation5 + $0x6dc] sm:$0xf0] }
  0x91   :  { %2009 = vmatpush.bf16.msrb.mxu0 %v4717_v14  ;;  %v7065_v14 = vld [vmem:[#allocation5 + $0x24c] sm:$0xf]  ;;  %v5557_v17 = vor.u32 %v7212_v6, %v5556_v5  ;;  %v5246_v5 = vld [vmem:[#allocation5 + $0x470] sm:$0xf0]  ;;  %v7179_v6 = vld [vmem:[#allocation5 + $0x5dc] sm:$0xf] }
  0x92   :  { %2022 = vmatpush.bf16.msrb.mxu1 %v4909_v18  ;;  %v5749_v18 = vor.u32 %v7260_v11, %v5748_v7  ;;  %v5461_v7 = vor.u32 %v7188_v58, %v5460_v57  ;;  %v7227_v11 = vld [vmem:[#allocation5 + $0x75c] sm:$0xf]  ;;  %v7257_v57 = vld [vmem:[#allocation5 + $0x84c] sm:$0xf]  ;;  %v5750_v58 = vld [vmem:[#allocation5 + $0x860] sm:$0xf0] }
  0x93   :  { %2035 = vmatpush.bf16.msrb.mxu2 %v5101_v19  ;;  %v4793_v19 = vor.u32 %v7017_v12, %v4790_v13  ;;  %v5630_v12 = vld [vmem:[#allocation5 + $0x770] sm:$0xf0]  ;;  %v5653_v13 = vor.u32 %v7236_v62, %v5652_v61 }
  0x94   :  { %2048 = vmatpush.bf16.msrb.mxu3 %v5293_v23  ;;  %v4985_v23 = vor.u32 %v7065_v14, %v4982_v16  ;;  %v4697_v14 = vor.u32 %v6993_v63, %v4694_v1  ;;  %v7275_v16 = vld [vmem:[#allocation5 + $0x8dc] sm:$0xf]  ;;  %v5633_v21 = vor.u32 %v7227_v11, %v5630_v12  ;;  %v5150_v63 = vld [vmem:[#allocation5 + $0x3b0] sm:$0xf0] }
  0x95   :  { %2010 = vmatpush.bf16.msrb.mxu0 %v4693_v31  ;;  %v5725_v31 = vor.u32 %v7254_v24, %v5724_v22  ;;  %v7125_v22 = vld [vmem:[#allocation5 + $0x42c] sm:$0xf] }
  0x96   :  { %2023 = vmatpush.bf16.msrb.mxu1 %v4885_v37  ;;  %v5700_v37 = vld [vmem:[#allocation5 + $0x7e8] sm:$0xf]  ;;  %v7173_v24 = vld [vmem:[#allocation5 + $0x5ac] sm:$0xf] }
  0x97   :  { %2036 = vmatpush.bf16.msrb.mxu2 %v5077_v38  ;;  %v4961_v38 = vor.u32 %v7059_v28, %v4958_v29  ;;  %v5701_v45 = vor.u32 %v7248_v39, %v5700_v37  ;;  %v7221_v28 = vld [vmem:[#allocation5 + $0x72c] sm:$0xf]  ;;  %v5606_v29 = vld [vmem:[#allocation5 + $0x740] sm:$0xf0]  ;;  %v7119_v37 = vld [vmem:[#allocation5 + $0x3fc] sm:$0xf] }
  0x98   :  { %2049 = vmatpush.bf16.msrb.mxu3 %v5269_v41  ;;  %2011 = vmatmul.bf16.vlgmr.msrb.gmra.mxu0 %v7816_v9  ;;  %v4742_v41 = vld [vmem:[#allocation5 + $0x80] sm:$0xf0]  ;;  %v7167_v39 = vld [vmem:[#allocation5 + $0x57c] sm:$0xf] }
  0x99   :  { %2055 = vmatpush.bf16.msra.mxu0 %v5629_v42  ;;  %2024 = vmatmul.bf16.vlgmr.msrb.gmra.mxu1 %v7823_v25  ;;  %v7053_v42 = vld [vmem:[#allocation5 + $0x1ec] sm:$0xf]  ;;  %v4745_v46 = vor.u32 %v7005_v40, %v4742_v41  ;;  %v5390_v41 = vld [vmem:[#allocation5 + $0x590] sm:$0xf0] }
  0x9a   :  { %2068 = vmatpush.bf16.msra.mxu1 %v5821_v43  ;;  %2037 = vmatmul.bf16.vlgmr.msrb.gmra.mxu2 %v7814_v8  ;;  %v4934_v43 = vld [vmem:[#allocation5 + $0x200] sm:$0xf0] }
  0x9b   :  { %2081 = vmatpush.bf16.msra.mxu2 %v4865_v44  ;;  %2050 = vmatmul.bf16.vlgmr.msrb.gmra.mxu3 %v7818_v15  ;;  %v5509_v44 = vor.u32 %v7200_v36, %v5508_v34  ;;  %v4937_v50 = vor.u32 %v7053_v42, %v4934_v43  ;;  %v5417_v34 = vor.u32 %v7173_v24, %v5414_v27  ;;  %v7215_v42 = vld [vmem:[#allocation5 + $0x6fc] sm:$0xf]  ;;  %v5582_v43 = vld [vmem:[#allocation5 + $0x710] sm:$0xf0]  ;;  %v5702_v24 = vld [vmem:[#allocation5 + $0x800] sm:$0xf0] }
  0x9c   :  { %2094 = vmatpush.bf16.msra.mxu3 %v5057_v48  ;;  %v7194_v48 = vld [vmem:[#allocation5 + $0x64c] sm:$0xf0]  ;;  %v5609_v36 = vor.u32 %v7221_v28, %v5606_v29  ;;  %v5585_v49 = vor.u32 %v7215_v42, %v5582_v43  ;;  %v5678_v42 = vld [vmem:[#allocation5 + $0x7d0] sm:$0xf0] }
  0x9d   :  { %2056 = vmatpush.bf16.msra.mxu0 %v5605_v54  ;;  %v7047_v54 = vld [vmem:[#allocation5 + $0x1bc] sm:$0xf] }
  0x9e   :  { %2069 = vmatpush.bf16.msra.mxu1 %v5797_v55  ;;  %v4910_v55 = vld [vmem:[#allocation5 + $0x1d0] sm:$0xf0] }
  0x9f   :  { %2082 = vmatpush.bf16.msra.mxu2 %v4841_v56  ;;  %v5485_v56 = vor.u32 %v7194_v48, %v5484_v47  ;;  %v4913_v0 = vor.u32 %v7047_v54, %v4910_v55  ;;  %v7113_v47 = vld [vmem:[#allocation5 + $0x3cc] sm:$0xf]  ;;  %v5393_v48 = vor.u32 %v7167_v39, %v5390_v41  ;;  %v5558_v55 = vld [vmem:[#allocation5 + $0x6e0] sm:$0xf0]  ;;  %v5486_v39 = vld [vmem:[#allocation5 + $0x650] sm:$0xf0] }
  0xa0   :  { %2095 = vmatpush.bf16.msra.mxu3 %v5033_v60  ;;  %v4721_v60 = vor.u32 %v6999_v52, %v4718_v53  ;;  %v5366_v52 = vld [vmem:[#allocation5 + $0x560] sm:$0xf0]  ;;  %v7209_v54 = vld [vmem:[#allocation5 + $0x6cc] sm:$0xf]  ;;  %v7239_v41 = vld [vmem:[#allocation5 + $0x7bc] sm:$0xf] }
  0xa1   :  { %2057 = vmatpush.bf16.msra.mxu0 %v5581_v2  ;;  %v7041_v2 = vld [vmem:[#allocation5 + $0x18c] sm:$0xf]  ;;  %v5369_v61 = vor.u32 %v7161_v51, %v5366_v52  ;;  %v5561_v62 = vor.u32 %v7209_v54, %v5558_v55  ;;  %v5270_v52 = vld [vmem:[#allocation5 + $0x4a0] sm:$0xf0]  ;;  %v5681_v55 = vor.u32 %v7239_v41, %v5678_v42 }
  0xa2   :  { %2070 = vmatpush.bf16.msra.mxu1 %v5773_v3  ;;  %v4886_v3 = vld [vmem:[#allocation5 + $0x1a0] sm:$0xf0]  ;;  %v7137_v51 = vld [vmem:[#allocation5 + $0x48c] sm:$0xf] }
  0xa3   :  { %2083 = vmatpush.bf16.msra.mxu2 %v4817_v4  ;;  %v7131_v4 = vld [vmem:[#allocation5 + $0x45c] sm:$0xf] }
  0xa4   :  { %2096 = vmatpush.bf16.msra.mxu3 %v5009_v10  ;;  %v5438_v10 = vld [vmem:[#allocation5 + $0x5f0] sm:$0xf0] }
  0xa5   :  { %2058 = vmatpush.bf16.msra.mxu0 %v5557_v17  ;;  %v5822_v17 = vld [vmem:[#allocation5 + $0x8f0] sm:$0xf0]  ;;  %v5441_v20 = vor.u32 %v7179_v6, %v5438_v10  ;;  %v7251_v6 = vld [vmem:[#allocation5 + $0x81c] sm:$0xf] }
  0xa6   :  { %2071 = vmatpush.bf16.msra.mxu1 %v5749_v18  ;;  %v4889_v18 = vor.u32 %v7041_v2, %v4886_v3  ;;  %v5825_v26 = vor.u32 %v7275_v16, %v5822_v17  ;;  %v5753_v2 = vor.u32 %v7257_v57, %v5750_v58  ;;  %v5342_v3 = vld [vmem:[#allocation5 + $0x530] sm:$0xf0]  ;;  %v5126_v16 = vld [vmem:[#allocation5 + $0x380] sm:$0xf0]  ;;  %v7149_v17 = vld [vmem:[#allocation5 + $0x4ec] sm:$0xf] }
  0xa7   :  { %2084 = vmatpush.bf16.msra.mxu2 %v4793_v19  ;;  %v5249_v19 = vor.u32 %v7131_v4, %v5246_v5  ;;  %v7203_v4 = vld [vmem:[#allocation5 + $0x69c] sm:$0xf]  ;;  %v5534_v5 = vld [vmem:[#allocation5 + $0x6b0] sm:$0xf0]  ;;  %v5462_v57 = vld [vmem:[#allocation5 + $0x620] sm:$0xf0] }
  0xa8   :  { %2097 = vmatpush.bf16.msra.mxu3 %v4985_v23  ;;  %v5222_v23 = vld [vmem:[#allocation5 + $0x440] sm:$0xf0]  ;;  %v7233_v58 = vld [vmem:[#allocation5 + $0x78c] sm:$0xf] }
  0xa9   :  { %2059 = vmatpush.bf16.msra.mxu0 %v5533_v30  ;;  %v7269_v30 = vld [vmem:[#allocation5 + $0x8ac] sm:$0xf] }
  0xaa   :  { %2072 = vmatpush.bf16.msra.mxu1 %v5725_v31  ;;  %v5798_v31 = vld [vmem:[#allocation5 + $0x8c0] sm:$0xf0] }
  0xab   :  { %2085 = vmatpush.bf16.msra.mxu2 %v4769_v33  ;;  %v5225_v33 = vor.u32 %v7125_v22, %v5222_v23  ;;  %v5801_v40 = vor.u32 %v7269_v30, %v5798_v31  ;;  %v5510_v22 = vld [vmem:[#allocation5 + $0x680] sm:$0xf0]  ;;  %v7245_v23 = vld [vmem:[#allocation5 + $0x7ec] sm:$0xf]  ;;  %v7095_v30 = vld [vmem:[#allocation5 + $0x33c] sm:$0xf] }
  0xac   :  { %2098 = vmatpush.bf16.msra.mxu3 %v4961_v38  ;;  %v5198_v38 = vld [vmem:[#allocation5 + $0x410] sm:$0xf0] }
  0xad   :  { %2060 = vmatpush.bf16.msra.mxu0 %v5509_v44  ;;  %v7263_v44 = vld [vmem:[#allocation5 + $0x87c] sm:$0xf]  ;;  %v5102_v31 = vld [vmem:[#allocation5 + $0x350] sm:$0xf0] }
  0xae   :  { %2073 = vmatpush.bf16.msra.mxu1 %v5701_v45  ;;  %v5774_v45 = vld [vmem:[#allocation5 + $0x890] sm:$0xf0] }
  0xaf   :  { %2086 = vmatpush.bf16.msra.mxu2 %v4745_v46  ;;  %v5201_v46 = vor.u32 %v7119_v37, %v5198_v38  ;;  %v5777_v53 = vor.u32 %v7263_v44, %v5774_v45  ;;  %v5294_v37 = vld [vmem:[#allocation5 + $0x4d0] sm:$0xf0]  ;;  %v7191_v38 = vld [vmem:[#allocation5 + $0x63c] sm:$0xf]  ;;  %v5105_v45 = vor.u32 %v7095_v30, %v5102_v31  ;;  %v4820_v30 = vld [vmem:[#allocation5 + $0x100] sm:$0xf] }
  0xb0   :  { %2099 = vmatpush.bf16.msra.mxu3 %v4937_v50  ;;  %v5174_v50 = vld [vmem:[#allocation5 + $0x3e0] sm:$0xf0]  ;;  %v7027_v31 = vld [vmem:[#allocation5 + $0x114] sm:$0xf0] }
  0xb1   :  { %2061 = vmatpush.bf16.msra.mxu0 %v5485_v56  ;;  %v7846_v56 = vld [vmem:[#allocation7] sm:$0x3f]  ;;  %v4821_v41 = vor.u32 %v7027_v31, %v4820_v30  ;;  %v7003_v31 = vld [vmem:[#allocation5 + $0x54] sm:$0xf0] }
  0xb2   :  { %2074 = vmatpush.bf16.msra.mxu1 %v5677_v59  ;;  %v5177_v59 = vor.u32 %v7113_v47, %v5174_v50  ;;  %v395_v1 = vperm.slane %v7846_v56, 0  ;;  %v5078_v47 = vld [vmem:[#allocation5 + $0x320] sm:$0xf0]  ;;  %v5489_v50 = vor.u32 %v7191_v38, %v5486_v39  ;;  %v7123_v38 = vld [vmem:[#allocation5 + $0x414] sm:$0xf0] }
  0xb3   :  { %2087 = vmatpush.bf16.msra.mxu2 %v4721_v60  ;;  %v7107_v60 = vld [vmem:[#allocation5 + $0x39c] sm:$0xf]  ;;  %v5396_v39 = vld [vmem:[#allocation5 + $0x580] sm:$0xf] }
  0xb4   :  { %2100 = vmatpush.bf16.msra.mxu3 %v4913_v0  ;;  %v7155_v0 = vld [vmem:[#allocation5 + $0x51c] sm:$0xf]  ;;  %v5153_v10 = vor.u32 %v7107_v60, %v5150_v63  ;;  %v4868_v60 = vld [vmem:[#allocation5 + $0x160] sm:$0xf] }
  0xb5   :  { %2062 = vmatpush.bf16.msra.mxu0 %v5461_v7  ;;  %v5726_v7 = vld [vmem:[#allocation5 + $0x830] sm:$0xf0]  ;;  %v1856_v11 = vpop.f32.mrf.mxu0  ;;  %v5345_v12 = vor.u32 %v7155_v0, %v5342_v3  ;;  %v7087_v0 = vld [vmem:[#allocation5 + $0x2f4] sm:$0xf0]  ;;  %v4724_v30 = vld [vmem:[#allocation5 + $0x40] sm:$0xf] }
  0xb6   :  { %2075 = vmatpush.bf16.msra.mxu1 %v5653_v13  ;;  %v5537_v13 = vor.u32 %v7203_v4, %v5534_v5  ;;  %v5273_v4 = vor.u32 %v7137_v51, %v5270_v52  ;;  %v5372_v51 = vld [vmem:[#allocation5 + $0x550] sm:$0xf]  ;;  %v7165_v52 = vld [vmem:[#allocation5 + $0x564] sm:$0xf0] }
  0xb7   :  { %2088 = vmatpush.bf16.msra.mxu2 %v4697_v14  ;;  %v7101_v14 = vld [vmem:[#allocation5 + $0x36c] sm:$0xf] }
  0xb8   :  { %2101 = vmatpush.bf16.msra.mxu3 %v4889_v18  ;;  %2063 = vmatmul.bf16.vlgmr.msra.gmra.mxu0 %v7826_v32  ;;  %v1857_v18 = vadd.f32 %v1856_v11, %v395_v1  ;;  %v5252_v1 = vld [vmem:[#allocation5 + $0x460] sm:$0xf] }
  0xb9   :  { %2107 = vmatpush.bf16.msrb.mxu0 %v5249_v19  ;;  %2076 = vmatmul.bf16.vlgmr.msra.gmra.mxu1 %v7828_v35  ;;  %v5729_v19 = vor.u32 %v7251_v6, %v5726_v7  ;;  %v1869_v27 = vpop.f32.mrf.mxu1  ;;  %v5444_v6 = vld [vmem:[#allocation5 + $0x5e0] sm:$0xf]  ;;  %v7183_v7 = vld [vmem:[#allocation5 + $0x5f4] sm:$0xf0] }
  0xba   :  { %2120 = vmatpush.bf16.msrb.mxu1 %v5441_v20  ;;  %2089 = vmatmul.bf16.vlgmr.msra.gmra.mxu2 %v7816_v9  ;;  %v5318_v20 = vld [vmem:[#allocation5 + $0x500] sm:$0xf0] }
  0xbb   :  { %2133 = vmatpush.bf16.msrb.mxu2 %v5633_v21  ;;  %2102 = vmatmul.bf16.vlgmr.msra.gmra.mxu3 %v7823_v25  ;;  %v7197_v21 = vld [vmem:[#allocation5 + $0x66c] sm:$0xf]  ;;  %v5321_v28 = vor.u32 %v7149_v17, %v5318_v20  ;;  %v7033_v17 = vld [vmem:[#allocation5 + $0x144] sm:$0xf0]  ;;  %v5445_v20 = vor.u32 %v7183_v7, %v5444_v6  ;;  %v7159_v6 = vld [vmem:[#allocation5 + $0x534] sm:$0xf0] }
  0xbc   :  { %2146 = vmatpush.bf16.msrb.mxu3 %v5825_v26  ;;  %v5129_v26 = vor.u32 %v7101_v14, %v5126_v16  ;;  %v5513_v29 = vor.u32 %v7197_v21, %v5510_v22  ;;  %v4844_v16 = vld [vmem:[#allocation5 + $0x130] sm:$0xf]  ;;  %v7081_v21 = vld [vmem:[#allocation5 + $0x2c4] sm:$0xf0]  ;;  %v396_v7 = vperm.slane %v7846_v56, 1 }
  0xbd   :  { %2108 = vmatpush.bf16.msrb.mxu0 %v5225_v33  ;;  %v7143_v33 = vld [vmem:[#allocation5 + $0x4bc] sm:$0xf]  ;;  %v5228_v22 = vld [vmem:[#allocation5 + $0x430] sm:$0xf] }
  0xbe   :  { %2121 = vmatpush.bf16.msrb.mxu1 %v5417_v34  ;;  %v1870_v34 = vadd.f32 %v1869_v27, %v1857_v18  ;;  %v1895_v44 = vpop.f32.mrf.mxu3  ;;  %v5036_v18 = vld [vmem:[#allocation5 + $0x2b0] sm:$0xf]  ;;  %v4845_v27 = vor.u32 %v7033_v17, %v4844_v16  ;;  %v7057_v17 = vld [vmem:[#allocation5 + $0x204] sm:$0xf0] }
  0xbf   :  { %2134 = vmatpush.bf16.msrb.mxu2 %v5609_v36  ;;  %v5705_v36 = vor.u32 %v7245_v23, %v5702_v24  ;;  %v7129_v23 = vld [vmem:[#allocation5 + $0x444] sm:$0xf0]  ;;  %v5420_v24 = vld [vmem:[#allocation5 + $0x5b0] sm:$0xf] }
  0xc0   :  { %2147 = vmatpush.bf16.msrb.mxu3 %v5801_v40  ;;  %v1882_v40 = vpop.f32.mrf.mxu2 }
  0xc1   :  { %2109 = vmatpush.bf16.msrb.mxu0 %v5201_v46  ;;  %v1883_v43 = vadd.f32 %v1882_v40, %v1870_v34  ;;  %v7089_v46 = vld [vmem:[#allocation5 + $0x30c] sm:$0xf]  ;;  %v1871_v3 = vpop.f32.mrf.mxu1  ;;  %v7171_v40 = vld [vmem:[#allocation5 + $0x594] sm:$0xf0] }
  0xc2   :  { %2122 = vmatpush.bf16.msrb.mxu1 %v5393_v48  ;;  %v1858_v48 = vpop.f32.mrf.mxu0  ;;  %v5081_v63 = vor.u32 %v7089_v46, %v5078_v47  ;;  %v4988_v46 = vld [vmem:[#allocation5 + $0x250] sm:$0xf]  ;;  %v5397_v47 = vor.u32 %v7171_v40, %v5396_v39  ;;  %v7111_v3 = vld [vmem:[#allocation5 + $0x3b4] sm:$0xf0]  ;;  %v5300_v40 = vld [vmem:[#allocation5 + $0x4c0] sm:$0xf] }
  0xc3   :  { %2135 = vmatpush.bf16.msrb.mxu2 %v5585_v49  ;;  %v5297_v49 = vor.u32 %v7143_v33, %v5294_v37  ;;  %v7849_v54 = vadd.f32 %v1895_v44, %v1883_v43  ;;  %v5012_v33 = vld [vmem:[#allocation5 + $0x280] sm:$0xf]  ;;  %v4796_v44 = vld [vmem:[#allocation5 + $0xd0] sm:$0xf]  ;;  %v7069_v48 = vld [vmem:[#allocation5 + $0x264] sm:$0xf0] }
  0xc4   :  { %2148 = vmatpush.bf16.msrb.mxu3 %v5777_v53  ;;  %v7185_v53 = vld [vmem:[#allocation5 + $0x60c] sm:$0xf]  ;;  %v5204_v37 = vld [vmem:[#allocation5 + $0x400] sm:$0xf]  ;;  %v7099_v39 = vld [vmem:[#allocation5 + $0x354] sm:$0xf0] }
  0xc5   :  { %2110 = vmatpush.bf16.msrb.mxu0 %v5177_v59  ;;  %v5654_v59 = vld [vmem:[#allocation5 + $0x7a0] sm:$0xf0]  ;;  %v5465_v5 = vor.u32 %v7185_v53, %v5462_v57  ;;  %v5205_v43 = vor.u32 %v7123_v38, %v5204_v37  ;;  %v7051_v37 = vld [vmem:[#allocation5 + $0x1d4] sm:$0xf0]  ;;  %v5108_v38 = vld [vmem:[#allocation5 + $0x340] sm:$0xf] }
  0xc6   :  { %2123 = vmatpush.bf16.msrb.mxu1 %v5369_v61  ;;  %v7039_v61 = vld [vmem:[#allocation5 + $0x174] sm:$0xf0] }
  0xc7   :  { %2136 = vmatpush.bf16.msrb.mxu2 %v5561_v62  ;;  %v5060_v62 = vld [vmem:[#allocation5 + $0x2e0] sm:$0xf]  ;;  %v4869_v11 = vor.u32 %v7039_v61, %v4868_v60 }
  0xc8   :  { %2149 = vmatpush.bf16.msrb.mxu3 %v5753_v2  ;;  %v7135_v2 = vld [vmem:[#allocation5 + $0x474] sm:$0xf0]  ;;  %v4772_v61 = vld [vmem:[#allocation5 + $0xa0] sm:$0xf] }
  0xc9   :  { %2111 = vmatpush.bf16.msrb.mxu0 %v5153_v10  ;;  %v5657_v10 = vor.u32 %v7233_v58, %v5654_v59  ;;  %v5253_v14 = vor.u32 %v7135_v2, %v5252_v1  ;;  %v4989_v59 = vor.u32 %v7069_v48, %v4988_v46  ;;  %v7063_v1 = vld [vmem:[#allocation5 + $0x234] sm:$0xf0]  ;;  %v5156_v2 = vld [vmem:[#allocation5 + $0x3a0] sm:$0xf]  ;;  %v5109_v46 = vor.u32 %v7099_v39, %v5108_v38  ;;  %v7045_v48 = vld [vmem:[#allocation5 + $0x1a4] sm:$0xf0] }
  0xca   :  { %2124 = vmatpush.bf16.msrb.mxu1 %v5345_v12  ;;  %v1884_v12 = vpop.f32.mrf.mxu2  ;;  %v5564_v39 = vld [vmem:[#allocation5 + $0x6d0] sm:$0xf] }
  0xcb   :  { %2137 = vmatpush.bf16.msrb.mxu2 %v5537_v13  ;;  %v5061_v13 = vor.u32 %v7087_v0, %v5060_v62  ;;  %v7015_v62 = vld [vmem:[#allocation5 + $0xb4] sm:$0xf0]  ;;  %v5373_v0 = vor.u32 %v7165_v52, %v5372_v51  ;;  %v4748_v12 = vld [vmem:[#allocation5 + $0x70] sm:$0xf]  ;;  %v7093_v51 = vld [vmem:[#allocation5 + $0x324] sm:$0xf0] }
  0xcc   :  { %2150 = vmatpush.bf16.msrb.mxu3 %v5729_v19  ;;  %v1897_v19 = vpop.f32.mrf.mxu3  ;;  %v5276_v52 = vld [vmem:[#allocation5 + $0x490] sm:$0xf] }
  0xcd   :  { %2112 = vmatpush.bf16.msrb.mxu0 %v5129_v26  ;;  %v7177_v26 = vld [vmem:[#allocation5 + $0x5c4] sm:$0xf0] }
  0xce   :  { %2125 = vmatpush.bf16.msrb.mxu1 %v5321_v28  ;;  %v5037_v28 = vor.u32 %v7081_v21, %v5036_v18  ;;  %v5421_v34 = vor.u32 %v7177_v26, %v5420_v24  ;;  %v5132_v18 = vld [vmem:[#allocation5 + $0x370] sm:$0xf]  ;;  %v7105_v19 = vld [vmem:[#allocation5 + $0x384] sm:$0xf0] }
  0xcf   :  { %2138 = vmatpush.bf16.msrb.mxu2 %v5513_v29  ;;  %v5229_v29 = vor.u32 %v7129_v23, %v5228_v22  ;;  %v5324_v21 = vld [vmem:[#allocation5 + $0x4f0] sm:$0xf]  ;;  %v7153_v22 = vld [vmem:[#allocation5 + $0x504] sm:$0xf0] }
  0xd0   :  { %2151 = vmatpush.bf16.msrb.mxu3 %v5705_v36  ;;  %v7075_v36 = vld [vmem:[#allocation5 + $0x294] sm:$0xf0] }
  0xd1   :  { %2113 = vmatpush.bf16.msrb.mxu0 %v5105_v45  ;;  %v5013_v42 = vor.u32 %v7075_v36, %v5012_v33  ;;  %v7021_v45 = vld [vmem:[#allocation5 + $0xe4] sm:$0xf0]  ;;  %v4916_v33 = vld [vmem:[#allocation5 + $0x1c0] sm:$0xf]  ;;  %v5325_v36 = vor.u32 %v7153_v22, %v5324_v21 }
  0xd2   :  { %2126 = vmatpush.bf16.msrb.mxu1 %v5297_v49  ;;  %v5180_v49 = vld [vmem:[#allocation5 + $0x3d0] sm:$0xf] }
  0xd3   :  { %2139 = vmatpush.bf16.msrb.mxu2 %v5489_v50  ;;  %v7117_v50 = vld [vmem:[#allocation5 + $0x3e4] sm:$0xf0] }
  0xd4   :  { %2152 = vmatpush.bf16.msrb.mxu3 %v5681_v55  ;;  %v4797_v55 = vor.u32 %v7021_v45, %v4796_v44  ;;  %v5181_v60 = vor.u32 %v7117_v50, %v5180_v49  ;;  %v6997_v44 = vld [vmem:[#allocation5 + $0x24] sm:$0xf0]  ;;  %v4917_v45 = vor.u32 %v7051_v37, %v4916_v33  ;;  %v5084_v49 = vld [vmem:[#allocation5 + $0x310] sm:$0xf]  ;;  %v5014_v33 = vld [vmem:[#allocation5 + $0x298] sm:$0xf0] }
  0xd5   :  { %2114 = vmatpush.bf16.msrb.mxu0 %v5081_v63  ;;  %v1908_v53 = vpop.f32.mrf.mxu0  ;;  %v4964_v63 = vld [vmem:[#allocation5 + $0x220] sm:$0xf] }
  0xd6   :  { %2127 = vmatpush.bf16.msrb.mxu1 %v5273_v4  ;;  %v1909_v57 = vadd.f32 %v1908_v53, %v7849_v54  ;;  %v1921_v58 = vpop.f32.mrf.mxu1  ;;  %v4773_v54 = vor.u32 %v7015_v62, %v4772_v61  ;;  %v7141_v53 = vld [vmem:[#allocation5 + $0x4a4] sm:$0xf0]  ;;  %v7279_v62 = vld [vmem:[#allocation5 + $0x8f4] sm:$0xf0] }
  0xd7   :  { %2140 = vmatpush.bf16.msrb.mxu2 %v5465_v5  ;;  %v5348_v5 = vld [vmem:[#allocation5 + $0x520] sm:$0xf] }
  0xd8   :  { %2153 = vmatpush.bf16.msrb.mxu3 %v5657_v10  ;;  %2115 = vmatmul.bf16.vlgmr.msrb.gmra.mxu0 %v7814_v8  ;;  %v7856_v4 = vadd.f32 %v1921_v58, %v1909_v57  ;;  %v4965_v10 = vor.u32 %v7063_v1, %v4964_v63  ;;  %v5349_v16 = vor.u32 %v7159_v6, %v5348_v5  ;;  %v5636_v57 = vld [vmem:[#allocation5 + $0x760] sm:$0xf]  ;;  %v7231_v58 = vld [vmem:[#allocation5 + $0x774] sm:$0xf0]  ;;  %v7036_v63 = vld [vmem:[#allocation5 + $0x164] sm:$0xf] }
  0xd9   :  { %2159 = vmatpush.bf16.msra.mxu0 %v4869_v11  ;;  %2128 = vmatmul.bf16.vlgmr.msrb.gmra.mxu1 %v7818_v15  ;;  %v5157_v11 = vor.u32 %v7111_v3, %v5156_v2  ;;  %v5085_v2 = vor.u32 %v7093_v51, %v5084_v49  ;;  %v7084_v3 = vld [vmem:[#allocation5 + $0x2e4] sm:$0xf]  ;;  %v5062_v5 = vld [vmem:[#allocation5 + $0x2f8] sm:$0xf0]  ;;  %v5277_v6 = vor.u32 %v7141_v53, %v5276_v52  ;;  %v5540_v52 = vld [vmem:[#allocation5 + $0x6a0] sm:$0xf] }
  0xda   :  { %2172 = vmatpush.bf16.msra.mxu1 %v5061_v13  ;;  %2141 = vmatmul.bf16.vlgmr.msrb.gmra.mxu2 %v7826_v32  ;;  %v7009_v13 = vld [vmem:[#allocation5 + $0x84] sm:$0xf0]  ;;  %v7207_v53 = vld [vmem:[#allocation5 + $0x6b4] sm:$0xf0] }
  0xdb   :  { %2185 = vmatpush.bf16.msra.mxu2 %v5253_v14  ;;  %2154 = vmatmul.bf16.vlgmr.msrb.gmra.mxu3 %v7828_v35  ;;  %v4940_v14 = vld [vmem:[#allocation5 + $0x1f0] sm:$0xf]  ;;  %v4749_v26 = vor.u32 %v7009_v13, %v4748_v12  ;;  %v7225_v12 = vld [vmem:[#allocation5 + $0x744] sm:$0xf0] }
  0xdc   :  { %2198 = vmatpush.bf16.msra.mxu3 %v5445_v20  ;;  %v5804_v13 = vld [vmem:[#allocation5 + $0x8b0] sm:$0xf] }
  0xdd   :  { %2160 = vmatpush.bf16.msra.mxu0 %v4845_v27  ;;  %v1934_v20 = vpop.f32.mrf.mxu2  ;;  %v1910_v56 = vpop.f32.mrf.mxu0 }
  0xde   :  { %2173 = vmatpush.bf16.msra.mxu1 %v5037_v28  ;;  %v1935_v23 = vadd.f32 %v1934_v20, %v396_v7  ;;  %v1947_v24 = vpop.f32.mrf.mxu3  ;;  %v1923_v27 = vpop.f32.mrf.mxu1  ;;  %v4941_v28 = vor.u32 %v7057_v17, %v4940_v14  ;;  %v5637_v7 = vor.u32 %v7231_v58, %v5636_v57  ;;  %v5065_v14 = vor.u32 %v7084_v3, %v5062_v5  ;;  %v7030_v17 = vld [vmem:[#allocation5 + $0x134] sm:$0xf]  ;;  %v5038_v20 = vld [vmem:[#allocation5 + $0x2c8] sm:$0xf0]  ;;  %v7219_v56 = vld [vmem:[#allocation5 + $0x714] sm:$0xf0] }
  0xdf   :  { %2186 = vmatpush.bf16.msra.mxu2 %v5229_v29  ;;  %v5133_v29 = vor.u32 %v7105_v19, %v5132_v18  ;;  %v4846_v18 = vld [vmem:[#allocation5 + $0x148] sm:$0xf0]  ;;  %v7078_v19 = vld [vmem:[#allocation5 + $0x2b4] sm:$0xf] }
  0xe0   :  { %2199 = vmatpush.bf16.msra.mxu3 %v5421_v34  ;;  %v7859_v34 = vadd.f32 %v1947_v24, %v1935_v23  ;;  %v4849_v23 = vor.u32 %v7030_v17, %v4846_v18  ;;  %v5588_v24 = vld [vmem:[#allocation5 + $0x700] sm:$0xf]  ;;  %v5041_v27 = vor.u32 %v7078_v19, %v5038_v20  ;;  %v7054_v17 = vld [vmem:[#allocation5 + $0x1f4] sm:$0xf]  ;;  %v4942_v18 = vld [vmem:[#allocation5 + $0x208] sm:$0xf0] }
  0xe1   :  { %2161 = vmatpush.bf16.msra.mxu0 %v4821_v41  ;;  %v7147_v41 = vld [vmem:[#allocation5 + $0x4d4] sm:$0xf0] }
  0xe2   :  { %2174 = vmatpush.bf16.msra.mxu1 %v5013_v42  ;;  %v4725_v42 = vor.u32 %v7003_v31, %v4724_v30  ;;  %v5301_v50 = vor.u32 %v7147_v41, %v5300_v40  ;;  %v4822_v30 = vld [vmem:[#allocation5 + $0x118] sm:$0xf0]  ;;  %v7072_v31 = vld [vmem:[#allocation5 + $0x284] sm:$0xf]  ;;  %v7213_v40 = vld [vmem:[#allocation5 + $0x6e4] sm:$0xf0] }
  0xe3   :  { %2187 = vmatpush.bf16.msra.mxu2 %v5205_v43  ;;  %v4700_v43 = vld [vmem:[#allocation5 + $0x10] sm:$0xf] }
  0xe4   :  { %2200 = vmatpush.bf16.msra.mxu3 %v5397_v47  ;;  %v4892_v47 = vld [vmem:[#allocation5 + $0x190] sm:$0xf]  ;;  %v4701_v61 = vor.u32 %v6997_v44, %v4700_v43  ;;  %v7261_v43 = vld [vmem:[#allocation5 + $0x864] sm:$0xf0]  ;;  %v7018_v44 = vld [vmem:[#allocation5 + $0xd4] sm:$0xf] }
  0xe5   :  { %2162 = vmatpush.bf16.msra.mxu0 %v4797_v55  ;;  %v1936_v55 = vpop.f32.mrf.mxu2  ;;  %v4893_v1 = vor.u32 %v7045_v48, %v4892_v47  ;;  %v5756_v41 = vld [vmem:[#allocation5 + $0x850] sm:$0xf]  ;;  %v4990_v47 = vld [vmem:[#allocation5 + $0x268] sm:$0xf0]  ;;  %v5565_v48 = vor.u32 %v7213_v40, %v5564_v39  ;;  %v7189_v39 = vld [vmem:[#allocation5 + $0x624] sm:$0xf0] }
  0xe6   :  { %2175 = vmatpush.bf16.msra.mxu1 %v4989_v59  ;;  %v5828_v59 = vld [vmem:[#allocation5 + $0x8e0] sm:$0xf] }
  0xe7   :  { %2188 = vmatpush.bf16.msra.mxu2 %v5181_v60  ;;  %v1949_v60 = vpop.f32.mrf.mxu3  ;;  %v5732_v55 = vld [vmem:[#allocation5 + $0x820] sm:$0xf] }
  0xe8   :  { %2201 = vmatpush.bf16.msra.mxu3 %v5373_v0  ;;  %v4870_v0 = vld [vmem:[#allocation5 + $0x178] sm:$0xf0]  ;;  %v7255_v60 = vld [vmem:[#allocation5 + $0x834] sm:$0xf0] }
  0xe9   :  { %2163 = vmatpush.bf16.msra.mxu0 %v4773_v54  ;;  %v5829_v54 = vor.u32 %v7279_v62, %v5828_v59  ;;  %v4774_v62 = vld [vmem:[#allocation5 + $0xb8] sm:$0xf0]  ;;  %v5733_v3 = vor.u32 %v7255_v60, %v5732_v55 }
  0xea   :  { %2176 = vmatpush.bf16.msra.mxu1 %v4965_v10  ;;  %v4873_v10 = vor.u32 %v7036_v63, %v4870_v0  ;;  %v7060_v63 = vld [vmem:[#allocation5 + $0x224] sm:$0xf]  ;;  %v4966_v0 = vld [vmem:[#allocation5 + $0x238] sm:$0xf0] }
  0xeb   :  { %2189 = vmatpush.bf16.msra.mxu2 %v5157_v11  ;;  %v5612_v11 = vld [vmem:[#allocation5 + $0x730] sm:$0xf] }
  0xec   :  { %2202 = vmatpush.bf16.msra.mxu3 %v5349_v16  ;;  %v7273_v16 = vld [vmem:[#allocation5 + $0x8c4] sm:$0xf0]  ;;  %v5613_v21 = vor.u32 %v7225_v12, %v5612_v11  ;;  %v7006_v12 = vld [vmem:[#allocation5 + $0x74] sm:$0xf] }
  0xed   :  { %2164 = vmatpush.bf16.msra.mxu0 %v4749_v26  ;;  %v5805_v22 = vor.u32 %v7273_v16, %v5804_v13  ;;  %v5780_v26 = vld [vmem:[#allocation5 + $0x880] sm:$0xf]  ;;  %v7249_v11 = vld [vmem:[#allocation5 + $0x804] sm:$0xf0]  ;;  %v4750_v13 = vld [vmem:[#allocation5 + $0x88] sm:$0xf0] }
  0xee   :  { %2177 = vmatpush.bf16.msra.mxu1 %v4941_v28  ;;  %v7267_v28 = vld [vmem:[#allocation5 + $0x894] sm:$0xf0] }
  0xef   :  { %2190 = vmatpush.bf16.msra.mxu2 %v5133_v29  ;;  %v7024_v29 = vld [vmem:[#allocation5 + $0x104] sm:$0xf]  ;;  %v5781_v37 = vor.u32 %v7267_v28, %v5780_v26  ;;  %v5684_v26 = vld [vmem:[#allocation5 + $0x7c0] sm:$0xf]  ;;  %v4945_v28 = vor.u32 %v7054_v17, %v4942_v18 }
  0xf0   :  { %2203 = vmatpush.bf16.msra.mxu3 %v5325_v36  ;;  %v5589_v36 = vor.u32 %v7219_v56, %v5588_v24  ;;  %v4825_v38 = vor.u32 %v7024_v29, %v4822_v30  ;;  %v5492_v24 = vld [vmem:[#allocation5 + $0x640] sm:$0xf]  ;;  %v7195_v56 = vld [vmem:[#allocation5 + $0x654] sm:$0xf0]  ;;  %v7000_v30 = vld [vmem:[#allocation5 + $0x44] sm:$0xf] }
  0xf1   :  { %2165 = vmatpush.bf16.msra.mxu0 %v4725_v42  ;;  %v5017_v42 = vor.u32 %v7072_v31, %v5014_v33  ;;  %v7243_v29 = vld [vmem:[#allocation5 + $0x7d4] sm:$0xf0]  ;;  %v4726_v31 = vld [vmem:[#allocation5 + $0x58] sm:$0xf0]  ;;  %v7048_v33 = vld [vmem:[#allocation5 + $0x1c4] sm:$0xf] }
  0xf2   :  { %2178 = vmatpush.bf16.msra.mxu1 %v4917_v45  ;;  %v4798_v45 = vld [vmem:[#allocation5 + $0xe8] sm:$0xf0]  ;;  %v5685_v40 = vor.u32 %v7243_v29, %v5684_v26  ;;  %v7120_v18 = vld [vmem:[#allocation5 + $0x404] sm:$0xf] }
  0xf3   :  { %2191 = vmatpush.bf16.msra.mxu2 %v5109_v46  ;;  %v7066_v46 = vld [vmem:[#allocation5 + $0x254] sm:$0xf]  ;;  %v4801_v51 = vor.u32 %v7018_v44, %v4798_v45  ;;  %v7264_v26 = vld [vmem:[#allocation5 + $0x884] sm:$0xf] }
  0xf4   :  { %2204 = vmatpush.bf16.msra.mxu3 %v5301_v50  ;;  %v5757_v50 = vor.u32 %v7261_v43, %v5756_v41  ;;  %v4993_v59 = vor.u32 %v7066_v46, %v4990_v47  ;;  %v4729_v41 = vor.u32 %v7000_v30, %v4726_v31  ;;  %v7237_v43 = vld [vmem:[#allocation5 + $0x7a4] sm:$0xf0]  ;;  %v6994_v44 = vld [vmem:[#allocation5 + $0x14] sm:$0xf]  ;;  %v4702_v47 = vld [vmem:[#allocation5 + $0x28] sm:$0xf0] }
  0xf5   :  { %2166 = vmatpush.bf16.msra.mxu0 %v4701_v61  ;;  %v1960_v49 = vpop.f32.mrf.mxu0  ;;  %v7012_v61 = vld [vmem:[#allocation5 + $0xa4] sm:$0xf]  ;;  %v7114_v31 = vld [vmem:[#allocation5 + $0x3d4] sm:$0xf] }
  0xf6   :  { %2179 = vmatpush.bf16.msra.mxu1 %v4893_v1  ;;  %v1961_v57 = vadd.f32 %v1960_v49, %v7859_v34  ;;  %v1973_v58 = vpop.f32.mrf.mxu1  ;;  %v4777_v5 = vor.u32 %v7012_v61, %v4774_v62  ;;  %v4969_v34 = vor.u32 %v7060_v63, %v4966_v0  ;;  %v4894_v49 = vld [vmem:[#allocation5 + $0x1a8] sm:$0xf0]  ;;  %v4705_v61 = vor.u32 %v6994_v44, %v4702_v47  ;;  %v7276_v62 = vld [vmem:[#allocation5 + $0x8e4] sm:$0xf]  ;;  %v5830_v63 = vld [vmem:[#allocation5 + $0x8f8] sm:$0xf0] }
  0xf7   :  { %2192 = vmatpush.bf16.msra.mxu2 %v5085_v2  ;;  %v5541_v2 = vor.u32 %v7207_v53, %v5540_v52  ;;  %v5254_v52 = vld [vmem:[#allocation5 + $0x478] sm:$0xf0]  ;;  %v7180_v53 = vld [vmem:[#allocation5 + $0x5e4] sm:$0xf] }
  0xf8   :  { %2205 = vmatpush.bf16.msra.mxu3 %v5277_v6  ;;  %2167 = vmatmul.bf16.vlgmr.msra.gmra.mxu0 %v7816_v9  ;;  %v1974_v1 = vadd.f32 %v1973_v58, %v1961_v57  ;;  %v5516_v6 = vld [vmem:[#allocation5 + $0x670] sm:$0xf]  ;;  %v5446_v57 = vld [vmem:[#allocation5 + $0x5f8] sm:$0xf0]  ;;  %v7228_v58 = vld [vmem:[#allocation5 + $0x764] sm:$0xf] }
  0xf9   :  { %2211 = vmatpush.bf16.msrb.mxu0 %v5637_v7  ;;  %2180 = vmatmul.bf16.vlgmr.msra.gmra.mxu1 %v7823_v25  ;;  %v7201_v7 = vld [vmem:[#allocation5 + $0x684] sm:$0xf0]  ;;  %v7156_v47 = vld [vmem:[#allocation5 + $0x524] sm:$0xf] }
  0xfa   :  { %2224 = vmatpush.bf16.msrb.mxu1 %v5829_v54  ;;  %2193 = vmatmul.bf16.vlgmr.msra.gmra.mxu2 %v7814_v8  ;;  %v5708_v54 = vld [vmem:[#allocation5 + $0x7f0] sm:$0xf]  ;;  %v5517_v19 = vor.u32 %v7201_v7, %v5516_v6  ;;  %v5230_v6 = vld [vmem:[#allocation5 + $0x448] sm:$0xf0]  ;;  %v7174_v7 = vld [vmem:[#allocation5 + $0x5b4] sm:$0xf] }
  0xfb   :  { %2237 = vmatpush.bf16.msrb.mxu2 %v4873_v10  ;;  %2206 = vmatmul.bf16.vlgmr.msra.gmra.mxu3 %v7818_v15 }
  0xfc   :  { %2250 = vmatpush.bf16.msrb.mxu3 %v5065_v14 }
  0xfd   :  { %2212 = vmatpush.bf16.msrb.mxu0 %v5613_v21  ;;  %v1986_v10 = vpop.f32.mrf.mxu2  ;;  %v1962_v21 = vpop.f32.mrf.mxu0 }
  0xfe   :  { %2225 = vmatpush.bf16.msrb.mxu1 %v5805_v22  ;;  %v1987_v14 = vadd.f32 %v1986_v10, %v1974_v1  ;;  %v1999_v16 = vpop.f32.mrf.mxu3  ;;  %v5709_v22 = vor.u32 %v7249_v11, %v5708_v54  ;;  %v5833_v54 = vor.u32 %v7276_v62, %v5830_v63  ;;  %v5422_v10 = vld [vmem:[#allocation5 + $0x5c8] sm:$0xf0]  ;;  %v7168_v21 = vld [vmem:[#allocation5 + $0x584] sm:$0xf]  ;;  %v7150_v62 = vld [vmem:[#allocation5 + $0x4f4] sm:$0xf] }
  0xff   :  { %2238 = vmatpush.bf16.msrb.mxu2 %v4849_v23  ;;  %v4753_v23 = vor.u32 %v7006_v12, %v4750_v13  ;;  %v5614_v11 = vld [vmem:[#allocation5 + $0x748] sm:$0xf0]  ;;  %v7270_v12 = vld [vmem:[#allocation5 + $0x8b4] sm:$0xf] }
 0x100   :  { %2251 = vmatpush.bf16.msrb.mxu3 %v5041_v27  ;;  %v7866_v20 = vadd.f32 %v1999_v16, %v1987_v14  ;;  %v1975_v27 = vpop.f32.mrf.mxu1  ;;  %v5806_v13 = vld [vmem:[#allocation5 + $0x8c8] sm:$0xf0]  ;;  %v5425_v16 = vor.u32 %v7174_v7, %v5422_v10 }
 0x101   :  { %2213 = vmatpush.bf16.msrb.mxu0 %v5589_v36  ;;  %v4918_v36 = vld [vmem:[#allocation5 + $0x1d8] sm:$0xf0]  ;;  %v5710_v7 = vld [vmem:[#allocation5 + $0x808] sm:$0xf0] }
 0x102   :  { %2226 = vmatpush.bf16.msrb.mxu1 %v5781_v37  ;;  %v5493_v37 = vor.u32 %v7195_v56, %v5492_v24  ;;  %v4921_v46 = vor.u32 %v7048_v33, %v4918_v36  ;;  %v7216_v24 = vld [vmem:[#allocation5 + $0x704] sm:$0xf]  ;;  %v5590_v56 = vld [vmem:[#allocation5 + $0x718] sm:$0xf0]  ;;  %v5182_v33 = vld [vmem:[#allocation5 + $0x3e8] sm:$0xf0] }
 0x103   :  { %2239 = vmatpush.bf16.msrb.mxu2 %v4825_v38  ;;  %v5468_v38 = vld [vmem:[#allocation5 + $0x610] sm:$0xf]  ;;  %v5782_v27 = vld [vmem:[#allocation5 + $0x898] sm:$0xf0]  ;;  %v5593_v30 = vor.u32 %v7216_v24, %v5590_v56  ;;  %v7162_v36 = vld [vmem:[#allocation5 + $0x554] sm:$0xf] }
 0x104   :  { %2252 = vmatpush.bf16.msrb.mxu3 %v5017_v42  ;;  %v5660_v42 = vld [vmem:[#allocation5 + $0x790] sm:$0xf]  ;;  %v5469_v55 = vor.u32 %v7189_v39, %v5468_v38  ;;  %v5374_v38 = vld [vmem:[#allocation5 + $0x568] sm:$0xf0]  ;;  %v7210_v39 = vld [vmem:[#allocation5 + $0x6d4] sm:$0xf] }
 0x105   :  { %2214 = vmatpush.bf16.msrb.mxu0 %v5565_v48  ;;  %v1988_v45 = vpop.f32.mrf.mxu2  ;;  %v7042_v48 = vld [vmem:[#allocation5 + $0x194] sm:$0xf]  ;;  %v5661_v60 = vor.u32 %v7237_v43, %v5660_v42  ;;  %v5185_v42 = vor.u32 %v7114_v31, %v5182_v33 }
 0x106   :  { %2227 = vmatpush.bf16.msrb.mxu1 %v5757_v50  ;;  %v2001_v50 = vpop.f32.mrf.mxu3  ;;  %v4897_v0 = vor.u32 %v7042_v48, %v4894_v49  ;;  %v7108_v45 = vld [vmem:[#allocation5 + $0x3a4] sm:$0xf]  ;;  %v7090_v56 = vld [vmem:[#allocation5 + $0x314] sm:$0xf] }
 0x107   :  { %2240 = vmatpush.bf16.msrb.mxu2 %v4801_v51  ;;  %v7132_v51 = vld [vmem:[#allocation5 + $0x464] sm:$0xf]  ;;  %v5350_v50 = vld [vmem:[#allocation5 + $0x538] sm:$0xf0]  ;;  %v7186_v31 = vld [vmem:[#allocation5 + $0x614] sm:$0xf] }
 0x108   :  { %2253 = vmatpush.bf16.msrb.mxu3 %v4993_v59  ;;  %v5638_v59 = vld [vmem:[#allocation5 + $0x778] sm:$0xf0]  ;;  %v5257_v1 = vor.u32 %v7132_v51, %v5254_v52  ;;  %v7204_v51 = vld [vmem:[#allocation5 + $0x6a4] sm:$0xf] }
 0x109   :  { %2215 = vmatpush.bf16.msrb.mxu0 %v5541_v2  ;;  %v5449_v2 = vor.u32 %v7180_v53, %v5446_v57  ;;  %v5542_v52 = vld [vmem:[#allocation5 + $0x6b8] sm:$0xf0]  ;;  %v7252_v53 = vld [vmem:[#allocation5 + $0x824] sm:$0xf] }
 0x10a   :  { %2228 = vmatpush.bf16.msrb.mxu1 %v5733_v3  ;;  %v5641_v3 = vor.u32 %v7228_v58, %v5638_v59  ;;  %v5353_v58 = vor.u32 %v7156_v47, %v5350_v50  ;;  %v5545_v59 = vor.u32 %v7204_v51, %v5542_v52  ;;  %v5980_v52 = vld [vmem:[#allocation8 + $0x120] sm:$0xf] }
 0x10b   :  { %2241 = vmatpush.bf16.msrb.mxu2 %v4777_v5  ;;  %v7126_v5 = vld [vmem:[#allocation5 + $0x434] sm:$0xf] }
 0x10c   :  { %2254 = vmatpush.bf16.msrb.mxu3 %v4969_v34  ;;  %v7222_v34 = vld [vmem:[#allocation5 + $0x734] sm:$0xf]  ;;  %v5233_v14 = vor.u32 %v7126_v5, %v5230_v6 }
 0x10d   :  { %2216 = vmatpush.bf16.msrb.mxu0 %v5517_v19  ;;  %v5617_v17 = vor.u32 %v7222_v34, %v5614_v11  ;;  %v5206_v19 = vld [vmem:[#allocation5 + $0x418] sm:$0xf0]  ;;  %v7246_v6 = vld [vmem:[#allocation5 + $0x7f4] sm:$0xf] }
 0x10e   :  { %2229 = vmatpush.bf16.msrb.mxu1 %v5709_v22  ;;  %v5809_v22 = vor.u32 %v7270_v12, %v5806_v13  ;;  %v7096_v12 = vld [vmem:[#allocation5 + $0x344] sm:$0xf]  ;;  %v5110_v13 = vld [vmem:[#allocation5 + $0x358] sm:$0xf0] }
 0x10f   :  { %2242 = vmatpush.bf16.msrb.mxu2 %v4753_v23  ;;  %v5398_v23 = vld [vmem:[#allocation5 + $0x598] sm:$0xf0]  ;;  %v5113_v24 = vor.u32 %v7096_v12, %v5110_v13  ;;  %v6556_v12 = vld [vmem:[#allocation8 + $0x5a0] sm:$0xf] }
 0x110   :  { %2255 = vmatpush.bf16.msrb.mxu3 %v4945_v28  ;;  %v5209_v28 = vor.u32 %v7120_v18, %v5206_v19  ;;  %v5401_v29 = vor.u32 %v7168_v21, %v5398_v23  ;;  %v5302_v18 = vld [vmem:[#allocation5 + $0x4d8] sm:$0xf0]  ;;  %v7192_v19 = vld [vmem:[#allocation5 + $0x644] sm:$0xf] }
 0x111   :  { %2217 = vmatpush.bf16.msrb.mxu0 %v5493_v37  ;;  %v5785_v37 = vor.u32 %v7264_v26, %v5782_v27  ;;  %v5494_v21 = vld [vmem:[#allocation5 + $0x658] sm:$0xf0]  ;;  %v5086_v26 = vld [vmem:[#allocation5 + $0x328] sm:$0xf0] }
 0x112   :  { %2230 = vmatpush.bf16.msrb.mxu1 %v5685_v40  ;;  %v5566_v40 = vld [vmem:[#allocation5 + $0x6e8] sm:$0xf0]  ;;  %v5686_v23 = vld [vmem:[#allocation5 + $0x7d8] sm:$0xf0] }
 0x113   :  { %2243 = vmatpush.bf16.msrb.mxu2 %v4729_v41  ;;  %v7258_v41 = vld [vmem:[#allocation5 + $0x854] sm:$0xf]  ;;  %v5569_v44 = vor.u32 %v7210_v39, %v5566_v40  ;;  %v5662_v39 = vld [vmem:[#allocation5 + $0x7a8] sm:$0xf0]  ;;  %v7463_v13 = vld [vmem:[#allocation8 + $0x5b4] sm:$0xf0] }
 0x114   :  { %2256 = vmatpush.bf16.msrb.mxu3 %v4921_v46  ;;  %v5158_v46 = vld [vmem:[#allocation5 + $0x3b8] sm:$0xf0] }
 0x115   :  { %2218 = vmatpush.bf16.msrb.mxu0 %v5469_v55  ;;  %v7872_v43 = vpop.f32.mrf.mxu0  ;;  %v5734_v55 = vld [vmem:[#allocation5 + $0x838] sm:$0xf0]  ;;  %v5161_v57 = vor.u32 %v7108_v45, %v5158_v46  ;;  %v6388_v45 = vld [vmem:[#allocation8 + $0x450] sm:$0xf]  ;;  %v7421_v46 = vld [vmem:[#allocation8 + $0x464] sm:$0xf0] }
 0x116   :  { %2231 = vmatpush.bf16.msrb.mxu1 %v5661_v60  ;;  %v7874_v48 = vpop.f32.mrf.mxu1  ;;  %v7102_v60 = vld [vmem:[#allocation5 + $0x374] sm:$0xf] }
 0x117   :  { %2244 = vmatpush.bf16.msrb.mxu2 %v4705_v61  ;;  %v5134_v61 = vld [vmem:[#allocation5 + $0x388] sm:$0xf0] }
 0x118   :  { %2257 = vmatpush.bf16.msrb.mxu3 %v4897_v0  ;;  %2219 = vmatmul.bf16.vlgmr.msrb.gmra.mxu0 %v7826_v32  ;;  %v5737_v0 = vor.u32 %v7252_v53, %v5734_v55  ;;  %v7319_v53 = vld [vmem:[#allocation8 + $0x134] sm:$0xf0]  ;;  %v6172_v55 = vld [vmem:[#allocation8 + $0x2a0] sm:$0xf] }
 0x119   :  { %2263 = vmatpush.bf16.msra.mxu0 %v5257_v1  ;;  %2232 = vmatmul.bf16.vlgmr.msrb.gmra.mxu1 %v7828_v35  ;;  %v5326_v1 = vld [vmem:[#allocation5 + $0x508] sm:$0xf0] }
 0x11a   :  { %2276 = vmatpush.bf16.msra.mxu1 %v5449_v2  ;;  %2245 = vmatmul.bf16.vlgmr.msrb.gmra.mxu2 %v7816_v9  ;;  %v5758_v9 = vld [vmem:[#allocation5 + $0x868] sm:$0xf0]  ;;  %v7198_v2 = vld [vmem:[#allocation5 + $0x674] sm:$0xf]  ;;  %v5329_v34 = vor.u32 %v7150_v62, %v5326_v1  ;;  %v6364_v1 = vld [vmem:[#allocation8 + $0x420] sm:$0xf] }
 0x11b   :  { %2289 = vmatpush.bf16.msra.mxu2 %v5641_v3  ;;  %2258 = vmatmul.bf16.vlgmr.msrb.gmra.mxu3 %v7823_v25  ;;  %v5377_v25 = vor.u32 %v7162_v36, %v5374_v38  ;;  %v5761_v49 = vor.u32 %v7258_v41, %v5758_v9  ;;  %v5518_v3 = vld [vmem:[#allocation5 + $0x688] sm:$0xf0]  ;;  %v7234_v38 = vld [vmem:[#allocation5 + $0x794] sm:$0xf] }
 0x11c   :  { %2302 = vmatpush.bf16.msra.mxu3 %v5833_v54  ;;  %v5137_v54 = vor.u32 %v7102_v60, %v5134_v61  ;;  %v5521_v11 = vor.u32 %v7198_v2, %v5518_v3  ;;  %v6004_v41 = vld [vmem:[#allocation8 + $0x150] sm:$0xf]  ;;  %v7325_v9 = vld [vmem:[#allocation8 + $0x164] sm:$0xf0]  ;;  %v5665_v50 = vor.u32 %v7234_v38, %v5662_v39  ;;  %v7415_v2 = vld [vmem:[#allocation8 + $0x434] sm:$0xf0]  ;;  %v5981_v3 = vor.u32 %v7319_v53, %v5980_v52 }
 0x11d   :  { %2264 = vmatpush.bf16.msra.mxu0 %v5233_v14  ;;  %v7876_v63 = vpop.f32.mrf.mxu2  ;;  %v2014_v10 = vpop.f32.mrf.mxu0  ;;  %v7144_v14 = vld [vmem:[#allocation5 + $0x4c4] sm:$0xf]  ;;  %v6005_v51 = vor.u32 %v7325_v9, %v6004_v41  ;;  %v6580_v61 = vld [vmem:[#allocation8 + $0x5d0] sm:$0xf]  ;;  %v7469_v62 = vld [vmem:[#allocation8 + $0x5e4] sm:$0xf0] }
 0x11e   :  { %2277 = vmatpush.bf16.msra.mxu1 %v5425_v16  ;;  %v7878_v5 = vpop.f32.mrf.mxu3  ;;  %v2027_v16 = vpop.f32.mrf.mxu1  ;;  %v5305_v27 = vor.u32 %v7144_v14, %v5302_v18  ;;  %v7409_v18 = vld [vmem:[#allocation8 + $0x404] sm:$0xf0]  ;;  %v6100_v39 = vld [vmem:[#allocation8 + $0x210] sm:$0xf]  ;;  %v7451_v41 = vld [vmem:[#allocation8 + $0x554] sm:$0xf0] }
 0x11f   :  { %2290 = vmatpush.bf16.msra.mxu2 %v5617_v17  ;;  %v5713_v17 = vor.u32 %v7246_v6, %v5710_v7  ;;  %v5956_v6 = vld [vmem:[#allocation8 + $0xf0] sm:$0xf]  ;;  %v7313_v7 = vld [vmem:[#allocation8 + $0x104] sm:$0xf0] }
 0x120   :  { %2303 = vmatpush.bf16.msra.mxu3 %v5809_v22  ;;  %v7240_v22 = vld [vmem:[#allocation5 + $0x7c4] sm:$0xf]  ;;  %v7361_v16 = vld [vmem:[#allocation8 + $0x284] sm:$0xf0]  ;;  %v6484_v52 = vld [vmem:[#allocation8 + $0x510] sm:$0xf] }
 0x121   :  { %2265 = vmatpush.bf16.msra.mxu0 %v5209_v28  ;;  %v5497_v28 = vor.u32 %v7192_v19, %v5494_v21  ;;  %v5689_v36 = vor.u32 %v7240_v22, %v5686_v23  ;;  %v5957_v19 = vor.u32 %v7313_v7, %v5956_v6  ;;  %v5932_v21 = vld [vmem:[#allocation8 + $0xc0] sm:$0xf]  ;;  %v7307_v22 = vld [vmem:[#allocation8 + $0xd4] sm:$0xf0]  ;;  %v6557_v23 = vor.u32 %v7463_v13, %v6556_v12  ;;  %v7349_v9 = vld [vmem:[#allocation8 + $0x224] sm:$0xf0] }
 0x122   :  { %2278 = vmatpush.bf16.msra.mxu1 %v5401_v29  ;;  %v7138_v29 = vld [vmem:[#allocation5 + $0x494] sm:$0xf]  ;;  %v7445_v53 = vld [vmem:[#allocation8 + $0x524] sm:$0xf0] }
 0x123   :  { %2291 = vmatpush.bf16.msra.mxu2 %v5593_v30  ;;  %v5278_v30 = vld [vmem:[#allocation5 + $0x4a8] sm:$0xf0]  ;;  %v6244_v13 = vld [vmem:[#allocation8 + $0x330] sm:$0xf] }
 0x124   :  { %2304 = vmatpush.bf16.msra.mxu3 %v5785_v37  ;;  %v5470_v37 = vld [vmem:[#allocation5 + $0x628] sm:$0xf0]  ;;  %v5281_v47 = vor.u32 %v7138_v29, %v5278_v30  ;;  %v5908_v30 = vld [vmem:[#allocation8 + $0x90] sm:$0xf] }
 0x125   :  { %2266 = vmatpush.bf16.msra.mxu0 %v5185_v42  ;;  %v2040_v33 = vpop.f32.mrf.mxu2  ;;  %v6196_v42 = vld [vmem:[#allocation8 + $0x2d0] sm:$0xf]  ;;  %v7337_v12 = vld [vmem:[#allocation8 + $0x1c4] sm:$0xf0] }
 0x126   :  { %2279 = vmatpush.bf16.msra.mxu1 %v5377_v25  ;;  %v2053_v40 = vpop.f32.mrf.mxu3  ;;  %v5089_v25 = vor.u32 %v7090_v56, %v5086_v26  ;;  %v6532_v56 = vld [vmem:[#allocation8 + $0x570] sm:$0xf] }
 0x127   :  { %2292 = vmatpush.bf16.msra.mxu2 %v5569_v44  ;;  %v7373_v44 = vld [vmem:[#allocation8 + $0x2e4] sm:$0xf0]  ;;  %v6508_v40 = vld [vmem:[#allocation8 + $0x540] sm:$0xf] }
 0x128   :  { %2305 = vmatpush.bf16.msra.mxu3 %v5761_v49  ;;  %v5473_v49 = vor.u32 %v7186_v31, %v5470_v37  ;;  %v7301_v31 = vld [vmem:[#allocation8 + $0xa4] sm:$0xf0] }
 0x129   :  { %2267 = vmatpush.bf16.msra.mxu0 %v5161_v57  ;;  %v6197_v57 = vor.u32 %v7373_v44, %v6196_v42  ;;  %v6292_v42 = vld [vmem:[#allocation8 + $0x390] sm:$0xf]  ;;  %v5909_v44 = vor.u32 %v7301_v31, %v5908_v30  ;;  %v7517_v30 = vld [vmem:[#allocation8 + $0x764] sm:$0xf0] }
 0x12a   :  { %2280 = vmatpush.bf16.msra.mxu1 %v5353_v58  ;;  %v6389_v58 = vor.u32 %v7421_v46, %v6388_v45  ;;  %v5884_v45 = vld [vmem:[#allocation8 + $0x60] sm:$0xf]  ;;  %v7295_v46 = vld [vmem:[#allocation8 + $0x74] sm:$0xf0] }
 0x12b   :  { %2293 = vmatpush.bf16.msra.mxu2 %v5545_v59  ;;  %v7880_v59 = vld [vmem:[#allocation7] sm:$0x3f] }
 0x12c   :  { %2306 = vmatpush.bf16.msra.mxu3 %v5737_v0  ;;  %v397_v60 = vperm.slane %v7880_v59, 2  ;;  %v7367_v0 = vld [vmem:[#allocation8 + $0x2b4] sm:$0xf0] }
 0x12d   :  { %2268 = vmatpush.bf16.msra.mxu0 %v5137_v54  ;;  %v6581_v54 = vor.u32 %v7469_v62, %v6580_v61  ;;  %v6173_v10 = vor.u32 %v7367_v0, %v6172_v55  ;;  %v5885_v0 = vor.u32 %v7295_v46, %v5884_v45  ;;  %v5982_v45 = vld [vmem:[#allocation8 + $0x138] sm:$0xf0]  ;;  %v7370_v46 = vld [vmem:[#allocation8 + $0x2d4] sm:$0xf] }
 0x12e   :  { %2281 = vmatpush.bf16.msra.mxu1 %v5329_v34  ;;  %v6365_v34 = vor.u32 %v7415_v2, %v6364_v1  ;;  %v2013_v14 = vadd.f32 %v7872_v43, %v397_v60  ;;  %v7457_v43 = vld [vmem:[#allocation8 + $0x584] sm:$0xf0]  ;;  %v5860_v1 = vld [vmem:[#allocation8 + $0x30] sm:$0xf] }
 0x12f   :  { %2294 = vmatpush.bf16.msra.mxu2 %v5521_v11  ;;  %v6148_v11 = vld [vmem:[#allocation8 + $0x270] sm:$0xf]  ;;  %v6533_v33 = vor.u32 %v7457_v43, %v6532_v56  ;;  %v7289_v2 = vld [vmem:[#allocation8 + $0x44] sm:$0xf0]  ;;  %v6220_v43 = vld [vmem:[#allocation8 + $0x300] sm:$0xf] }
 0x130   :  { %2307 = vmatpush.bf16.msra.mxu3 %v5713_v17  ;;  %v6340_v17 = vld [vmem:[#allocation8 + $0x3f0] sm:$0xf]  ;;  %v2026_v26 = vadd.f32 %v7874_v48, %v2013_v14  ;;  %v7385_v14 = vld [vmem:[#allocation8 + $0x344] sm:$0xf0] }
 0x131   :  { %2269 = vmatpush.bf16.msra.mxu0 %v5113_v24  ;;  %v6341_v24 = vor.u32 %v7409_v18, %v6340_v17  ;;  %v5836_v17 = vld [vmem:[#allocation8] sm:$0xf]  ;;  %v7283_v18 = vld [vmem:[#allocation8 + $0x14] sm:$0xf0] }
 0x132   :  { %2282 = vmatpush.bf16.msra.mxu1 %v5305_v27  ;;  %v7355_v27 = vld [vmem:[#allocation8 + $0x254] sm:$0xf0]  ;;  %v2039_v48 = vadd.f32 %v7876_v63, %v2026_v26  ;;  %v6268_v63 = vld [vmem:[#allocation8 + $0x360] sm:$0xf]  ;;  %v5837_v31 = vor.u32 %v7283_v18, %v5836_v17  ;;  %v7298_v17 = vld [vmem:[#allocation8 + $0x94] sm:$0xf] }
 0x133   :  { %2295 = vmatpush.bf16.msra.mxu2 %v5497_v28  ;;  %v6316_v28 = vld [vmem:[#allocation8 + $0x3c0] sm:$0xf]  ;;  %v7379_v26 = vld [vmem:[#allocation8 + $0x314] sm:$0xf0] }
 0x134   :  { %2308 = vmatpush.bf16.msra.mxu3 %v5689_v36  ;;  %v2052_v55 = vadd.f32 %v7878_v5, %v2039_v48  ;;  %v6052_v5 = vld [vmem:[#allocation8 + $0x1b0] sm:$0xf] }
 0x135   :  { %2270 = vmatpush.bf16.msra.mxu0 %v5089_v25  ;;  %v2064_v29 = vpop.f32.mrf.mxu0  ;;  %v7397_v25 = vld [vmem:[#allocation8 + $0x3a4] sm:$0xf0] }
 0x136   :  { %2283 = vmatpush.bf16.msra.mxu1 %v5281_v47  ;;  %v7889_v36 = vpop.f32.mrf.mxu1  ;;  %v6509_v47 = vor.u32 %v7451_v41, %v6508_v40  ;;  %v7316_v40 = vld [vmem:[#allocation8 + $0x124] sm:$0xf] }
 0x137   :  { %2296 = vmatpush.bf16.msra.mxu2 %v5473_v49  ;;  %v6101_v49 = vor.u32 %v7349_v9, %v6100_v39  ;;  %v398_v9 = vperm.slane %v7880_v59, 3 }
 0x138   :  { %2309 = vmatpush.bf16.msra.mxu3 %v5665_v50  ;;  %2271 = vmatmul.bf16.vlgmr.msra.gmra.mxu0 %v7814_v8  ;;  %v6149_v8 = vor.u32 %v7361_v16, %v6148_v11  ;;  %v6293_v50 = vor.u32 %v7397_v25, %v6292_v42  ;;  %v2065_v11 = vadd.f32 %v2064_v29, %v2052_v55  ;;  %v6412_v42 = vld [vmem:[#allocation8 + $0x480] sm:$0xf]  ;;  %v7427_v25 = vld [vmem:[#allocation8 + $0x494] sm:$0xf0]  ;;  %v7310_v55 = vld [vmem:[#allocation8 + $0xf4] sm:$0xf] }
 0x139   :  { %4069 = vmatpush.bf16.msrb.mxu0 %v6005_v51  ;;  %2284 = vmatmul.bf16.vlgmr.msra.gmra.mxu1 %v7818_v15  ;;  %v6124_v15 = vld [vmem:[#allocation8 + $0x240] sm:$0xf]  ;;  %v5861_v16 = vor.u32 %v7289_v2, %v5860_v1  ;;  %v6724_v2 = vld [vmem:[#allocation8 + $0x6f0] sm:$0xf] }
 0x13a   :  { %4082 = vmatpush.bf16.msrb.mxu1 %v6197_v57  ;;  %2297 = vmatmul.bf16.vlgmr.msra.gmra.mxu2 %v7826_v32  ;;  %v7403_v32 = vld [vmem:[#allocation8 + $0x3d4] sm:$0xf0]  ;;  %v6125_v37 = vor.u32 %v7355_v27, %v6124_v15  ;;  %v6076_v51 = vld [vmem:[#allocation8 + $0x1e0] sm:$0xf]  ;;  %v7433_v15 = vld [vmem:[#allocation8 + $0x4c4] sm:$0xf0]  ;;  %v2078_v56 = vadd.f32 %v7889_v36, %v2065_v11  ;;  %v6221_v36 = vor.u32 %v7379_v26, %v6220_v43 }
 0x13b   :  { %4095 = vmatpush.bf16.msrb.mxu2 %v6389_v58  ;;  %2310 = vmatmul.bf16.vlgmr.msra.gmra.mxu3 %v7828_v35  ;;  %v5933_v35 = vor.u32 %v7307_v22, %v5932_v21  ;;  %v6317_v38 = vor.u32 %v7403_v32, %v6316_v28  ;;  %v7343_v57 = vld [vmem:[#allocation8 + $0x1f4] sm:$0xf0]  ;;  %v6053_v22 = vor.u32 %v7337_v12, %v6052_v5  ;;  %v7322_v27 = vld [vmem:[#allocation8 + $0x154] sm:$0xf]  ;;  %v6006_v32 = vld [vmem:[#allocation8 + $0x168] sm:$0xf0] }
 0x13c   :  { %4108 = vmatpush.bf16.msrb.mxu3 %v6581_v54  ;;  %v7391_v58 = vld [vmem:[#allocation8 + $0x374] sm:$0xf0]  ;;  %v6077_v7 = vor.u32 %v7343_v57, %v6076_v51  ;;  %v2317_v41 = vmax.f32 %v2078_v56, 0.0  ;;  %v6009_v48 = vor.u32 %v7322_v27, %v6006_v32  ;;  %v6413_v51 = vor.u32 %v7427_v25, %v6412_v42  ;;  %v5934_v5 = vld [vmem:[#allocation8 + $0xd8] sm:$0xf0] }
 0x13d   :  { %4070 = vmatpush.bf16.msrb.mxu0 %v5981_v3  ;;  %v7893_v60 = vpop.f32.mrf.mxu2  ;;  %v2066_v62 = vpop.f32.mrf.mxu0  ;;  %v6485_v3 = vor.u32 %v7445_v53, %v6484_v52  ;;  %v6269_v54 = vor.u32 %v7391_v58, %v6268_v63  ;;  %v5985_v53 = vor.u32 %v7316_v40, %v5982_v45  ;;  %v5958_v58 = vld [vmem:[#allocation8 + $0x108] sm:$0xf0]  ;;  %v6700_v12 = vld [vmem:[#allocation8 + $0x6c0] sm:$0xf]  ;;  %v7292_v26 = vld [vmem:[#allocation8 + $0x64] sm:$0xf] }
 0x13e   :  { %4083 = vmatpush.bf16.msrb.mxu1 %v6173_v10  ;;  %v7895_v61 = vpop.f32.mrf.mxu3  ;;  %v2079_v6 = vpop.f32.mrf.mxu1  ;;  %v6460_v10 = vld [vmem:[#allocation8 + $0x4e0] sm:$0xf]  ;;  %v7905_v52 = vpack.c.bf16 %v2317_v41, %v2317_v41  ;;  %v2091_v63 = vadd.f32 %v7893_v60, %v398_v9  ;;  %v7364_v62 = vld [vmem:[#allocation8 + $0x2a4] sm:$0xf]  ;;  %v5886_v32 = vld [vmem:[#allocation8 + $0x78] sm:$0xf0] }
 0x13f   :  { %4096 = vmatpush.bf16.msrb.mxu2 %v6365_v34  ;;  %v7439_v34 = vld [vmem:[#allocation8 + $0x4f4] sm:$0xf0]  ;;  %v5961_v6 = vor.u32 %v7310_v55, %v5958_v58  ;;  %v7286_v40 = vld [vmem:[#allocation8 + $0x34] sm:$0xf]  ;;  %v5862_v9 = vld [vmem:[#allocation8 + $0x48] sm:$0xf0] }
 0x140   :  { %4109 = vmatpush.bf16.msrb.mxu3 %v6557_v23  ;;  %v6461_v21 = vor.u32 %v7439_v34, %v6460_v10  ;;  %v6245_v23 = vor.u32 %v7385_v14, %v6244_v13  ;;  %v2104_v60 = vadd.f32 %v7895_v61, %v2091_v63  ;;  %v7358_v10 = vld [vmem:[#allocation8 + $0x274] sm:$0xf]  ;;  %v6150_v34 = vld [vmem:[#allocation8 + $0x288] sm:$0xf0]  ;;  %v7499_v13 = vld [vmem:[#allocation8 + $0x6d4] sm:$0xf0] }
 0x141   :  { %4071 = vmatpush.bf16.msrb.mxu0 %v5957_v19  ;;  %v6028_v19 = vld [vmem:[#allocation8 + $0x180] sm:$0xf]  ;;  %v6153_v18 = vor.u32 %v7358_v10, %v6150_v34  ;;  %v6701_v61 = vor.u32 %v7499_v13, %v6700_v12  ;;  %v7340_v42 = vld [vmem:[#allocation8 + $0x1e4] sm:$0xf]  ;;  %v6078_v25 = vld [vmem:[#allocation8 + $0x1f8] sm:$0xf0] }
 0x142   :  { %4084 = vmatpush.bf16.msrb.mxu1 %v6149_v8  ;;  %v7331_v8 = vld [vmem:[#allocation8 + $0x194] sm:$0xf0]  ;;  %v5838_v55 = vld [vmem:[#allocation8 + $0x18] sm:$0xf0]  ;;  %v6964_v63 = vld [vmem:[#allocation8 + $0x8d0] sm:$0xf] }
 0x143   :  { %4097 = vmatpush.bf16.msrb.mxu2 %v6341_v24  ;;  %v6436_v24 = vld [vmem:[#allocation8 + $0x4b0] sm:$0xf]  ;;  %v6029_v39 = vor.u32 %v7331_v8, %v6028_v19  ;;  %v6126_v8 = vld [vmem:[#allocation8 + $0x258] sm:$0xf0]  ;;  %v7565_v58 = vld [vmem:[#allocation8 + $0x8e4] sm:$0xf0] }
 0x144   :  { %4110 = vmatpush.bf16.msrb.mxu3 %v6533_v33  ;;  %v6437_v33 = vor.u32 %v7433_v15, %v6436_v24  ;;  %v6676_v24 = vld [vmem:[#allocation8 + $0x690] sm:$0xf]  ;;  %v7493_v15 = vld [vmem:[#allocation8 + $0x6a4] sm:$0xf0]  ;;  %v7418_v10 = vld [vmem:[#allocation8 + $0x454] sm:$0xf] }
 0x145   :  { %4072 = vmatpush.bf16.msrb.mxu0 %v5933_v35  ;;  %v2092_v28 = vpop.f32.mrf.mxu2  ;;  %v6772_v35 = vld [vmem:[#allocation8 + $0x750] sm:$0xf]  ;;  %v6390_v34 = vld [vmem:[#allocation8 + $0x468] sm:$0xf0]  ;;  %v6940_v13 = vld [vmem:[#allocation8 + $0x8a0] sm:$0xf] }
 0x146   :  { %4085 = vmatpush.bf16.msrb.mxu1 %v6125_v37  ;;  %v2105_v29 = vpop.f32.mrf.mxu3  ;;  %v2315_v37 = vmax.f32 %v7856_v4, 0.0  ;;  %v6748_v4 = vld [vmem:[#allocation8 + $0x720] sm:$0xf] }
 0x147   :  { %4098 = vmatpush.bf16.msrb.mxu2 %v6317_v38  ;;  %v2316_v38 = vmax.f32 %v7866_v20, 0.0  ;;  %v7346_v29 = vld [vmem:[#allocation8 + $0x214] sm:$0xf] }
 0x148   :  { %4111 = vmatpush.bf16.msrb.mxu3 %v6509_v47  ;;  %v6198_v47 = vld [vmem:[#allocation8 + $0x2e8] sm:$0xf0]  ;;  %v7901_v20 = vpack.c.bf16 %v2315_v37, %v2315_v37  ;;  %v6652_v37 = vld [vmem:[#allocation8 + $0x660] sm:$0xf] }
 0x149   :  { %4073 = vmatpush.bf16.msrb.mxu0 %v5909_v44  ;;  %v6773_v44 = vor.u32 %v7517_v30, %v6772_v35  ;;  %v6201_v57 = vor.u32 %v7370_v46, %v6198_v47  ;;  %v6102_v35 = vld [vmem:[#allocation8 + $0x228] sm:$0xf0]  ;;  %v6677_v30 = vor.u32 %v7493_v15, %v6676_v24  ;;  %v6628_v47 = vld [vmem:[#allocation8 + $0x630] sm:$0xf]  ;;  %v7412_v15 = vld [vmem:[#allocation8 + $0x424] sm:$0xf] }
 0x14a   :  { %4086 = vmatpush.bf16.msrb.mxu1 %v6101_v49  ;;  %v7511_v49 = vld [vmem:[#allocation8 + $0x734] sm:$0xf0]  ;;  %v6105_v41 = vor.u32 %v7346_v29, %v6102_v35  ;;  %v6966_v24 = vld [vmem:[#allocation8 + $0x8e8] sm:$0xf0] }
 0x14b   :  { %4099 = vmatpush.bf16.msrb.mxu2 %v6293_v50  ;;  %v7903_v50 = vpack.c.bf16 %v2316_v38, %v2316_v38  ;;  %v6749_v1 = vor.u32 %v7511_v49, %v6748_v4  ;;  %v7487_v38 = vld [vmem:[#allocation8 + $0x674] sm:$0xf0]  ;;  %v7481_v4 = vld [vmem:[#allocation8 + $0x644] sm:$0xf0]  ;;  %v7280_v49 = vld [vmem:[#allocation8 + $0x4] sm:$0xf] }
 0x14c   :  { %4112 = vmatpush.bf16.msrb.mxu3 %v6485_v3  ;;  %v7505_v3 = vld [vmem:[#allocation8 + $0x704] sm:$0xf0] }
 0x14d   :  { %4074 = vmatpush.bf16.msrb.mxu0 %v5885_v0  ;;  %v6174_v0 = vld [vmem:[#allocation8 + $0x2b8] sm:$0xf0]  ;;  %v6725_v11 = vor.u32 %v7505_v3, %v6724_v2  ;;  %v6629_v3 = vor.u32 %v7481_v4, %v6628_v47  ;;  %v7400_v47 = vld [vmem:[#allocation8 + $0x3c4] sm:$0xf] }
 0x14e   :  { %4087 = vmatpush.bf16.msrb.mxu1 %v6077_v7  ;;  %v7304_v7 = vld [vmem:[#allocation8 + $0xc4] sm:$0xf]  ;;  %v6318_v4 = vld [vmem:[#allocation8 + $0x3d8] sm:$0xf0] }
 0x14f   :  { %4100 = vmatpush.bf16.msrb.mxu2 %v6269_v54  ;;  %v6177_v54 = vor.u32 %v7364_v62, %v6174_v0  ;;  %v5937_v14 = vor.u32 %v7304_v7, %v5934_v5  ;;  %v7514_v62 = vld [vmem:[#allocation8 + $0x754] sm:$0xf]  ;;  %v6774_v7 = vld [vmem:[#allocation8 + $0x768] sm:$0xf0]  ;;  %v7475_v5 = vld [vmem:[#allocation8 + $0x614] sm:$0xf0] }
 0x150   :  { %4113 = vmatpush.bf16.msrb.mxu3 %v6461_v21  ;;  %v7334_v0 = vld [vmem:[#allocation8 + $0x1b4] sm:$0xf] }
 0x151   :  { %4075 = vmatpush.bf16.msrb.mxu0 %v5861_v16 }
 0x152   :  { %4088 = vmatpush.bf16.msrb.mxu1 %v6053_v22  ;;  %v5910_v22 = vld [vmem:[#allocation8 + $0xa8] sm:$0xf0] }
 0x153   :  { %4101 = vmatpush.bf16.msrb.mxu2 %v6245_v23  ;;  %v7352_v23 = vld [vmem:[#allocation8 + $0x244] sm:$0xf]  ;;  %v5913_v43 = vor.u32 %v7298_v17, %v5910_v22 }
 0x154   :  { %4114 = vmatpush.bf16.msrb.mxu3 %v6437_v33  ;;  %v6129_v27 = vor.u32 %v7352_v23, %v6126_v8  ;;  %v7508_v17 = vld [vmem:[#allocation8 + $0x724] sm:$0xf]  ;;  %v6750_v23 = vld [vmem:[#allocation8 + $0x738] sm:$0xf0]  ;;  %v6393_v8 = vor.u32 %v7418_v10, %v6390_v34 }
 0x155   :  { %4076 = vmatpush.bf16.msrb.mxu0 %v5837_v31  ;;  %v2116_v16 = vpop.f32.mrf.mxu0  ;;  %v7484_v34 = vld [vmem:[#allocation8 + $0x664] sm:$0xf] }
 0x156   :  { %4089 = vmatpush.bf16.msrb.mxu1 %v6029_v39  ;;  %v2117_v19 = vadd.f32 %v2116_v16, %v2104_v60  ;;  %v2129_v21 = vpop.f32.mrf.mxu1  ;;  %v6604_v60 = vld [vmem:[#allocation8 + $0x600] sm:$0xf]  ;;  %v6777_v16 = vor.u32 %v7514_v62, %v6774_v7  ;;  %v7394_v7 = vld [vmem:[#allocation8 + $0x394] sm:$0xf] }
 0x157   :  { %4102 = vmatpush.bf16.msrb.mxu2 %v6221_v36  ;;  %v5889_v36 = vor.u32 %v7292_v26, %v5886_v32  ;;  %v6916_v26 = vld [vmem:[#allocation8 + $0x870] sm:$0xf]  ;;  %v7502_v32 = vld [vmem:[#allocation8 + $0x6f4] sm:$0xf] }
 0x158   :  { %4077 = vmatmul.bf16.vlgmr.msrb.gmra.mxu0 %v7901_v20  ;;  %4115 = vmatpush.bf16.msrb.mxu3 %v6413_v51  ;;  %v2130_v56 = vadd.f32 %v2129_v21, %v2117_v19  ;;  %v6030_v19 = vld [vmem:[#allocation8 + $0x198] sm:$0xf0]  ;;  %v6605_v21 = vor.u32 %v7475_v5, %v6604_v60  ;;  %v6844_v60 = vld [vmem:[#allocation8 + $0x7e0] sm:$0xf]  ;;  %v7535_v5 = vld [vmem:[#allocation8 + $0x7f4] sm:$0xf0] }
 0x159   :  { %4121 = vmatpush.bf16.msra.mxu0 %v6773_v44  ;;  %4090 = vmatmul.bf16.vlgmr.msrb.gmra.mxu1 %v7903_v50  ;;  %v6653_v44 = vor.u32 %v7487_v38, %v6652_v37  ;;  %v6942_v37 = vld [vmem:[#allocation8 + $0x8b8] sm:$0xf0]  ;;  %v7406_v38 = vld [vmem:[#allocation8 + $0x3f4] sm:$0xf] }
 0x15a   :  { %4103 = vmatmul.bf16.vlgmr.msrb.gmra.mxu2 %v7905_v52 }
 0x15b   :  { %4147 = vmatpush.bf16.msra.mxu2 %v6009_v48 }
 0x15c   :  { %4160 = vmatpush.bf16.msra.mxu3 %v6201_v57  ;;  %v6081_v57 = vor.u32 %v7340_v42, %v6078_v25  ;;  %v6702_v25 = vld [vmem:[#allocation8 + $0x6d8] sm:$0xf0] }
 0x15d   :  { %4122 = vmatpush.bf16.msra.mxu0 %v6749_v1  ;;  %v2142_v28 = vpop.f32.mrf.mxu2  ;;  %v2118_v48 = vpop.f32.mrf.mxu0  ;;  %v6054_v1 = vld [vmem:[#allocation8 + $0x1c8] sm:$0xf0] }
 0x15e   :  { %v2143_v31 = vadd.f32 %v2142_v28, %v2130_v56  ;;  %v2155_v33 = vpop.f32.mrf.mxu3  ;;  %v2131_v45 = vpop.f32.mrf.mxu1  ;;  %v6057_v12 = vor.u32 %v7334_v0, %v6054_v1  ;;  %v6366_v56 = vld [vmem:[#allocation8 + $0x438] sm:$0xf0]  ;;  %v6753_v28 = vor.u32 %v7508_v17, %v6750_v23  ;;  %v7496_v48 = vld [vmem:[#allocation8 + $0x6c4] sm:$0xf]  ;;  %v6678_v0 = vld [vmem:[#allocation8 + $0x6a8] sm:$0xf0] }
 0x15f   :  { %4148 = vmatpush.bf16.msra.mxu2 %v5985_v53  ;;  %v5865_v53 = vor.u32 %v7286_v40, %v5862_v9  ;;  %v7547_v40 = vld [vmem:[#allocation8 + $0x854] sm:$0xf0]  ;;  %v7550_v45 = vld [vmem:[#allocation8 + $0x874] sm:$0xf]  ;;  %v6870_v17 = vld [vmem:[#allocation8 + $0x828] sm:$0xf0] }
 0x160   :  { %4161 = vmatpush.bf16.msra.mxu3 %v6177_v54  ;;  %v2156_v39 = vadd.f32 %v2155_v33, %v2143_v31  ;;  %v6369_v31 = vor.u32 %v7412_v15, %v6366_v56  ;;  %v7556_v33 = vld [vmem:[#allocation8 + $0x8a4] sm:$0xf]  ;;  %v7529_v23 = vld [vmem:[#allocation8 + $0x7c4] sm:$0xf0] }
 0x161   :  { %4123 = vmatpush.bf16.msra.mxu0 %v6725_v11  ;;  %v5841_v11 = vor.u32 %v7280_v49, %v5838_v55  ;;  %v6945_v9 = vor.u32 %v7556_v33, %v6942_v37  ;;  %v6868_v49 = vld [vmem:[#allocation8 + $0x810] sm:$0xf]  ;;  %v6705_v55 = vor.u32 %v7496_v48, %v6702_v25  ;;  %v7472_v33 = vld [vmem:[#allocation8 + $0x604] sm:$0xf]  ;;  %v6796_v37 = vld [vmem:[#allocation8 + $0x780] sm:$0xf] }
 0x162   :  { %v2318_v46 = vmax.f32 %v2156_v39, 0.0  ;;  %v6342_v39 = vld [vmem:[#allocation8 + $0x408] sm:$0xf0]  ;;  %v7466_v48 = vld [vmem:[#allocation8 + $0x5d4] sm:$0xf] }
 0x163   :  { %4149 = vmatpush.bf16.msra.mxu2 %v5961_v6  ;;  %v6965_v6 = vor.u32 %v7565_v58, %v6964_v63 }
 0x164   :  { %4162 = vmatpush.bf16.msra.mxu3 %v6153_v18  ;;  %v7912_v51 = vpack.c.bf16 %v2318_v46, %v2318_v46  ;;  %v7328_v18 = vld [vmem:[#allocation8 + $0x184] sm:$0xf]  ;;  %v6918_v46 = vld [vmem:[#allocation8 + $0x888] sm:$0xf0] }
 0x165   :  { %4124 = vmatpush.bf16.msra.mxu0 %v6701_v61  ;;  %v2144_v2 = vpop.f32.mrf.mxu2  ;;  %4134 = vmatpush.bf16.msra.mxu1 %v6965_v6  ;;  %v7562_v61 = vld [vmem:[#allocation8 + $0x8d4] sm:$0xf]  ;;  %v6921_v58 = vor.u32 %v7550_v45, %v6918_v46  ;;  %v6894_v6 = vld [vmem:[#allocation8 + $0x858] sm:$0xf0]  ;;  %v6822_v45 = vld [vmem:[#allocation8 + $0x7c8] sm:$0xf0] }
 0x166   :  { %4116 = vmatmul.bf16.vlgmr.msrb.gmra.mxu3 %v7912_v51  ;;  %v2157_v54 = vpop.f32.mrf.mxu3  ;;  %v6969_v29 = vor.u32 %v7562_v61, %v6966_v24  ;;  %v6321_v2 = vor.u32 %v7400_v47, %v6318_v4  ;;  %v7478_v61 = vld [vmem:[#allocation8 + $0x634] sm:$0xf]  ;;  %v7422_v46 = vld [vmem:[#allocation8 + $0x46c] sm:$0xf0]  ;;  %v7376_v47 = vld [vmem:[#allocation8 + $0x304] sm:$0xf] }
 0x167   :  { %4150 = vmatpush.bf16.msra.mxu2 %v5937_v14  ;;  %v7559_v14 = vld [vmem:[#allocation8 + $0x8b4] sm:$0xf0]  ;;  %v6294_v54 = vld [vmem:[#allocation8 + $0x3a8] sm:$0xf0]  ;;  %v6222_v4 = vld [vmem:[#allocation8 + $0x318] sm:$0xf0] }
 0x168   :  { %4163 = vmatpush.bf16.msra.mxu3 %v6129_v27  ;;  %v6941_v22 = vor.u32 %v7559_v14, %v6940_v13  ;;  %v7553_v27 = vld [vmem:[#allocation8 + $0x884] sm:$0xf0]  ;;  %v6654_v13 = vld [vmem:[#allocation8 + $0x678] sm:$0xf0]  ;;  %v6297_v14 = vor.u32 %v7394_v7, %v6294_v54  ;;  %v7520_v7 = vld [vmem:[#allocation8 + $0x784] sm:$0xf] }
 0x169   :  { %4125 = vmatpush.bf16.msra.mxu0 %v6677_v30  ;;  %v6917_v35 = vor.u32 %v7553_v27, %v6916_v26  ;;  %v6726_v30 = vld [vmem:[#allocation8 + $0x708] sm:$0xf0]  ;;  %v6798_v54 = vld [vmem:[#allocation8 + $0x798] sm:$0xf0] }
 0x16a   :  { %4135 = vmatpush.bf16.msra.mxu1 %v6941_v22  ;;  %v6820_v22 = vld [vmem:[#allocation8 + $0x7b0] sm:$0xf]  ;;  %v6630_v26 = vld [vmem:[#allocation8 + $0x648] sm:$0xf0] }
 0x16b   :  { %4151 = vmatpush.bf16.msra.mxu2 %v5913_v43  ;;  %v6033_v43 = vor.u32 %v7328_v18, %v6030_v19  ;;  %v7388_v18 = vld [vmem:[#allocation8 + $0x364] sm:$0xf]  ;;  %v6270_v19 = vld [vmem:[#allocation8 + $0x378] sm:$0xf0] }
 0x16c   :  { %4164 = vmatpush.bf16.msra.mxu3 %v6105_v41  ;;  %v6729_v41 = vor.u32 %v7502_v32, %v6726_v30  ;;  %v7532_v32 = vld [vmem:[#allocation8 + $0x7e4] sm:$0xf]  ;;  %v7382_v30 = vld [vmem:[#allocation8 + $0x334] sm:$0xf] }
 0x16d   :  { %4126 = vmatpush.bf16.msra.mxu0 %v6653_v44  ;;  %v6345_v44 = vor.u32 %v7406_v38, %v6342_v39  ;;  %v7523_v38 = vld [vmem:[#allocation8 + $0x794] sm:$0xf0]  ;;  %v6633_v39 = vor.u32 %v7478_v61, %v6630_v26  ;;  %v6510_v61 = vld [vmem:[#allocation8 + $0x558] sm:$0xf0] }
 0x16e   :  { %4136 = vmatpush.bf16.msra.mxu1 %v6917_v35  ;;  %v399_v35 = vperm.slane %v7880_v59, 4 }
 0x16f   :  { %4152 = vmatpush.bf16.msra.mxu2 %v5889_v36  ;;  %v6892_v36 = vld [vmem:[#allocation8 + $0x840] sm:$0xf] }
 0x170   :  { %4165 = vmatpush.bf16.msra.mxu3 %v6081_v57  ;;  %v6893_v42 = vor.u32 %v7547_v40, %v6892_v36  ;;  %v7490_v57 = vld [vmem:[#allocation8 + $0x694] sm:$0xf]  ;;  %v6606_v36 = vld [vmem:[#allocation8 + $0x618] sm:$0xf0] }
 0x171   :  { %4127 = vmatpush.bf16.msra.mxu0 %v6629_v3  ;;  %v7544_v3 = vld [vmem:[#allocation8 + $0x844] sm:$0xf]  ;;  %v6681_v10 = vor.u32 %v7490_v57, %v6678_v0  ;;  %v6558_v0 = vld [vmem:[#allocation8 + $0x5b8] sm:$0xf0] }
 0x172   :  { %4137 = vmatpush.bf16.msra.mxu1 %v6893_v42  ;;  %v6396_v42 = vld [vmem:[#allocation8 + $0x458] sm:$0xf] }
 0x173   :  { %4153 = vmatpush.bf16.msra.mxu2 %v5865_v53  ;;  %v7541_v53 = vld [vmem:[#allocation8 + $0x824] sm:$0xf0] }
 0x174   :  { %4166 = vmatpush.bf16.msra.mxu3 %v6057_v12  ;;  %v6869_v62 = vor.u32 %v7541_v53, %v6868_v49  ;;  %v6845_v12 = vor.u32 %v7535_v5, %v6844_v60  ;;  %v7416_v5 = vld [vmem:[#allocation8 + $0x43c] sm:$0xf0] }
 0x175   :  { %4128 = vmatpush.bf16.msra.mxu0 %v6605_v21  ;;  %v7916_v63 = vpop.f32.mrf.mxu0 }
 0x176   :  { %v7919_v1 = vpop.f32.mrf.mxu1  ;;  %4138 = vmatpush.bf16.msra.mxu1 %v6869_v62  ;;  %v2169_v49 = vadd.f32 %v7916_v63, %v399_v35  ;;  %v7460_v62 = vld [vmem:[#allocation8 + $0x5a4] sm:$0xf]  ;;  %v7442_v35 = vld [vmem:[#allocation8 + $0x514] sm:$0xf] }
 0x177   :  { %4154 = vmatpush.bf16.msra.mxu2 %v5841_v11  ;;  %v6897_v11 = vor.u32 %v7544_v3, %v6894_v6  ;;  %v6372_v3 = vld [vmem:[#allocation8 + $0x428] sm:$0xf]  ;;  %v6225_v6 = vor.u32 %v7376_v47, %v6222_v4  ;;  %v6561_v60 = vor.u32 %v7460_v62, %v6558_v0  ;;  %v7392_v4 = vld [vmem:[#allocation8 + $0x37c] sm:$0xf0]  ;;  %v7430_v62 = vld [vmem:[#allocation8 + $0x4b4] sm:$0xf] }
 0x178   :  { %4167 = vmatpush.bf16.msra.mxu3 %v6033_v43  ;;  %v6821_v43 = vor.u32 %v7529_v23, %v6820_v22  ;;  %v2182_v63 = vadd.f32 %v7919_v1, %v2169_v49  ;;  %v6564_v22 = vld [vmem:[#allocation8 + $0x5a8] sm:$0xf]  ;;  %v7464_v23 = vld [vmem:[#allocation8 + $0x5bc] sm:$0xf0]  ;;  %v7448_v1 = vld [vmem:[#allocation8 + $0x544] sm:$0xf] }
 0x179   :  { %4173 = vmatpush.bf16.msrb.mxu0 %v6393_v8  ;;  %v6657_v8 = vor.u32 %v7484_v34, %v6654_v13  ;;  %v7470_v34 = vld [vmem:[#allocation8 + $0x5ec] sm:$0xf0]  ;;  %v6534_v13 = vld [vmem:[#allocation8 + $0x588] sm:$0xf0]  ;;  %v6513_v26 = vor.u32 %v7448_v1, %v6510_v61  ;;  %v6492_v49 = vld [vmem:[#allocation8 + $0x518] sm:$0xf] }
 0x17a   :  { %4155 = vmatmul.bf16.vlgmr.msra.gmra.mxu2 %v7901_v20  ;;  %4139 = vmatpush.bf16.msra.mxu1 %v6845_v12  ;;  %v7454_v12 = vld [vmem:[#allocation8 + $0x574] sm:$0xf]  ;;  %v7380_v61 = vld [vmem:[#allocation8 + $0x31c] sm:$0xf0] }
 0x17b   :  { %4199 = vmatpush.bf16.msrb.mxu2 %v6777_v16  ;;  %4168 = vmatmul.bf16.vlgmr.msra.gmra.mxu3 %v7903_v50  ;;  %v7538_v16 = vld [vmem:[#allocation8 + $0x814] sm:$0xf] }
 0x17c   :  { %4212 = vmatpush.bf16.msrb.mxu3 %v6969_v29  ;;  %v6873_v56 = vor.u32 %v7538_v16, %v6870_v17  ;;  %v6846_v29 = vld [vmem:[#allocation8 + $0x7f8] sm:$0xf0]  ;;  %v6348_v16 = vld [vmem:[#allocation8 + $0x3f8] sm:$0xf] }
 0x17d   :  { %4174 = vmatpush.bf16.msrb.mxu0 %v6369_v31  ;;  %v7921_v21 = vpop.f32.mrf.mxu2  ;;  %v2170_v24 = vpop.f32.mrf.mxu0  ;;  %v6246_v31 = vld [vmem:[#allocation8 + $0x348] sm:$0xf0]  ;;  %v6849_v40 = vor.u32 %v7532_v32, %v6846_v29  ;;  %v7458_v32 = vld [vmem:[#allocation8 + $0x58c] sm:$0xf0] }
 0x17e   :  { %v7923_v15 = vpop.f32.mrf.mxu3  ;;  %v2183_v27 = vpop.f32.mrf.mxu1  ;;  %4140 = vmatpush.bf16.msra.mxu1 %v6821_v43  ;;  %v6249_v25 = vor.u32 %v7382_v30, %v6246_v31  ;;  %v6565_v43 = vor.u32 %v7464_v23, %v6564_v22  ;;  %v6486_v30 = vld [vmem:[#allocation8 + $0x528] sm:$0xf0]  ;;  %v6300_v31 = vld [vmem:[#allocation8 + $0x398] sm:$0xf]  ;;  %v7314_v22 = vld [vmem:[#allocation8 + $0x10c] sm:$0xf0] }
 0x17f   :  { %4200 = vmatpush.bf16.msrb.mxu2 %v6753_v28  ;;  %v6273_v28 = vor.u32 %v7388_v18, %v6270_v19  ;;  %v6537_v18 = vor.u32 %v7454_v12, %v6534_v13  ;;  %v7410_v19 = vld [vmem:[#allocation8 + $0x40c] sm:$0xf0]  ;;  %v7404_v27 = vld [vmem:[#allocation8 + $0x3dc] sm:$0xf0]  ;;  %v6228_v23 = vld [vmem:[#allocation8 + $0x308] sm:$0xf] }
 0x180   :  { %4213 = vmatpush.bf16.msrb.mxu3 %v6945_v9  ;;  %v6582_v9 = vld [vmem:[#allocation8 + $0x5e8] sm:$0xf0]  ;;  %v6349_v24 = vor.u32 %v7410_v19, %v6348_v16  ;;  %v7424_v16 = vld [vmem:[#allocation8 + $0x484] sm:$0xf]  ;;  %v5964_v19 = vld [vmem:[#allocation8 + $0xf8] sm:$0xf] }
 0x181   :  { %4175 = vmatpush.bf16.msrb.mxu0 %v6345_v44  ;;  %v7526_v44 = vld [vmem:[#allocation8 + $0x7b4] sm:$0xf]  ;;  %v6585_v59 = vor.u32 %v7466_v48, %v6582_v9 }
 0x183   :  { %4201 = vmatpush.bf16.msrb.mxu2 %v6729_v41  ;;  %v6797_v41 = vor.u32 %v7523_v38, %v6796_v37  ;;  %v6489_v38 = vor.u32 %v7442_v35, %v6486_v30  ;;  %v7308_v35 = vld [vmem:[#allocation8 + $0xdc] sm:$0xf0] }
 0x184   :  { %4214 = vmatpush.bf16.msrb.mxu3 %v6921_v58  ;;  %v6825_v58 = vor.u32 %v7526_v44, %v6822_v45  ;;  %v6012_v44 = vld [vmem:[#allocation8 + $0x158] sm:$0xf]  ;;  %v7326_v45 = vld [vmem:[#allocation8 + $0x16c] sm:$0xf0] }
 0x185   :  { %4176 = vmatpush.bf16.msrb.mxu0 %v6321_v2  ;;  %4141 = vmatpush.bf16.msra.mxu1 %v6797_v41  ;;  %v2196_v53 = vpop.f32.mrf.mxu2  ;;  %v6397_v2 = vor.u32 %v7422_v46, %v6396_v42  ;;  %v7436_v42 = vld [vmem:[#allocation8 + $0x4e4] sm:$0xf] }
 0x186   :  { %v2209_v57 = vpop.f32.mrf.mxu3  ;;  %v7446_v53 = vld [vmem:[#allocation8 + $0x52c] sm:$0xf0] }
 0x187   :  { %4202 = vmatpush.bf16.msrb.mxu2 %v6705_v55  ;;  %v6609_v55 = vor.u32 %v7472_v33, %v6606_v36  ;;  %v7398_v33 = vld [vmem:[#allocation8 + $0x3ac] sm:$0xf0]  ;;  %v6516_v36 = vld [vmem:[#allocation8 + $0x548] sm:$0xf]  ;;  %v6013_v57 = vor.u32 %v7326_v45, %v6012_v44 }
 0x188   :  { %4215 = vmatpush.bf16.msrb.mxu3 %v6897_v11  ;;  %v6801_v11 = vor.u32 %v7520_v7, %v6798_v54  ;;  %v6301_v9 = vor.u32 %v7398_v33, %v6300_v31  ;;  %v6252_v7 = vld [vmem:[#allocation8 + $0x338] sm:$0xf]  ;;  %v6493_v54 = vor.u32 %v7446_v53, %v6492_v49  ;;  %v6420_v33 = vld [vmem:[#allocation8 + $0x488] sm:$0xf]  ;;  %v5942_v49 = vld [vmem:[#allocation8 + $0xe0] sm:$0xf0] }
 0x189   :  { %4177 = vmatpush.bf16.msrb.mxu0 %v6297_v14  ;;  %4186 = vmatpush.bf16.msrb.mxu1 %v6585_v59  ;;  %v6373_v14 = vor.u32 %v7416_v5, %v6372_v3  ;;  %v6276_v59 = vld [vmem:[#allocation8 + $0x368] sm:$0xf] }
 0x18b   :  { %4203 = vmatpush.bf16.msrb.mxu2 %v6681_v10  ;;  %v6588_v10 = vld [vmem:[#allocation8 + $0x5d8] sm:$0xf] }
 0x18c   :  { %4216 = vmatpush.bf16.msrb.mxu3 %v6873_v56  ;;  %v6589_v17 = vor.u32 %v7470_v34, %v6588_v10  ;;  %v6324_v56 = vld [vmem:[#allocation8 + $0x3c8] sm:$0xf]  ;;  %v7386_v10 = vld [vmem:[#allocation8 + $0x34c] sm:$0xf0] }
 0x18d   :  { %4178 = vmatpush.bf16.msrb.mxu0 %v6273_v28  ;;  %4187 = vmatpush.bf16.msrb.mxu1 %v6561_v60  ;;  %v6540_v28 = vld [vmem:[#allocation8 + $0x578] sm:$0xf]  ;;  %v6438_v60 = vld [vmem:[#allocation8 + $0x4c8] sm:$0xf0] }
 0x18e   :  { %v6541_v37 = vor.u32 %v7458_v32, %v6540_v28  ;;  %v6441_v12 = vor.u32 %v7430_v62, %v6438_v60  ;;  %v6229_v28 = vor.u32 %v7380_v61, %v6228_v23  ;;  %v7512_v23 = vld [vmem:[#allocation8 + $0x73c] sm:$0xf0]  ;;  %v7287_v61 = vld [vmem:[#allocation8 + $0x3c] sm:$0xf] }
 0x18f   :  { %4204 = vmatpush.bf16.msrb.mxu2 %v6657_v8  ;;  %v2195_v8 = vadd.f32 %v7921_v21, %v2182_v63  ;;  %v6325_v21 = vor.u32 %v7404_v27, %v6324_v56  ;;  %v6468_v63 = vld [vmem:[#allocation8 + $0x4e8] sm:$0xf]  ;;  %v7434_v56 = vld [vmem:[#allocation8 + $0x4cc] sm:$0xf0]  ;;  %v5965_v27 = vor.u32 %v7314_v22, %v5964_v19 }
 0x190   :  { %4217 = vmatpush.bf16.msrb.mxu3 %v6849_v40  ;;  %v7452_v40 = vld [vmem:[#allocation8 + $0x55c] sm:$0xf0] }
 0x191   :  { %4179 = vmatpush.bf16.msrb.mxu0 %v6249_v25  ;;  %4188 = vmatpush.bf16.msrb.mxu1 %v6537_v18  ;;  %v2208_v29 = vadd.f32 %v7923_v15, %v2195_v8  ;;  %v6462_v25 = vld [vmem:[#allocation8 + $0x4f8] sm:$0xf0]  ;;  %v6517_v46 = vor.u32 %v7452_v40, %v6516_v36  ;;  %v6253_v18 = vor.u32 %v7386_v10, %v6252_v7  ;;  %v5916_v40 = vld [vmem:[#allocation8 + $0x98] sm:$0xf] }
 0x192   :  { %v6465_v47 = vor.u32 %v7436_v42, %v6462_v25  ;;  %v7311_v42 = vld [vmem:[#allocation8 + $0xfc] sm:$0xf]  ;;  %v5966_v25 = vld [vmem:[#allocation8 + $0x110] sm:$0xf0] }
 0x193   :  { %4205 = vmatpush.bf16.msrb.mxu2 %v6633_v39 }
 0x194   :  { %4218 = vmatpush.bf16.msrb.mxu3 %v6825_v58  ;;  %v5988_v58 = vld [vmem:[#allocation8 + $0x128] sm:$0xf] }
 0x195   :  { %4180 = vmatpush.bf16.msrb.mxu0 %v6225_v6  ;;  %4189 = vmatpush.bf16.msrb.mxu1 %v6513_v26  ;;  %v2220_v39 = vpop.f32.mrf.mxu0  ;;  %v7320_v6 = vld [vmem:[#allocation8 + $0x13c] sm:$0xf0]  ;;  %v6014_v26 = vld [vmem:[#allocation8 + $0x170] sm:$0xf0] }
 0x196   :  { %v2221_v41 = vadd.f32 %v2220_v39, %v2208_v29  ;;  %v2233_v48 = vpop.f32.mrf.mxu1  ;;  %v5940_v29 = vld [vmem:[#allocation8 + $0xc8] sm:$0xf]  ;;  %v5990_v39 = vld [vmem:[#allocation8 + $0x140] sm:$0xf0] }
 0x197   :  { %4206 = vmatpush.bf16.msrb.mxu2 %v6609_v55  ;;  %v5941_v36 = vor.u32 %v7308_v35, %v5940_v29 }
 0x198   :  { %4219 = vmatpush.bf16.msrb.mxu3 %v6801_v11  ;;  %v2234_v15 = vadd.f32 %v2233_v48, %v2221_v41  ;;  %v7440_v11 = vld [vmem:[#allocation8 + $0x4fc] sm:$0xf0]  ;;  %v7302_v41 = vld [vmem:[#allocation8 + $0xac] sm:$0xf0] }
 0x199   :  { %4190 = vmatpush.bf16.msrb.mxu1 %v6489_v38  ;;  %v6469_v8 = vor.u32 %v7440_v11, %v6468_v63  ;;  %v7317_v38 = vld [vmem:[#allocation8 + $0x12c] sm:$0xf]  ;;  %v5917_v45 = vor.u32 %v7302_v41, %v5916_v40  ;;  %v7284_v63 = vld [vmem:[#allocation8 + $0x1c] sm:$0xf0]  ;;  %v6782_v40 = vld [vmem:[#allocation8 + $0x770] sm:$0xf0] }
 0x19a   :  { %v2319_v55 = vmax.f32 %v2234_v15, 0.0  ;;  %v7601_v15 = vld [vmem:[#allocation7] sm:$0x3f] }
 0x19b   :  { %4251 = vmatpush.bf16.msra.mxu2 %v6397_v2  ;;  %v6277_v2 = vor.u32 %v7392_v4, %v6276_v59  ;;  %v400_v44 = vperm.slane %v7601_v15, 5  ;;  %v5892_v59 = vld [vmem:[#allocation8 + $0x68] sm:$0xf]  ;;  %v7305_v4 = vld [vmem:[#allocation8 + $0xcc] sm:$0xf] }
 0x19c   :  { %4264 = vmatpush.bf16.msra.mxu3 %v6589_v17  ;;  %v7930_v0 = vpack.c.bf16 %v2319_v55, %v2319_v55  ;;  %v6414_v17 = vld [vmem:[#allocation8 + $0x498] sm:$0xf0]  ;;  %v5945_v62 = vor.u32 %v7305_v4, %v5942_v49  ;;  %v6708_v49 = vld [vmem:[#allocation8 + $0x6c8] sm:$0xf] }
 0x19d   :  { %4191 = vmatpush.bf16.msrb.mxu1 %v6465_v47  ;;  %v7932_v3 = vpop.f32.mrf.mxu2  ;;  %v2222_v34 = vpop.f32.mrf.mxu0  ;;  %v6417_v1 = vor.u32 %v7424_v16, %v6414_v17  ;;  %v5969_v47 = vor.u32 %v7311_v42, %v5966_v25  ;;  %v5894_v16 = vld [vmem:[#allocation8 + $0x80] sm:$0xf0] }
 0x19e   :  { %v7934_v5 = vpop.f32.mrf.mxu3  ;;  %4129 = vmatmul.bf16.vlgmr.msra.gmra.mxu0 %v7930_v0  ;;  %4207 = vmatmul.bf16.vlgmr.msrb.gmra.mxu2 %v7930_v0  ;;  %v2235_v13 = vpop.f32.mrf.mxu1  ;;  %v2247_v53 = vadd.f32 %v7932_v3, %v400_v44  ;;  %v5844_v34 = vld [vmem:[#allocation8 + $0x8] sm:$0xf]  ;;  %v6780_v3 = vld [vmem:[#allocation8 + $0x758] sm:$0xf]  ;;  %v7368_v44 = vld [vmem:[#allocation8 + $0x2bc] sm:$0xf0] }
 0x19f   :  { %4252 = vmatpush.bf16.msra.mxu2 %v6373_v14  ;;  %4225 = vmatpush.bf16.msra.mxu0 %v6013_v57  ;;  %v5989_v14 = vor.u32 %v7320_v6, %v5988_v58  ;;  %v5868_v57 = vld [vmem:[#allocation8 + $0x38] sm:$0xf]  ;;  %v7290_v58 = vld [vmem:[#allocation8 + $0x4c] sm:$0xf0]  ;;  %v5918_v6 = vld [vmem:[#allocation8 + $0xb0] sm:$0xf0]  ;;  %v5845_v17 = vor.u32 %v7284_v63, %v5844_v34 }
 0x1a0   :  { %4265 = vmatpush.bf16.msra.mxu3 %v6565_v43  ;;  %v7323_v43 = vld [vmem:[#allocation8 + $0x15c] sm:$0xf]  ;;  %v2260_v7 = vadd.f32 %v7934_v5, %v2247_v53  ;;  %v5869_v10 = vor.u32 %v7290_v58, %v5868_v57  ;;  %v7518_v13 = vld [vmem:[#allocation8 + $0x76c] sm:$0xf0]  ;;  %v6756_v5 = vld [vmem:[#allocation8 + $0x728] sm:$0xf] }
 0x1a1   :  { %4192 = vmatpush.bf16.msrb.mxu1 %v6441_v12  ;;  %v7500_v53 = vld [vmem:[#allocation8 + $0x6dc] sm:$0xf0]  ;;  %v6758_v57 = vld [vmem:[#allocation8 + $0x740] sm:$0xf0]  ;;  %v6684_v34 = vld [vmem:[#allocation8 + $0x698] sm:$0xf] }
 0x1a2   :  { %v7494_v63 = vld [vmem:[#allocation8 + $0x6ac] sm:$0xf0] }
 0x1a3   :  { %4253 = vmatpush.bf16.msra.mxu2 %v6349_v24  ;;  %v6444_v24 = vld [vmem:[#allocation8 + $0x4b8] sm:$0xf]  ;;  %4226 = vmatpush.bf16.msra.mxu0 %v5989_v14  ;;  %v7293_v14 = vld [vmem:[#allocation8 + $0x6c] sm:$0xf] }
 0x1a4   :  { %4266 = vmatpush.bf16.msra.mxu3 %v6541_v37  ;;  %v6445_v30 = vor.u32 %v7434_v56, %v6444_v24  ;;  %v7428_v37 = vld [vmem:[#allocation8 + $0x49c] sm:$0xf0]  ;;  %v5897_v22 = vor.u32 %v7293_v14, %v5894_v16  ;;  %v5870_v24 = vld [vmem:[#allocation8 + $0x50] sm:$0xf0]  ;;  %v6132_v14 = vld [vmem:[#allocation8 + $0x248] sm:$0xf] }
 0x1a5   :  { %4193 = vmatpush.bf16.msrb.mxu1 %v6417_v1  ;;  %v2248_v32 = vpop.f32.mrf.mxu2  ;;  %v6421_v48 = vor.u32 %v7428_v37, %v6420_v33  ;;  %v5873_v35 = vor.u32 %v7287_v61, %v5870_v24  ;;  %v7506_v33 = vld [vmem:[#allocation8 + $0x70c] sm:$0xf0]  ;;  %v7281_v37 = vld [vmem:[#allocation8 + $0xc] sm:$0xf]  ;;  %v7356_v16 = vld [vmem:[#allocation8 + $0x25c] sm:$0xf0] }
 0x1a6   :  { %v2261_v31 = vpop.f32.mrf.mxu3  ;;  %v7374_v32 = vld [vmem:[#allocation8 + $0x2ec] sm:$0xf0]  ;;  %v6710_v61 = vld [vmem:[#allocation8 + $0x6e0] sm:$0xf0]  ;;  %v6133_v24 = vor.u32 %v7356_v16, %v6132_v14 }
 0x1a7   :  { %4254 = vmatpush.bf16.msra.mxu2 %v6325_v21  ;;  %v6017_v21 = vor.u32 %v7323_v43, %v6014_v26  ;;  %4227 = vmatpush.bf16.msra.mxu0 %v5965_v27  ;;  %v6757_v27 = vor.u32 %v7512_v23, %v6756_v5  ;;  %v6732_v31 = vld [vmem:[#allocation8 + $0x6f8] sm:$0xf]  ;;  %v6660_v23 = vld [vmem:[#allocation8 + $0x668] sm:$0xf] }
 0x1a8   :  { %4267 = vmatpush.bf16.msra.mxu3 %v6517_v46  ;;  %v7296_v46 = vld [vmem:[#allocation8 + $0x7c] sm:$0xf0]  ;;  %v6733_v25 = vor.u32 %v7506_v33, %v6732_v31  ;;  %v7491_v31 = vld [vmem:[#allocation8 + $0x69c] sm:$0xf]  ;;  %v6686_v33 = vld [vmem:[#allocation8 + $0x6b0] sm:$0xf0] }
 0x1a9   :  { %v5893_v55 = vor.u32 %v7296_v46, %v5892_v59  ;;  %v6182_v59 = vld [vmem:[#allocation8 + $0x2c0] sm:$0xf0] }
 0x1ab   :  { %4255 = vmatpush.bf16.msra.mxu2 %v6301_v9  ;;  %v5993_v9 = vor.u32 %v7317_v38, %v5990_v39  ;;  %4228 = vmatpush.bf16.msra.mxu0 %v5941_v36  ;;  %v5846_v38 = vld [vmem:[#allocation8 + $0x20] sm:$0xf0]  ;;  %v7515_v36 = vld [vmem:[#allocation8 + $0x75c] sm:$0xf] }
 0x1ac   :  { %4268 = vmatpush.bf16.msra.mxu3 %v6493_v54  ;;  %v5849_v15 = vor.u32 %v7281_v37, %v5846_v38  ;;  %v6785_v4 = vor.u32 %v7515_v36, %v6782_v40  ;;  %v6084_v36 = vld [vmem:[#allocation8 + $0x1e8] sm:$0xf] }
 0x1ae   :  { %4181 = vmatmul.bf16.vlgmr.msrb.gmra.mxu0 %v7905_v52 }
 0x1af   :  { %4256 = vmatpush.bf16.msra.mxu2 %v6277_v2  ;;  %4229 = vmatpush.bf16.msra.mxu0 %v5917_v45  ;;  %v7299_v2 = vld [vmem:[#allocation8 + $0x9c] sm:$0xf]  ;;  %v7365_v45 = vld [vmem:[#allocation8 + $0x2ac] sm:$0xf] }
 0x1b0   :  { %4269 = vmatpush.bf16.msra.mxu3 %v6469_v8  ;;  %v5921_v12 = vor.u32 %v7299_v2, %v5918_v6  ;;  %v6156_v2 = vld [vmem:[#allocation8 + $0x278] sm:$0xf]  ;;  %v6709_v6 = vor.u32 %v7500_v53, %v6708_v49  ;;  %v7485_v49 = vld [vmem:[#allocation8 + $0x66c] sm:$0xf]  ;;  %v6662_v53 = vld [vmem:[#allocation8 + $0x680] sm:$0xf0] }
 0x1b3   :  { %4257 = vmatpush.bf16.msra.mxu2 %v6253_v18  ;;  %4230 = vmatpush.bf16.msra.mxu0 %v5893_v55  ;;  %v6781_v18 = vor.u32 %v7518_v13, %v6780_v3  ;;  %v7509_v55 = vld [vmem:[#allocation8 + $0x72c] sm:$0xf] }
 0x1b4   :  { %4270 = vmatpush.bf16.msra.mxu3 %v6445_v30  ;;  %v7371_v30 = vld [vmem:[#allocation8 + $0x2dc] sm:$0xf] }
 0x1b5   :  { %v2272_v54 = vpop.f32.mrf.mxu0 }
 0x1b6   :  { %v2285_v60 = vpop.f32.mrf.mxu1  ;;  %v2273_v11 = vadd.f32 %v2272_v54, %v2260_v7  ;;  %v7362_v7 = vld [vmem:[#allocation8 + $0x28c] sm:$0xf0]  ;;  %v7359_v54 = vld [vmem:[#allocation8 + $0x27c] sm:$0xf] }
 0x1b7   :  { %4258 = vmatpush.bf16.msra.mxu2 %v6229_v28  ;;  %4231 = vmatpush.bf16.msra.mxu0 %v5869_v10  ;;  %v6204_v28 = vld [vmem:[#allocation8 + $0x2d8] sm:$0xf]  ;;  %v6761_v10 = vor.u32 %v7509_v55, %v6758_v57  ;;  %v6157_v3 = vor.u32 %v7362_v7, %v6156_v2  ;;  %v7338_v2 = vld [vmem:[#allocation8 + $0x1cc] sm:$0xf0]  ;;  %v6062_v7 = vld [vmem:[#allocation8 + $0x1d0] sm:$0xf0] }
 0x1b8   :  { %4271 = vmatpush.bf16.msra.mxu3 %v6421_v48  ;;  %v2286_v19 = vadd.f32 %v2285_v60, %v2273_v11  ;;  %v6205_v41 = vor.u32 %v7374_v32, %v6204_v28  ;;  %v6158_v60 = vld [vmem:[#allocation8 + $0x290] sm:$0xf0]  ;;  %v7503_v11 = vld [vmem:[#allocation8 + $0x6fc] sm:$0xf]  ;;  %v7350_v28 = vld [vmem:[#allocation8 + $0x22c] sm:$0xf0] }
 0x1b9   :  { %v6161_v13 = vor.u32 %v7359_v54, %v6158_v60  ;;  %v7347_v32 = vld [vmem:[#allocation8 + $0x21c] sm:$0xf]  ;;  %v6665_v60 = vor.u32 %v7485_v49, %v6662_v53  ;;  %v7554_v49 = vld [vmem:[#allocation8 + $0x88c] sm:$0xf0] }
 0x1ba   :  { %4259 = vmatmul.bf16.vlgmr.msra.gmra.mxu2 %v7905_v52  ;;  %v7551_v53 = vld [vmem:[#allocation8 + $0x87c] sm:$0xf] }
 0x1bb   :  { %4303 = vmatpush.bf16.msrb.mxu2 %v6017_v21  ;;  %4232 = vmatpush.bf16.msra.mxu0 %v5845_v17  ;;  %v6206_v21 = vld [vmem:[#allocation8 + $0x2f0] sm:$0xf0]  ;;  %v6685_v17 = vor.u32 %v7494_v63, %v6684_v34  ;;  %v6374_v63 = vld [vmem:[#allocation8 + $0x440] sm:$0xf0] }
 0x1bc   :  { %v6209_v48 = vor.u32 %v7371_v30, %v6206_v21  ;;  %v6636_v30 = vld [vmem:[#allocation8 + $0x638] sm:$0xf]  ;;  %v7482_v21 = vld [vmem:[#allocation8 + $0x64c] sm:$0xf0] }
 0x1bd   :  { %v2298_v8 = vpop.f32.mrf.mxu2  ;;  %v2274_v43 = vpop.f32.mrf.mxu0 }
 0x1be   :  { %v2311_v1 = vpop.f32.mrf.mxu3  ;;  %v2299_v56 = vadd.f32 %v2298_v8, %v2286_v19  ;;  %v2287_v26 = vpop.f32.mrf.mxu1  ;;  %4233 = vmatmul.bf16.vlgmr.msra.gmra.mxu0 %v7901_v20  ;;  %v6134_v19 = vld [vmem:[#allocation8 + $0x260] sm:$0xf0]  ;;  %v7488_v8 = vld [vmem:[#allocation8 + $0x67c] sm:$0xf0] }
 0x1bf   :  { %4304 = vmatpush.bf16.msrb.mxu2 %v5993_v9  ;;  %4277 = vmatpush.bf16.msrb.mxu0 %v6781_v18  ;;  %v6180_v9 = vld [vmem:[#allocation8 + $0x2a8] sm:$0xf]  ;;  %v7353_v18 = vld [vmem:[#allocation8 + $0x24c] sm:$0xf]  ;;  %v6108_v26 = vld [vmem:[#allocation8 + $0x218] sm:$0xf] }
 0x1c0   :  { %v2312_v29 = vadd.f32 %v2311_v1, %v2299_v56  ;;  %v6181_v58 = vor.u32 %v7368_v44, %v6180_v9  ;;  %v7497_v1 = vld [vmem:[#allocation8 + $0x6cc] sm:$0xf]  ;;  %v6137_v56 = vor.u32 %v7353_v18, %v6134_v19  ;;  %v6109_v38 = vor.u32 %v7350_v28, %v6108_v26  ;;  %v7344_v9 = vld [vmem:[#allocation8 + $0x1fc] sm:$0xf0]  ;;  %v7407_v26 = vld [vmem:[#allocation8 + $0x3fc] sm:$0xf] }
 0x1c1   :  { %v6689_v44 = vor.u32 %v7491_v31, %v6686_v33  ;;  %v6085_v55 = vor.u32 %v7344_v9, %v6084_v36  ;;  %v7332_v18 = vld [vmem:[#allocation8 + $0x19c] sm:$0xf0]  ;;  %v7329_v19 = vld [vmem:[#allocation8 + $0x18c] sm:$0xf]  ;;  %v7423_v33 = vld [vmem:[#allocation8 + $0x474] sm:$0xf0] }
 0x1c2   :  { %v2320_v39 = vmax.f32 %v2312_v29, 0.0  ;;  %v6110_v29 = vld [vmem:[#allocation8 + $0x230] sm:$0xf0]  ;;  %v7473_v28 = vld [vmem:[#allocation8 + $0x60c] sm:$0xf] }
 0x1c3   :  { %4305 = vmatpush.bf16.msrb.mxu2 %v5969_v47  ;;  %4278 = vmatpush.bf16.msrb.mxu0 %v6757_v27  ;;  %v6661_v27 = vor.u32 %v7488_v8, %v6660_v23  ;;  %v6038_v23 = vld [vmem:[#allocation8 + $0x1a0] sm:$0xf0]  ;;  %v6972_v8 = vld [vmem:[#allocation8 + $0x8d8] sm:$0xf]  ;;  %v6404_v31 = vld [vmem:[#allocation8 + $0x460] sm:$0xf] }
 0x1c4   :  { %v7943_v42 = vpack.c.bf16 %v2320_v39, %v2320_v39  ;;  %v6113_v39 = vor.u32 %v7347_v32, %v6110_v29  ;;  %v6614_v32 = vld [vmem:[#allocation8 + $0x620] sm:$0xf0]  ;;  %v7560_v36 = vld [vmem:[#allocation8 + $0x8bc] sm:$0xf0]  ;;  %v7401_v9 = vld [vmem:[#allocation8 + $0x3cc] sm:$0xf] }
 0x1c5   :  { %v2300_v46 = vpop.f32.mrf.mxu2 }
 0x1c6   :  { %v2313_v47 = vpop.f32.mrf.mxu3  ;;  %4142 = vmatmul.bf16.vlgmr.msra.gmra.mxu1 %v7943_v42  ;;  %4220 = vmatmul.bf16.vlgmr.msrb.gmra.mxu3 %v7943_v42  ;;  %v7419_v46 = vld [vmem:[#allocation8 + $0x45c] sm:$0xf] }
 0x1c7   :  { %4306 = vmatpush.bf16.msrb.mxu2 %v5945_v62  ;;  %4238 = vmatpush.bf16.msra.mxu1 %v6205_v41  ;;  %v6185_v62 = vor.u32 %v7365_v45, %v6182_v59  ;;  %v6612_v45 = vld [vmem:[#allocation8 + $0x608] sm:$0xf]  ;;  %v7476_v59 = vld [vmem:[#allocation8 + $0x61c] sm:$0xf0] }
 0x1c8   :  { %4316 = vmatpush.bf16.msrb.mxu3 %v6209_v48  ;;  %4279 = vmatpush.bf16.msrb.mxu0 %v6733_v25  ;;  %v6637_v48 = vor.u32 %v7482_v21, %v6636_v30  ;;  %v7341_v25 = vld [vmem:[#allocation8 + $0x1ec] sm:$0xf] }
 0x1cb   :  { %4307 = vmatpush.bf16.msrb.mxu2 %v5921_v12  ;;  %v6734_v12 = vld [vmem:[#allocation8 + $0x710] sm:$0xf0]  ;;  %4239 = vmatpush.bf16.msra.mxu1 %v6181_v58  ;;  %v6060_v58 = vld [vmem:[#allocation8 + $0x1b8] sm:$0xf] }
 0x1cc   :  { %4317 = vmatpush.bf16.msrb.mxu3 %v6185_v62  ;;  %4280 = vmatpush.bf16.msrb.mxu0 %v6709_v6  ;;  %v6737_v5 = vor.u32 %v7503_v11, %v6734_v12  ;;  %v6613_v62 = vor.u32 %v7476_v59, %v6612_v45  ;;  %v7335_v6 = vld [vmem:[#allocation8 + $0x1bc] sm:$0xf]  ;;  %v6638_v12 = vld [vmem:[#allocation8 + $0x650] sm:$0xf0]  ;;  %v6061_v14 = vor.u32 %v7338_v2, %v6060_v58  ;;  %v6380_v59 = vld [vmem:[#allocation8 + $0x430] sm:$0xf] }
 0x1cd   :  { %v7479_v11 = vld [vmem:[#allocation8 + $0x63c] sm:$0xf]  ;;  %v6065_v16 = vor.u32 %v7335_v6, %v6062_v7  ;;  %v6302_v58 = vld [vmem:[#allocation8 + $0x3b0] sm:$0xf0]  ;;  %v6356_v7 = vld [vmem:[#allocation8 + $0x400] sm:$0xf] }
 0x1cf   :  { %4308 = vmatpush.bf16.msrb.mxu2 %v5897_v22  ;;  %v7948_v22 = vld [vmem:[#allocation10] sm:$0x3f]  ;;  %4240 = vmatpush.bf16.msra.mxu1 %v6157_v3 }
 0x1d0   :  { %4318 = vmatpush.bf16.msrb.mxu3 %v6161_v13  ;;  %v2617_v43 = vperm.slane %v7948_v22, 0  ;;  %4281 = vmatpush.bf16.msrb.mxu0 %v6685_v17  ;;  %v6036_v17 = vld [vmem:[#allocation8 + $0x188] sm:$0xf] }
 0x1d1   :  { %v6037_v29 = vor.u32 %v7332_v18, %v6036_v17  ;;  %v6332_v18 = vld [vmem:[#allocation8 + $0x3d0] sm:$0xf] }
 0x1d3   :  { %4309 = vmatpush.bf16.msrb.mxu2 %v5873_v35  ;;  %v6713_v35 = vor.u32 %v7497_v1, %v6710_v61  ;;  %4241 = vmatpush.bf16.msra.mxu1 %v6133_v24  ;;  %v7566_v1 = vld [vmem:[#allocation8 + $0x8ec] sm:$0xf0]  ;;  %v6641_v24 = vor.u32 %v7479_v11, %v6638_v12  ;;  %v6902_v11 = vld [vmem:[#allocation8 + $0x860] sm:$0xf0]  ;;  %v7389_v12 = vld [vmem:[#allocation8 + $0x36c] sm:$0xf] }
 0x1d4   :  { %4319 = vmatpush.bf16.msrb.mxu3 %v6137_v56  ;;  %4282 = vmatpush.bf16.msrb.mxu0 %v6661_v27  ;;  %v7563_v56 = vld [vmem:[#allocation8 + $0x8dc] sm:$0xf]  ;;  %v6350_v27 = vld [vmem:[#allocation8 + $0x410] sm:$0xf0]  ;;  %v6973_v30 = vor.u32 %v7566_v1, %v6972_v8  ;;  %v7542_v8 = vld [vmem:[#allocation8 + $0x82c] sm:$0xf0] }
 0x1d5   :  { %v4078_v37 = vpop.f32.mrf.mxu0  ;;  %v7539_v1 = vld [vmem:[#allocation8 + $0x81c] sm:$0xf] }
 0x1d6   :  { %v4079_v40 = vadd.f32 %v4078_v37, %v2617_v43  ;;  %v4091_v41 = vpop.f32.mrf.mxu1  ;;  %4194 = vmatmul.bf16.vlgmr.msrb.gmra.mxu1 %v7912_v51  ;;  %4272 = vmatmul.bf16.vlgmr.msra.gmra.mxu3 %v7912_v51  ;;  %v6974_v43 = vld [vmem:[#allocation8 + $0x8f0] sm:$0xf0]  ;;  %v6948_v37 = vld [vmem:[#allocation8 + $0x8a8] sm:$0xf] }
 0x1d7   :  { %4310 = vmatpush.bf16.msrb.mxu2 %v5849_v15  ;;  %v6086_v15 = vld [vmem:[#allocation8 + $0x200] sm:$0xf0]  ;;  %4242 = vmatpush.bf16.msra.mxu1 %v6109_v38  ;;  %v6977_v21 = vor.u32 %v7563_v56, %v6974_v43  ;;  %v6353_v38 = vor.u32 %v7407_v26, %v6350_v27  ;;  %v7383_v56 = vld [vmem:[#allocation8 + $0x33c] sm:$0xf]  ;;  %v6254_v43 = vld [vmem:[#allocation8 + $0x350] sm:$0xf0] }
 0x1d8   :  { %v4092_v47 = vadd.f32 %v4091_v41, %v4079_v40  ;;  %4320 = vmatpush.bf16.msrb.mxu3 %v6113_v39  ;;  %v6089_v57 = vor.u32 %v7341_v25, %v6086_v15  ;;  %4283 = vmatpush.bf16.msrb.mxu0 %v6637_v48  ;;  %v6617_v39 = vor.u32 %v7473_v28, %v6614_v32  ;;  %v7557_v40 = vld [vmem:[#allocation8 + $0x8ac] sm:$0xf]  ;;  %v6950_v41 = vld [vmem:[#allocation8 + $0x8c0] sm:$0xf0] }
 0x1d9   :  { %v6326_v25 = vld [vmem:[#allocation8 + $0x3e0] sm:$0xf0]  ;;  %v6405_v15 = vor.u32 %v7423_v33, %v6404_v31  ;;  %v6953_v45 = vor.u32 %v7557_v40, %v6950_v41  ;;  %v7536_v31 = vld [vmem:[#allocation8 + $0x7fc] sm:$0xf0]  ;;  %v7533_v33 = vld [vmem:[#allocation8 + $0x7ec] sm:$0xf] }
 0x1da   :  { %4311 = vmatmul.bf16.vlgmr.msrb.gmra.mxu2 %v7901_v20  ;;  %v6020_v40 = vld [vmem:[#allocation8 + $0x160] sm:$0xf] }
 0x1db   :  { %4355 = vmatpush.bf16.msra.mxu2 %v6785_v4  ;;  %v6398_v4 = vld [vmem:[#allocation8 + $0x470] sm:$0xf0]  ;;  %4243 = vmatpush.bf16.msra.mxu1 %v6085_v55 }
 0x1dc   :  { %v6401_v54 = vor.u32 %v7419_v46, %v6398_v4  ;;  %4321 = vmatpush.bf16.msrb.mxu3 %v6089_v57  ;;  %4284 = vmatpush.bf16.msrb.mxu0 %v6613_v62  ;;  %v7417_v46 = vld [vmem:[#allocation8 + $0x444] sm:$0xf0]  ;;  %v6329_v4 = vor.u32 %v7401_v9, %v6326_v25  ;;  %v6926_v55 = vld [vmem:[#allocation8 + $0x890] sm:$0xf0]  ;;  %v7395_v57 = vld [vmem:[#allocation8 + $0x39c] sm:$0xf] }
 0x1dd   :  { %v4104_v34 = vpop.f32.mrf.mxu2  ;;  %v4080_v13 = vpop.f32.mrf.mxu0  ;;  %v6381_v62 = vor.u32 %v7417_v46, %v6380_v59  ;;  %v6929_v6 = vor.u32 %v7551_v53, %v6926_v55  ;;  %v6284_v9 = vld [vmem:[#allocation8 + $0x370] sm:$0xf]  ;;  %v7393_v25 = vld [vmem:[#allocation8 + $0x384] sm:$0xf0]  ;;  %v7527_v59 = vld [vmem:[#allocation8 + $0x7bc] sm:$0xf] }
 0x1de   :  { %v7953_v3 = vadd.f32 %v4104_v34, %v4092_v47  ;;  %v6924_v47 = vld [vmem:[#allocation8 + $0x878] sm:$0xf]  ;;  %v7548_v34 = vld [vmem:[#allocation8 + $0x85c] sm:$0xf0]  ;;  %v6278_v13 = vld [vmem:[#allocation8 + $0x380] sm:$0xf0]  ;;  %v6285_v55 = vor.u32 %v7393_v25, %v6284_v9 }
 0x1df   :  { %4356 = vmatpush.bf16.msra.mxu2 %v6761_v10  ;;  %v7413_v10 = vld [vmem:[#allocation8 + $0x42c] sm:$0xf]  ;;  %4244 = vmatpush.bf16.msra.mxu1 %v6061_v14  ;;  %v6925_v2 = vor.u32 %v7554_v49, %v6924_v47  ;;  %v6830_v46 = vld [vmem:[#allocation8 + $0x7d0] sm:$0xf0]  ;;  %v2618_v47 = vperm.slane %v7948_v22, 1 }
 0x1e0   :  { %4329 = vmatpush.bf16.msra.mxu0 %v6401_v54  ;;  %v6377_v61 = vor.u32 %v7413_v10, %v6374_v63  ;;  %4322 = vmatpush.bf16.msrb.mxu3 %v6065_v16  ;;  %v7411_v54 = vld [vmem:[#allocation8 + $0x414] sm:$0xf0]  ;;  %v6305_v10 = vor.u32 %v7395_v57, %v6302_v58  ;;  %v7545_v63 = vld [vmem:[#allocation8 + $0x84c] sm:$0xf]  ;;  %v5996_v57 = vld [vmem:[#allocation8 + $0x130] sm:$0xf] }
 0x1e1   :  { %4285 = vmatmul.bf16.vlgmr.msrb.gmra.mxu0 %v7930_v0  ;;  %v6357_v14 = vor.u32 %v7411_v54, %v6356_v7  ;;  %v6905_v17 = vor.u32 %v7545_v63, %v6902_v11  ;;  %v7321_v58 = vld [vmem:[#allocation8 + $0x144] sm:$0xf0]  ;;  %v7387_v7 = vld [vmem:[#allocation8 + $0x354] sm:$0xf0]  ;;  %v7467_v63 = vld [vmem:[#allocation8 + $0x5dc] sm:$0xf] }
 0x1e2   :  { %v6804_v54 = vld [vmem:[#allocation8 + $0x788] sm:$0xf]  ;;  %v5997_v22 = vor.u32 %v7321_v58, %v5996_v57  ;;  %v6590_v11 = vld [vmem:[#allocation8 + $0x5f0] sm:$0xf0]  ;;  %v6548_v25 = vld [vmem:[#allocation8 + $0x580] sm:$0xf] }
 0x1e3   :  { %4357 = vmatpush.bf16.msra.mxu2 %v6737_v5  ;;  %v4093_v5 = vpop.f32.mrf.mxu1  ;;  %4245 = vmatpush.bf16.msra.mxu1 %v6037_v29  ;;  %v6308_v29 = vld [vmem:[#allocation8 + $0x3a0] sm:$0xf]  ;;  %v6542_v9 = vld [vmem:[#allocation8 + $0x590] sm:$0xf0]  ;;  %v7449_v57 = vld [vmem:[#allocation8 + $0x54c] sm:$0xf] }
 0x1e4   :  { %4330 = vmatpush.bf16.msra.mxu0 %v6377_v61  ;;  %v6876_v5 = vld [vmem:[#allocation8 + $0x818] sm:$0xf]  ;;  %v6878_v61 = vld [vmem:[#allocation8 + $0x830] sm:$0xf0]  ;;  %v6518_v58 = vld [vmem:[#allocation8 + $0x560] sm:$0xf0] }
 0x1e5   :  { %v4106_v48 = vpop.f32.mrf.mxu2  ;;  %v6877_v28 = vor.u32 %v7542_v8, %v6876_v5  ;;  %v6881_v32 = vor.u32 %v7539_v1, %v6878_v61  ;;  %v6236_v5 = vld [vmem:[#allocation8 + $0x310] sm:$0xf]  ;;  %v6593_v8 = vor.u32 %v7467_v63, %v6590_v11  ;;  %v7381_v61 = vld [vmem:[#allocation8 + $0x324] sm:$0xf0]  ;;  %v7443_v11 = vld [vmem:[#allocation8 + $0x51c] sm:$0xf] }
 0x1e6   :  { %4246 = vmatmul.bf16.vlgmr.msra.gmra.mxu1 %v7903_v50 }
 0x1e7   :  { %4358 = vmatpush.bf16.msra.mxu2 %v6713_v35  ;;  %v6041_v35 = vor.u32 %v7329_v19, %v6038_v23  ;;  %4290 = vmatpush.bf16.msrb.mxu1 %v6973_v30  ;;  %v7405_v19 = vld [vmem:[#allocation8 + $0x3e4] sm:$0xf0]  ;;  %v6281_v23 = vor.u32 %v7389_v12, %v6278_v13  ;;  %v6596_v12 = vld [vmem:[#allocation8 + $0x5e0] sm:$0xf]  ;;  %v7471_v13 = vld [vmem:[#allocation8 + $0x5f4] sm:$0xf0] }
 0x1e8   :  { %4331 = vmatpush.bf16.msra.mxu0 %v6353_v38  ;;  %v6333_v27 = vor.u32 %v7405_v19, %v6332_v18  ;;  %v6852_v30 = vld [vmem:[#allocation8 + $0x7e8] sm:$0xf]  ;;  %v7377_v38 = vld [vmem:[#allocation8 + $0x30c] sm:$0xf]  ;;  %v6597_v1 = vor.u32 %v7471_v13, %v6596_v12  ;;  %v6494_v12 = vld [vmem:[#allocation8 + $0x530] sm:$0xf0] }
 0x1e9   :  { %4323 = vmatpush.bf16.msrb.mxu3 %v6041_v35  ;;  %v7399_v35 = vld [vmem:[#allocation8 + $0x3b4] sm:$0xf0]  ;;  %v6853_v41 = vor.u32 %v7536_v31, %v6852_v30  ;;  %v5948_v31 = vld [vmem:[#allocation8 + $0xd0] sm:$0xf]  ;;  %v6500_v13 = vld [vmem:[#allocation8 + $0x520] sm:$0xf] }
 0x1eb   :  { %4359 = vmatpush.bf16.msra.mxu2 %v6689_v44  ;;  %v6949_v44 = vor.u32 %v7560_v36, %v6948_v37  ;;  %v6854_v37 = vld [vmem:[#allocation8 + $0x800] sm:$0xf0]  ;;  %v6309_v36 = vor.u32 %v7399_v35, %v6308_v29  ;;  %v6572_v29 = vld [vmem:[#allocation8 + $0x5b0] sm:$0xf] }
 0x1ec   :  { %4324 = vmatmul.bf16.vlgmr.msrb.gmra.mxu3 %v7903_v50  ;;  %4332 = vmatpush.bf16.msra.mxu0 %v6329_v4  ;;  %v6857_v48 = vor.u32 %v7533_v33, %v6854_v37  ;;  %v7309_v33 = vld [vmem:[#allocation8 + $0xe4] sm:$0xf0]  ;;  %v6237_v37 = vor.u32 %v7381_v61, %v6236_v5  ;;  %v7300_v5 = vld [vmem:[#allocation8 + $0xa4] sm:$0xf]  ;;  %v7437_v61 = vld [vmem:[#allocation8 + $0x4ec] sm:$0xf] }
 0x1ed   :  { %4368 = vmatpush.bf16.msra.mxu3 %v6977_v21  ;;  %4291 = vmatpush.bf16.msrb.mxu1 %v6949_v44  ;;  %v6257_v21 = vor.u32 %v7383_v56, %v6254_v43  ;;  %v6022_v56 = vld [vmem:[#allocation8 + $0x178] sm:$0xf0] }
 0x1ef   :  { %4360 = vmatpush.bf16.msra.mxu2 %v6665_v60  ;;  %v6900_v60 = vld [vmem:[#allocation8 + $0x848] sm:$0xf] }
 0x1f0   :  { %v6901_v16 = vor.u32 %v7548_v34, %v6900_v60  ;;  %4333 = vmatpush.bf16.msra.mxu0 %v6305_v10  ;;  %v7524_v60 = vld [vmem:[#allocation8 + $0x79c] sm:$0xf0]  ;;  %v7521_v10 = vld [vmem:[#allocation8 + $0x78c] sm:$0xf]  ;;  %v6806_v34 = vld [vmem:[#allocation8 + $0x7a0] sm:$0xf0] }
 0x1f1   :  { %4369 = vmatpush.bf16.msra.mxu3 %v6953_v45  ;;  %4292 = vmatpush.bf16.msrb.mxu1 %v6925_v2  ;;  %v7530_v45 = vld [vmem:[#allocation8 + $0x7cc] sm:$0xf0]  ;;  %v6805_v18 = vor.u32 %v7524_v60, %v6804_v54  ;;  %v6809_v19 = vor.u32 %v7521_v10, %v6806_v34  ;;  %v6521_v60 = vor.u32 %v7449_v57, %v6518_v58  ;;  %v7306_v10 = vld [vmem:[#allocation8 + $0xd4] sm:$0xf]  ;;  %v5950_v34 = vld [vmem:[#allocation8 + $0xe8] sm:$0xf0] }
 0x1f2   :  { %v7375_v57 = vld [vmem:[#allocation8 + $0x2f4] sm:$0xf0]  ;;  %v7372_v58 = vld [vmem:[#allocation8 + $0x2e4] sm:$0xf] }
 0x1f3   :  { %4361 = vmatpush.bf16.msra.mxu2 %v6641_v24  ;;  %v4117_v24 = vpop.f32.mrf.mxu3 }
 0x1f4   :  { %v7960_v26 = vadd.f32 %v4117_v24, %v7953_v3  ;;  %4334 = vmatpush.bf16.msra.mxu0 %v6281_v23  ;;  %v7327_v3 = vld [vmem:[#allocation8 + $0x174] sm:$0xf0]  ;;  %v7324_v24 = vld [vmem:[#allocation8 + $0x164] sm:$0xf] }
 0x1f5   :  { %4370 = vmatpush.bf16.msra.mxu3 %v6929_v6  ;;  %4293 = vmatpush.bf16.msrb.mxu1 %v6901_v16  ;;  %v6021_v49 = vor.u32 %v7327_v3, %v6020_v40  ;;  %v6833_v6 = vor.u32 %v7527_v59, %v6830_v46  ;;  %v5972_v16 = vld [vmem:[#allocation8 + $0x100] sm:$0xf]  ;;  %v5998_v40 = vld [vmem:[#allocation8 + $0x148] sm:$0xf0] }
 0x1f7   :  { %4362 = vmatpush.bf16.msra.mxu2 %v6617_v39  ;;  %v6230_v39 = vld [vmem:[#allocation8 + $0x320] sm:$0xf0] }
 0x1f8   :  { %4335 = vmatpush.bf16.msra.mxu0 %v6257_v21  ;;  %v6233_v44 = vor.u32 %v7377_v38, %v6230_v39  ;;  %v7465_v21 = vld [vmem:[#allocation8 + $0x5c4] sm:$0xf0]  ;;  %v6025_v38 = vor.u32 %v7324_v24, %v6022_v56  ;;  %v6470_v24 = vld [vmem:[#allocation8 + $0x500] sm:$0xf0]  ;;  %v6476_v56 = vld [vmem:[#allocation8 + $0x4f0] sm:$0xf] }
 0x1f9   :  { %4371 = vmatpush.bf16.msra.mxu3 %v6905_v17  ;;  %4294 = vmatpush.bf16.msrb.mxu1 %v6877_v28  ;;  %v7315_v17 = vld [vmem:[#allocation8 + $0x114] sm:$0xf0]  ;;  %v7461_v28 = vld [vmem:[#allocation8 + $0x5ac] sm:$0xf]  ;;  %v6573_v3 = vor.u32 %v7465_v21, %v6572_v29  ;;  %v6473_v21 = vor.u32 %v7437_v61, %v6470_v24  ;;  %v7510_v24 = vld [vmem:[#allocation8 + $0x734] sm:$0xf] }
 0x1fa   :  { %4363 = vmatmul.bf16.vlgmr.msra.gmra.mxu2 %v7930_v0  ;;  %v7519_v29 = vld [vmem:[#allocation8 + $0x774] sm:$0xf0] }
 0x1fb   :  { %4407 = vmatpush.bf16.msrb.mxu2 %v6405_v15  ;;  %v6828_v15 = vld [vmem:[#allocation8 + $0x7b8] sm:$0xf]  ;;  %v4119_v4 = vpop.f32.mrf.mxu3 }
 0x1fc   :  { %v6829_v2 = vor.u32 %v7530_v45, %v6828_v15  ;;  %4336 = vmatpush.bf16.msra.mxu0 %v6233_v44  ;;  %v7459_v15 = vld [vmem:[#allocation8 + $0x594] sm:$0xf0]  ;;  %v5924_v44 = vld [vmem:[#allocation8 + $0xa0] sm:$0xf]  ;;  %v5974_v4 = vld [vmem:[#allocation8 + $0x118] sm:$0xf0] }
 0x1fd   :  { %4372 = vmatpush.bf16.msra.mxu3 %v6881_v32  ;;  %v4156_v53 = vpop.f32.mrf.mxu2  ;;  %4295 = vmatpush.bf16.msrb.mxu1 %v6853_v41  ;;  %v6566_v32 = vld [vmem:[#allocation8 + $0x5c0] sm:$0xf0]  ;;  %v5949_v41 = vor.u32 %v7309_v33, %v5948_v31  ;;  %v7303_v45 = vld [vmem:[#allocation8 + $0xb4] sm:$0xf0]  ;;  %v7294_v31 = vld [vmem:[#allocation8 + $0x74] sm:$0xf] }
 0x1fe   :  { %v4157_v23 = vadd.f32 %v4156_v53, %v2618_v47  ;;  %v6569_v39 = vor.u32 %v7461_v28, %v6566_v32  ;;  %v7312_v47 = vld [vmem:[#allocation8 + $0x104] sm:$0xf]  ;;  %v7285_v28 = vld [vmem:[#allocation8 + $0x24] sm:$0xf0]  ;;  %v6788_v32 = vld [vmem:[#allocation8 + $0x760] sm:$0xf] }
 0x1ff   :  { %4408 = vmatpush.bf16.msrb.mxu2 %v6381_v62  ;;  %v6260_v62 = vld [vmem:[#allocation8 + $0x340] sm:$0xf]  ;;  %4337 = vmatmul.bf16.vlgmr.msra.gmra.mxu0 %v7905_v52  ;;  %v5977_v54 = vor.u32 %v7312_v47, %v5974_v4  ;;  %v6422_v47 = vld [vmem:[#allocation8 + $0x4a0] sm:$0xf0]  ;;  %v6428_v4 = vld [vmem:[#allocation8 + $0x490] sm:$0xf] }
 0x200   :  { %4381 = vmatpush.bf16.msrb.mxu0 %v6021_v49  ;;  %v6549_v49 = vor.u32 %v7459_v15, %v6548_v25 }
 0x201   :  { %4373 = vmatpush.bf16.msra.mxu3 %v6857_v48  ;;  %4296 = vmatpush.bf16.msrb.mxu1 %v6829_v2  ;;  %v7455_v48 = vld [vmem:[#allocation8 + $0x57c] sm:$0xf]  ;;  %v7453_v2 = vld [vmem:[#allocation8 + $0x564] sm:$0xf0] }
 0x202   :  { %v6545_v46 = vor.u32 %v7455_v48, %v6542_v9  ;;  %v6764_v48 = vld [vmem:[#allocation8 + $0x730] sm:$0xf]  ;;  %v7513_v9 = vld [vmem:[#allocation8 + $0x744] sm:$0xf0] }
 0x203   :  { %4409 = vmatpush.bf16.msrb.mxu2 %v6357_v14  ;;  %v6261_v14 = vor.u32 %v7387_v7, %v6260_v62  ;;  %v4169_v43 = vpop.f32.mrf.mxu3  ;;  %v6524_v62 = vld [vmem:[#allocation8 + $0x550] sm:$0xf]  ;;  %v7297_v7 = vld [vmem:[#allocation8 + $0x84] sm:$0xf0] }
 0x204   :  { %4382 = vmatpush.bf16.msrb.mxu0 %v5997_v22  ;;  %v7964_v30 = vadd.f32 %v4169_v43, %v4157_v23  ;;  %v6525_v63 = vor.u32 %v7453_v2, %v6524_v62  ;;  %v5926_v23 = vld [vmem:[#allocation8 + $0xb8] sm:$0xf0]  ;;  %v7441_v43 = vld [vmem:[#allocation8 + $0x504] sm:$0xf0]  ;;  %v6740_v2 = vld [vmem:[#allocation8 + $0x700] sm:$0xf] }
 0x205   :  { %4374 = vmatpush.bf16.msra.mxu3 %v6833_v6  ;;  %v4158_v35 = vpop.f32.mrf.mxu2  ;;  %4297 = vmatpush.bf16.msrb.mxu1 %v6805_v18  ;;  %v5900_v6 = vld [vmem:[#allocation8 + $0x70] sm:$0xf]  ;;  %v5953_v18 = vor.u32 %v7306_v10, %v5950_v34  ;;  %v6477_v33 = vor.u32 %v7441_v43, %v6476_v56  ;;  %v6214_v62 = vld [vmem:[#allocation8 + $0x2f8] sm:$0xf0]  ;;  %v6766_v56 = vld [vmem:[#allocation8 + $0x748] sm:$0xf0] }
 0x206   :  { %v5901_v22 = vor.u32 %v7297_v7, %v5900_v6  ;;  %v5929_v35 = vor.u32 %v7300_v5, %v5926_v23  ;;  %v7507_v6 = vld [vmem:[#allocation8 + $0x714] sm:$0xf0]  ;;  %v7501_v5 = vld [vmem:[#allocation8 + $0x6e4] sm:$0xf0] }
 0x207   :  { %4410 = vmatpush.bf16.msrb.mxu2 %v6333_v27  ;;  %v5973_v27 = vor.u32 %v7315_v17, %v5972_v16  ;;  %v5876_v16 = vld [vmem:[#allocation8 + $0x40] sm:$0xf]  ;;  %v7291_v17 = vld [vmem:[#allocation8 + $0x54] sm:$0xf0] }
 0x208   :  { %4298 = vmatmul.bf16.vlgmr.msrb.gmra.mxu1 %v7943_v42 }
 0x209   :  { %4375 = vmatpush.bf16.msra.mxu3 %v6809_v19  ;;  %4342 = vmatpush.bf16.msra.mxu1 %v6593_v8  ;;  %v6497_v19 = vor.u32 %v7443_v11, %v6494_v12  ;;  %v6790_v11 = vld [vmem:[#allocation8 + $0x778] sm:$0xf0]  ;;  %v6217_v12 = vor.u32 %v7372_v58, %v6214_v62  ;;  %v7348_v58 = vld [vmem:[#allocation8 + $0x224] sm:$0xf]  ;;  %v6644_v62 = vld [vmem:[#allocation8 + $0x640] sm:$0xf] }
 0x20a   :  { %4383 = vmatpush.bf16.msrb.mxu0 %v5973_v27  ;;  %v5852_v27 = vld [vmem:[#allocation8 + $0x10] sm:$0xf] }
 0x20b   :  { %4411 = vmatpush.bf16.msrb.mxu2 %v6309_v36  ;;  %v7318_v36 = vld [vmem:[#allocation8 + $0x134] sm:$0xf]  ;;  %v4171_v53 = vpop.f32.mrf.mxu3 }
 0x20c   :  { %4376 = vmatmul.bf16.vlgmr.msra.gmra.mxu3 %v7943_v42  ;;  %v6001_v59 = vor.u32 %v7318_v36, %v5998_v40  ;;  %v6446_v36 = vld [vmem:[#allocation8 + $0x4d0] sm:$0xf0]  ;;  %v6789_v40 = vor.u32 %v7519_v29, %v6788_v32  ;;  %v6765_v53 = vor.u32 %v7513_v9, %v6764_v48  ;;  %v7363_v32 = vld [vmem:[#allocation8 + $0x294] sm:$0xf0]  ;;  %v7360_v29 = vld [vmem:[#allocation8 + $0x284] sm:$0xf] }
 0x20d   :  { %4420 = vmatpush.bf16.msrb.mxu3 %v6597_v1  ;;  %4343 = vmatpush.bf16.msra.mxu1 %v6569_v39  ;;  %v5877_v1 = vor.u32 %v7291_v17, %v5876_v16  ;;  %v7431_v39 = vld [vmem:[#allocation8 + $0x4bc] sm:$0xf]  ;;  %v7369_v16 = vld [vmem:[#allocation8 + $0x2c4] sm:$0xf0]  ;;  %v7366_v17 = vld [vmem:[#allocation8 + $0x2b4] sm:$0xf] }
 0x20e   :  { %4384 = vmatpush.bf16.msrb.mxu0 %v5949_v41  ;;  %v7435_v41 = vld [vmem:[#allocation8 + $0x4d4] sm:$0xf0]  ;;  %v6449_v15 = vor.u32 %v7431_v39, %v6446_v36  ;;  %v6742_v39 = vld [vmem:[#allocation8 + $0x718] sm:$0xf0]  ;;  %v7354_v48 = vld [vmem:[#allocation8 + $0x254] sm:$0xf] }
 0x20f   :  { %4412 = vmatpush.bf16.msrb.mxu2 %v6285_v55  ;;  %v5925_v55 = vor.u32 %v7303_v45, %v5924_v44  ;;  %v7288_v44 = vld [vmem:[#allocation8 + $0x44] sm:$0xf]  ;;  %v5878_v45 = vld [vmem:[#allocation8 + $0x58] sm:$0xf0] }
 0x210   :  { %v5881_v7 = vor.u32 %v7288_v44, %v5878_v45  ;;  %v7489_v44 = vld [vmem:[#allocation8 + $0x684] sm:$0xf0] }
 0x211   :  { %4421 = vmatpush.bf16.msrb.mxu3 %v6573_v3  ;;  %4344 = vmatpush.bf16.msra.mxu1 %v6545_v46  ;;  %v6452_v3 = vld [vmem:[#allocation8 + $0x4c0] sm:$0xf] }
 0x212   :  { %4385 = vmatpush.bf16.msrb.mxu0 %v5925_v55  ;;  %v6453_v46 = vor.u32 %v7435_v41, %v6452_v3  ;;  %v6212_v55 = vld [vmem:[#allocation8 + $0x2e0] sm:$0xf]  ;;  %v6140_v3 = vld [vmem:[#allocation8 + $0x250] sm:$0xf]  ;;  %v7357_v41 = vld [vmem:[#allocation8 + $0x264] sm:$0xf0] }
 0x213   :  { %4413 = vmatpush.bf16.msrb.mxu2 %v6261_v14  ;;  %v7447_v14 = vld [vmem:[#allocation8 + $0x534] sm:$0xf0]  ;;  %v6213_v34 = vor.u32 %v7375_v57, %v6212_v55  ;;  %v6116_v55 = vld [vmem:[#allocation8 + $0x220] sm:$0xf] }
 0x214   :  { %v6501_v8 = vor.u32 %v7447_v14, %v6500_v13  ;;  %v6741_v13 = vor.u32 %v7507_v6, %v6740_v2  ;;  %v6188_v14 = vld [vmem:[#allocation8 + $0x2b0] sm:$0xf]  ;;  %v7351_v57 = vld [vmem:[#allocation8 + $0x234] sm:$0xf0] }
 0x215   :  { %4422 = vmatpush.bf16.msrb.mxu3 %v6549_v49  ;;  %4345 = vmatpush.bf16.msra.mxu1 %v6521_v60  ;;  %v7429_v49 = vld [vmem:[#allocation8 + $0x4a4] sm:$0xf0]  ;;  %v7282_v60 = vld [vmem:[#allocation8 + $0x14] sm:$0xf]  ;;  %v6189_v61 = vor.u32 %v7369_v16, %v6188_v14  ;;  %v7483_v2 = vld [vmem:[#allocation8 + $0x654] sm:$0xf0] }
 0x216   :  { %4386 = vmatpush.bf16.msrb.mxu0 %v5901_v22  ;;  %v6429_v10 = vor.u32 %v7429_v49, %v6428_v4  ;;  %v7516_v22 = vld [vmem:[#allocation8 + $0x764] sm:$0xf]  ;;  %v6718_v4 = vld [vmem:[#allocation8 + $0x6e8] sm:$0xf0]  ;;  %v6620_v14 = vld [vmem:[#allocation8 + $0x610] sm:$0xf] }
 0x217   :  { %4414 = vmatpush.bf16.msrb.mxu2 %v6237_v37  ;;  %v5853_v37 = vor.u32 %v7285_v28, %v5852_v27  ;;  %v6164_v28 = vld [vmem:[#allocation8 + $0x280] sm:$0xf]  ;;  %v7477_v16 = vld [vmem:[#allocation8 + $0x624] sm:$0xf0] }
 0x219   :  { %4423 = vmatpush.bf16.msrb.mxu3 %v6525_v63  ;;  %4346 = vmatpush.bf16.msra.mxu1 %v6497_v19  ;;  %v5854_v63 = vld [vmem:[#allocation8 + $0x28] sm:$0xf0]  ;;  %v6716_v19 = vld [vmem:[#allocation8 + $0x6d0] sm:$0xf] }
 0x21a   :  { %4415 = vmatmul.bf16.vlgmr.msrb.gmra.mxu2 %v7905_v52  ;;  %4387 = vmatpush.bf16.msrb.mxu0 %v5877_v1  ;;  %v5857_v23 = vor.u32 %v7282_v60, %v5854_v63  ;;  %v6793_v1 = vor.u32 %v7516_v22, %v6790_v11  ;;  %v6717_v27 = vor.u32 %v7501_v5, %v6716_v19  ;;  %v6694_v60 = vld [vmem:[#allocation8 + $0x6b8] sm:$0xf0]  ;;  %v6092_v63 = vld [vmem:[#allocation8 + $0x1f0] sm:$0xf]  ;;  %v7345_v22 = vld [vmem:[#allocation8 + $0x204] sm:$0xf0] }
 0x21b   :  { %4459 = vmatpush.bf16.msra.mxu2 %v6025_v38  ;;  %v5902_v38 = vld [vmem:[#allocation8 + $0x88] sm:$0xf0]  ;;  %v7342_v11 = vld [vmem:[#allocation8 + $0x1f4] sm:$0xf] }
 0x21c   :  { %v5905_v25 = vor.u32 %v7294_v31, %v5902_v38  ;;  %v7495_v31 = vld [vmem:[#allocation8 + $0x6b4] sm:$0xf0]  ;;  %v7504_v38 = vld [vmem:[#allocation8 + $0x704] sm:$0xf] }
 0x21d   :  { %4424 = vmatpush.bf16.msrb.mxu3 %v6501_v8  ;;  %4347 = vmatpush.bf16.msra.mxu1 %v6473_v21  ;;  %v7970_v8 = vpop.f32.mrf.mxu0  ;;  %v6692_v21 = vld [vmem:[#allocation8 + $0x6a0] sm:$0xf] }
 0x21e   :  { %4388 = vmatpush.bf16.msrb.mxu0 %v5853_v37  ;;  %v6165_v37 = vor.u32 %v7363_v32, %v6164_v28  ;;  %v7336_v32 = vld [vmem:[#allocation8 + $0x1c4] sm:$0xf] }
 0x21f   :  { %4460 = vmatpush.bf16.msra.mxu2 %v6001_v59  ;;  %v7425_v59 = vld [vmem:[#allocation8 + $0x48c] sm:$0xf] }
 0x221   :  { %4425 = vmatpush.bf16.msrb.mxu3 %v6477_v33  ;;  %4348 = vmatpush.bf16.msra.mxu1 %v6449_v15  ;;  %v6769_v33 = vor.u32 %v7510_v24, %v6766_v56  ;;  %v7975_v9 = vpop.f32.mrf.mxu2  ;;  %v6668_v15 = vld [vmem:[#allocation8 + $0x670] sm:$0xf]  ;;  %v6621_v24 = vor.u32 %v7477_v16, %v6620_v14  ;;  %v6670_v56 = vld [vmem:[#allocation8 + $0x688] sm:$0xf0]  ;;  %v6932_v14 = vld [vmem:[#allocation8 + $0x880] sm:$0xf] }
 0x222   :  { %4433 = vmatpush.bf16.msra.mxu0 %v6789_v40  ;;  %v6693_v40 = vor.u32 %v7495_v31, %v6692_v21  ;;  %v6382_v21 = vld [vmem:[#allocation8 + $0x448] sm:$0xf0]  ;;  %v7555_v16 = vld [vmem:[#allocation8 + $0x894] sm:$0xf0] }
 0x223   :  { %4461 = vmatpush.bf16.msra.mxu2 %v5977_v54  ;;  %v6425_v54 = vor.u32 %v7425_v59, %v6422_v47  ;;  %4389 = vmatmul.bf16.vlgmr.msrb.gmra.mxu0 %v7901_v20  ;;  %v6745_v59 = vor.u32 %v7504_v38, %v6742_v39  ;;  %v7498_v47 = vld [vmem:[#allocation8 + $0x6d4] sm:$0xf]  ;;  %v6646_v38 = vld [vmem:[#allocation8 + $0x658] sm:$0xf0]  ;;  %v6044_v39 = vld [vmem:[#allocation8 + $0x190] sm:$0xf] }
 0x224   :  { %v6721_v6 = vor.u32 %v7498_v47, %v6718_v4  ;;  %v6358_v47 = vld [vmem:[#allocation8 + $0x418] sm:$0xf0] }
 0x225   :  { %4426 = vmatpush.bf16.msrb.mxu3 %v6453_v46  ;;  %4349 = vmatpush.bf16.msra.mxu1 %v6425_v54  ;;  %v4132_v45 = vpop.f32.mrf.mxu0  ;;  %v6141_v46 = vor.u32 %v7357_v41, %v6140_v3  ;;  %v7492_v54 = vld [vmem:[#allocation8 + $0x6a4] sm:$0xf]  ;;  %v7330_v3 = vld [vmem:[#allocation8 + $0x194] sm:$0xf]  ;;  %v6046_v41 = vld [vmem:[#allocation8 + $0x1a8] sm:$0xf0] }
 0x226   :  { %4434 = vmatpush.bf16.msra.mxu0 %v6765_v53  ;;  %v6669_v53 = vor.u32 %v7489_v44, %v6668_v15  ;;  %v6697_v5 = vor.u32 %v7492_v54, %v6694_v60  ;;  %v6980_v15 = vld [vmem:[#allocation8 + $0x8e0] sm:$0xf]  ;;  %v7567_v44 = vld [vmem:[#allocation8 + $0x8f4] sm:$0xf0]  ;;  %v7564_v45 = vld [vmem:[#allocation8 + $0x8e4] sm:$0xf] }
 0x227   :  { %4462 = vmatpush.bf16.msra.mxu2 %v5953_v18  ;;  %v6190_v18 = vld [vmem:[#allocation8 + $0x2c8] sm:$0xf0]  ;;  %v7558_v54 = vld [vmem:[#allocation8 + $0x8b4] sm:$0xf] }
 0x228   :  { %v6193_v43 = vor.u32 %v7366_v17, %v6190_v18  ;;  %4350 = vmatmul.bf16.vlgmr.msra.gmra.mxu1 %v7912_v51  ;;  %v7420_v17 = vld [vmem:[#allocation8 + $0x464] sm:$0xf]  ;;  %v6406_v18 = vld [vmem:[#allocation8 + $0x478] sm:$0xf0]  ;;  %v6958_v60 = vld [vmem:[#allocation8 + $0x8c8] sm:$0xf0] }
 0x229   :  { %4427 = vmatpush.bf16.msrb.mxu3 %v6429_v10  ;;  %4394 = vmatpush.bf16.msrb.mxu1 %v6213_v34  ;;  %v6645_v34 = vor.u32 %v7483_v2, %v6644_v62  ;;  %v6409_v28 = vor.u32 %v7420_v17, %v6406_v18  ;;  %v7552_v17 = vld [vmem:[#allocation8 + $0x884] sm:$0xf]  ;;  %v6934_v18 = vld [vmem:[#allocation8 + $0x898] sm:$0xf0] }
 0x22a   :  { %4435 = vmatpush.bf16.msra.mxu0 %v6741_v13  ;;  %v6094_v13 = vld [vmem:[#allocation8 + $0x208] sm:$0xf0] }
 0x22b   :  { %4463 = vmatpush.bf16.msra.mxu2 %v5929_v35  ;;  %v6166_v35 = vld [vmem:[#allocation8 + $0x298] sm:$0xf0] }
 0x22c   :  { %4428 = vmatmul.bf16.vlgmr.msrb.gmra.mxu3 %v7912_v51  ;;  %v6169_v36 = vor.u32 %v7360_v29, %v6166_v35  ;;  %v6070_v29 = vld [vmem:[#allocation8 + $0x1d8] sm:$0xf0]  ;;  %v7414_v35 = vld [vmem:[#allocation8 + $0x434] sm:$0xf] }
 0x22d   :  { %4472 = vmatpush.bf16.msra.mxu3 %v6217_v12  ;;  %4395 = vmatpush.bf16.msrb.mxu1 %v6189_v61  ;;  %v4210_v12 = vpop.f32.mrf.mxu2  ;;  %v7977_v19 = vpop.f32.mrf.mxu0  ;;  %v6097_v61 = vor.u32 %v7342_v11, %v6094_v13 }
 0x22e   :  { %4436 = vmatpush.bf16.msra.mxu0 %v6717_v27  ;;  %v7339_v27 = vld [vmem:[#allocation8 + $0x1d4] sm:$0xf0]  ;;  %v6961_v12 = vor.u32 %v7558_v54, %v6958_v60 }
 0x22f   :  { %4464 = vmatpush.bf16.msra.mxu2 %v5905_v25  ;;  %v6142_v25 = vld [vmem:[#allocation8 + $0x268] sm:$0xf0] }
 0x230   :  { %v6145_v49 = vor.u32 %v7354_v48, %v6142_v25  ;;  %v6385_v25 = vor.u32 %v7414_v35, %v6382_v21  ;;  %v6286_v35 = vld [vmem:[#allocation8 + $0x388] sm:$0xf0] }
 0x231   :  { %4473 = vmatpush.bf16.msra.mxu3 %v6193_v43  ;;  %4396 = vmatpush.bf16.msrb.mxu1 %v6165_v37  ;;  %v6068_v43 = vld [vmem:[#allocation8 + $0x1c0] sm:$0xf]  ;;  %v7480_v37 = vld [vmem:[#allocation8 + $0x644] sm:$0xf] }
 0x232   :  { %4437 = vmatpush.bf16.msra.mxu0 %v6693_v40  ;;  %v7333_v40 = vld [vmem:[#allocation8 + $0x1a4] sm:$0xf0] }
 0x233   :  { %4465 = vmatpush.bf16.msra.mxu2 %v5881_v7  ;;  %v6117_v7 = vor.u32 %v7351_v57, %v6116_v55  ;;  %v6049_v55 = vor.u32 %v7330_v3, %v6046_v41  ;;  %v6981_v57 = vor.u32 %v7567_v44, %v6980_v15  ;;  %v6886_v3 = vld [vmem:[#allocation8 + $0x838] sm:$0xf0]  ;;  %v7384_v41 = vld [vmem:[#allocation8 + $0x344] sm:$0xf] }
 0x235   :  { %4474 = vmatpush.bf16.msra.mxu3 %v6169_v36  ;;  %4397 = vmatpush.bf16.msrb.mxu1 %v6141_v46  ;;  %v6073_v36 = vor.u32 %v7336_v32, %v6070_v29  ;;  %v7408_v46 = vld [vmem:[#allocation8 + $0x404] sm:$0xf]  ;;  %v4184_v4 = vpop.f32.mrf.mxu0  ;;  %v6910_v32 = vld [vmem:[#allocation8 + $0x868] sm:$0xf0]  ;;  %v7390_v29 = vld [vmem:[#allocation8 + $0x374] sm:$0xf] }
 0x236   :  { %4438 = vmatpush.bf16.msra.mxu0 %v6669_v53  ;;  %v6045_v53 = vor.u32 %v7333_v40, %v6044_v39  ;;  %v6361_v2 = vor.u32 %v7408_v46, %v6358_v47  ;;  %v6884_v39 = vld [vmem:[#allocation8 + $0x820] sm:$0xf]  ;;  %v7540_v40 = vld [vmem:[#allocation8 + $0x824] sm:$0xf]  ;;  %v7534_v46 = vld [vmem:[#allocation8 + $0x7f4] sm:$0xf] }
 0x237   :  { %4466 = vmatpush.bf16.msra.mxu2 %v5857_v23  ;;  %v6093_v23 = vor.u32 %v7345_v22, %v6092_v63  ;;  %v6862_v4 = vld [vmem:[#allocation8 + $0x808] sm:$0xf0] }
 0x239   :  { %4475 = vmatpush.bf16.msra.mxu3 %v6145_v49  ;;  %4398 = vmatpush.bf16.msrb.mxu1 %v6117_v7  ;;  %v6649_v49 = vor.u32 %v7480_v37, %v6646_v38  ;;  %v7561_v7 = vld [vmem:[#allocation8 + $0x8c4] sm:$0xf0]  ;;  %v6289_v38 = vor.u32 %v7390_v29, %v6286_v35 }
 0x23a   :  { %4467 = vmatmul.bf16.vlgmr.msra.gmra.mxu2 %v7901_v20  ;;  %v6118_v20 = vld [vmem:[#allocation8 + $0x238] sm:$0xf0]  ;;  %4439 = vmatpush.bf16.msra.mxu0 %v6645_v34  ;;  %v6334_v34 = vld [vmem:[#allocation8 + $0x3e8] sm:$0xf0] }
 0x23b   :  { %4511 = vmatpush.bf16.msrb.mxu2 %v6793_v1  ;;  %v6121_v10 = vor.u32 %v7348_v58, %v6118_v20  ;;  %v7486_v1 = vld [vmem:[#allocation8 + $0x674] sm:$0xf]  ;;  %v6622_v20 = vld [vmem:[#allocation8 + $0x628] sm:$0xf0] }
 0x23c   :  { %v6673_v31 = vor.u32 %v7486_v1, %v6670_v56  ;;  %v7474_v58 = vld [vmem:[#allocation8 + $0x614] sm:$0xf] }
 0x23d   :  { %4476 = vmatpush.bf16.msra.mxu3 %v6121_v10  ;;  %4399 = vmatpush.bf16.msrb.mxu1 %v6093_v23  ;;  %v7979_v48 = vpop.f32.mrf.mxu2  ;;  %v7402_v10 = vld [vmem:[#allocation8 + $0x3d4] sm:$0xf]  ;;  %v6625_v63 = vor.u32 %v7474_v58, %v6622_v20  ;;  %v6310_v23 = vld [vmem:[#allocation8 + $0x3b8] sm:$0xf0]  ;;  %v7984_v1 = vpop.f32.mrf.mxu0  ;;  %v6865_v58 = vor.u32 %v7534_v46, %v6862_v4  ;;  %v7602_v46 = vld [vmem:[#allocation2] sm:$0xff] }
 0x23e   :  { %4440 = vmatpush.bf16.msra.mxu0 %v6621_v24  ;;  %v6337_v13 = vor.u32 %v7402_v10, %v6334_v34  ;;  %v6937_v24 = vor.u32 %v7552_v17, %v6934_v18  ;;  %v6598_v17 = vld [vmem:[#allocation8 + $0x5f8] sm:$0xf0]  ;;  %v4183_v18 = vadd.f32 %v7977_v19, %v7964_v30  ;;  %v7456_v19 = vld [vmem:[#allocation8 + $0x584] sm:$0xf] }
 0x23f   :  { %4512 = vmatpush.bf16.msrb.mxu2 %v6769_v33  ;;  %v6069_v33 = vor.u32 %v7339_v27, %v6068_v43  ;;  %v6908_v43 = vld [vmem:[#allocation8 + $0x850] sm:$0xf]  ;;  %v7549_v27 = vld [vmem:[#allocation8 + $0x864] sm:$0xf0] }
 0x241   :  { %4477 = vmatpush.bf16.msra.mxu3 %v6097_v61  ;;  %4400 = vmatpush.bf16.msrb.mxu1 %v6069_v33  ;;  %v6933_v61 = vor.u32 %v7555_v16, %v6932_v14  ;;  %v6814_v14 = vld [vmem:[#allocation8 + $0x7a8] sm:$0xf0]  ;;  %v7468_v16 = vld [vmem:[#allocation8 + $0x5e4] sm:$0xf] }
 0x242   :  { %4485 = vmatpush.bf16.msrb.mxu0 %v6409_v28  ;;  %v7546_v28 = vld [vmem:[#allocation8 + $0x854] sm:$0xf] }
 0x243   :  { %4513 = vmatpush.bf16.msrb.mxu2 %v6745_v59  ;;  %v6982_v59 = vld [vmem:[#allocation8 + $0x8f8] sm:$0xf0]  ;;  %4441 = vmatmul.bf16.vlgmr.msra.gmra.mxu0 %v7930_v0  ;;  %v4143_v21 = vpop.f32.mrf.mxu1  ;;  %v6913_v37 = vor.u32 %v7546_v28, %v6910_v32 }
 0x244   :  { %v6985_v62 = vor.u32 %v7564_v45, %v6982_v59  ;;  %v6860_v45 = vld [vmem:[#allocation8 + $0x7f0] sm:$0xf]  ;;  %v7537_v59 = vld [vmem:[#allocation8 + $0x804] sm:$0xf0] }
 0x245   :  { %4478 = vmatpush.bf16.msra.mxu3 %v6073_v36  ;;  %4401 = vmatpush.bf16.msrb.mxu1 %v6045_v53  ;;  %v4262_v11 = vpop.f32.mrf.mxu2  ;;  %v7543_v36 = vld [vmem:[#allocation8 + $0x834] sm:$0xf0]  ;;  %v4236_v15 = vpop.f32.mrf.mxu0  ;;  %v6238_v53 = vld [vmem:[#allocation8 + $0x328] sm:$0xf0] }
 0x246   :  { %4486 = vmatpush.bf16.msrb.mxu0 %v6385_v25  ;;  %v6885_v44 = vor.u32 %v7543_v36, %v6884_v39  ;;  %v7525_v11 = vld [vmem:[#allocation8 + $0x7a4] sm:$0xf0] }
 0x247   :  { %4514 = vmatpush.bf16.msrb.mxu2 %v6721_v6  ;;  %v6956_v6 = vld [vmem:[#allocation8 + $0x8b0] sm:$0xf] }
 0x248   :  { %v6957_v22 = vor.u32 %v7561_v7, %v6956_v6  ;;  %4402 = vmatmul.bf16.vlgmr.msrb.gmra.mxu1 %v7903_v50  ;;  %v7528_v6 = vld [vmem:[#allocation8 + $0x7c4] sm:$0xf]  ;;  %v6838_v7 = vld [vmem:[#allocation8 + $0x7d8] sm:$0xf0] }
 0x249   :  { %4479 = vmatpush.bf16.msra.mxu3 %v6049_v55  ;;  %4446 = vmatpush.bf16.msra.mxu1 %v6981_v57  ;;  %v4221_v47 = vpop.f32.mrf.mxu3  ;;  %v6861_v57 = vor.u32 %v7537_v59, %v6860_v45  ;;  %v6502_v45 = vld [vmem:[#allocation8 + $0x538] sm:$0xf0] }
 0x24a   :  { %4487 = vmatpush.bf16.msrb.mxu0 %v6361_v2  ;;  %v7531_v2 = vld [vmem:[#allocation8 + $0x7d4] sm:$0xf0] }
 0x24b   :  { %4515 = vmatpush.bf16.msrb.mxu2 %v6697_v5  ;;  %v7396_v5 = vld [vmem:[#allocation8 + $0x3a4] sm:$0xf]  ;;  %v4145_v55 = vpop.f32.mrf.mxu1 }
 0x24c   :  { %4480 = vmatmul.bf16.vlgmr.msra.gmra.mxu3 %v7903_v50  ;;  %v6313_v56 = vor.u32 %v7396_v5, %v6310_v23  ;;  %v4131_v50 = vadd.f32 %v7970_v8, %v7960_v26  ;;  %v6889_v26 = vor.u32 %v7540_v40, %v6886_v3  ;;  %v7450_v3 = vld [vmem:[#allocation8 + $0x554] sm:$0xf] }
 0x24d   :  { %4524 = vmatpush.bf16.msrb.mxu3 %v6985_v62  ;;  %4447 = vmatpush.bf16.msra.mxu1 %v6957_v22  ;;  %v6836_v62 = vld [vmem:[#allocation8 + $0x7c0] sm:$0xf]  ;;  %v6812_v22 = vld [vmem:[#allocation8 + $0x790] sm:$0xf] }
 0x24e   :  { %4488 = vmatpush.bf16.msrb.mxu0 %v6337_v13  ;;  %v4144_v33 = vadd.f32 %v4143_v21, %v4131_v50  ;;  %v6837_v34 = vor.u32 %v7531_v2, %v6836_v62  ;;  %v6813_v23 = vor.u32 %v7525_v11, %v6812_v22  ;;  %v6550_v21 = vld [vmem:[#allocation8 + $0x598] sm:$0xf0]  ;;  %v7432_v2 = vld [vmem:[#allocation8 + $0x4c4] sm:$0xf] }
 0x24f   :  { %4516 = vmatpush.bf16.msrb.mxu2 %v6673_v31  ;;  %v6909_v31 = vor.u32 %v7549_v27, %v6908_v43  ;;  %v7462_v43 = vld [vmem:[#allocation8 + $0x5b4] sm:$0xf]  ;;  %v6574_v27 = vld [vmem:[#allocation8 + $0x5c8] sm:$0xf0]  ;;  %v8005_v22 = vld [vmem:[#allocation10] sm:$0x3f] }
 0x250   :  { %v6986_v25 = vmul.f32 -1.442695, %v4144_v33  ;;  %v6577_v30 = vor.u32 %v7462_v43, %v6574_v27  ;;  %v2619_v11 = vperm.slane %v8005_v22, 2 }
 0x251   :  { %4525 = vmatpush.bf16.msrb.mxu3 %v6961_v12  ;;  %4448 = vmatpush.bf16.msra.mxu1 %v6933_v61  ;;  %v7522_v12 = vld [vmem:[#allocation8 + $0x794] sm:$0xf]  ;;  %v4223_v13 = vpop.f32.mrf.mxu3 }
 0x252   :  { %4489 = vmatpush.bf16.msrb.mxu0 %v6313_v56  ;;  %7576 = vpow2.f32 %v6986_v25  ;;  %v6601_v56 = vor.u32 %v7468_v16, %v6598_v17  ;;  %v6430_v13 = vld [vmem:[#allocation8 + $0x4a8] sm:$0xf0] }
 0x253   :  { %4517 = vmatpush.bf16.msrb.mxu2 %v6649_v49  ;;  %v7378_v49 = vld [vmem:[#allocation8 + $0x314] sm:$0xf]  ;;  %v4195_v5 = vpop.f32.mrf.mxu1 }
 0x254   :  { %v6241_v20 = vor.u32 %v7378_v49, %v6238_v53  ;;  %v4196_v61 = vadd.f32 %v4195_v5, %v4183_v18 }
 0x255   :  { %4526 = vmatpush.bf16.msrb.mxu3 %v6937_v24  ;;  %4449 = vmatpush.bf16.msra.mxu1 %v6909_v31  ;;  %v6817_v24 = vor.u32 %v7522_v12, %v6814_v14  ;;  %v7426_v12 = vld [vmem:[#allocation8 + $0x494] sm:$0xf] }
 0x256   :  { %4490 = vmatpush.bf16.msrb.mxu0 %v6289_v38  ;;  %v4209_v28 = vadd.f32 %v7975_v9, %v4196_v61  ;;  %v6553_v38 = vor.u32 %v7456_v19, %v6550_v21  ;;  %v6433_v5 = vor.u32 %v7426_v12, %v6430_v13 }
 0x257   :  { %4518 = vmatpush.bf16.msrb.mxu2 %v6625_v63  ;;  %v6841_v63 = vor.u32 %v7528_v6, %v6838_v7  ;;  %v6454_v6 = vld [vmem:[#allocation8 + $0x4d8] sm:$0xf0] }
 0x258   :  { %v7577_v54 = vpop.eup %7576  ;;  %v4222_v50 = vadd.f32 %v4221_v47, %v4209_v28 }
 0x259   :  { %4527 = vmatpush.bf16.msrb.mxu3 %v6913_v37  ;;  %4450 = vmatpush.bf16.msra.mxu1 %v6885_v44  ;;  %v4555_v60 = vadd.f32 1.0, %v7577_v54 }
 0x25a   :  { %4519 = vmatmul.bf16.vlgmr.msrb.gmra.mxu2 %v7930_v0  ;;  %v6262_v0 = vld [vmem:[#allocation8 + $0x358] sm:$0xf0]  ;;  %v6987_v33 = vmul.f32 -1.442695, %v4222_v50 }
 0x25b   :  { %v6265_v8 = vor.u32 %v7384_v41, %v6262_v0  ;;  %7578 = vrcp.f32 %v4555_v60  ;;  %v4572_v37 = vand.u32 2147483648, %v4555_v60  ;;  %v4197_v9 = vpop.f32.mrf.mxu1  ;;  %v4570_v36 = vand.u32 2147483647, %v4555_v60  ;;  %v6526_v41 = vld [vmem:[#allocation8 + $0x568] sm:$0xf0] }
 0x25c   :  { %7580 = vpow2.f32 %v6987_v33  ;;  %vm4566_vm1 = vweird.f32 %v4555_v60  ;;  %v6529_v44 = vor.u32 %v7450_v3, %v6526_v41 }
 0x25d   :  { %4528 = vmatpush.bf16.msrb.mxu3 %v6889_v26  ;;  %4491 = vmatpush.bf16.msrb.mxu0 %v6265_v8  ;;  %v7989_v10 = vpop.f32.mrf.mxu2  ;;  %v4573_v25 = vor.u32 1.1754944e-38, %v4572_v37  ;;  %vm4571_vm3 = vcmp.eq.f32.partialorder %v4570_v36, 8.507059e+37  ;;  %v7444_v8 = vld [vmem:[#allocation8 + $0x524] sm:$0xf] }
 0x25e   :  { %4451 = vmatpush.bf16.msra.mxu1 %v6861_v57  ;;  %v7999_v40 = vpop.f32.mrf.mxu0  ;;  %v6505_v53 = vor.u32 %v7444_v8, %v6502_v45  ;;  %v7438_v57 = vld [vmem:[#allocation8 + $0x4f4] sm:$0xf] }
 0x261   :  { %4529 = vmatpush.bf16.msrb.mxu3 %v6865_v58  ;;  %4492 = vmatpush.bf16.msrb.mxu0 %v6241_v20  ;;  %v7579_v32 = vpop.eup %7578  ;;  %v6478_v58 = vld [vmem:[#allocation8 + $0x508] sm:$0xf0] }
 0x262   :  { %4452 = vmatpush.bf16.msra.mxu1 %v6837_v34  ;;  %v4562_v35 = vmul.f32 %v7579_v32, %v4555_v60  ;;  %vm4567_vm0 = vweird.f32 %v7579_v32  ;;  %v7581_v59 = vpop.eup %7580  ;;  %v6481_v20 = vor.u32 %v7438_v57, %v6478_v58 }
 0x263   :  { %vm4568_vm2 = vmor %vm4566_vm1, %vm4567_vm0  ;;  %v4556_v4 = vadd.f32 1.0, %v7581_v59  ;;  %v4247_v49 = vpop.f32.mrf.mxu1 }
 0x264   :  { %4493 = vmatmul.bf16.vlgmr.msrb.gmra.mxu0 %v7905_v52  ;;  %v7995_v52 = vpop.f32.mrf.mxu3  ;;  %v4563_v31 = vsub.f32 1.0, %v4562_v35 }
 0x265   :  { %4530 = vmatpush.bf16.msrb.mxu3 %v6841_v63  ;;  %v4314_v29 = vpop.f32.mrf.mxu2  ;;  %7582 = vrcp.f32 %v4556_v4  ;;  %v6457_v63 = vor.u32 %v7432_v2, %v6454_v6  ;;  %v4587_v16 = vand.u32 2147483648, %v4556_v4  ;;  %v4585_v18 = vand.u32 2147483647, %v4556_v4 }
 0x266   :  { %4453 = vmatpush.bf16.msra.mxu1 %v6813_v23  ;;  %v4564_v39 = vmul.f32 %v7579_v32, %v4563_v31  ;;  %v4288_v55 = vpop.f32.mrf.mxu0  ;;  %v4235_v23 = vadd.f32 %v7984_v1, %v2619_v11  ;;  %vm4581_vm5 = vweird.f32 %v4556_v4  ;;  %v7604_v29 = vld [vmem:[#allocation2 + $0x8] sm:$0xff] }
 0x267   :  { %vm4586_vm7 = vcmp.eq.f32.partialorder %v4585_v18, 8.507059e+37  ;;  %v7605_v55 = vld [vmem:[#allocation2 + $0x10] sm:$0xff] }
 0x268   :  { %v4565_v0 = vadd.f32 %v7579_v32, %v4564_v39  ;;  %v4248_v43 = vadd.f32 %v4247_v49, %v4235_v23 }
 0x269   :  { %4531 = vmatpush.bf16.msrb.mxu3 %v6817_v24  ;;  %4454 = vmatmul.bf16.vlgmr.msra.gmra.mxu1 %v7943_v42 }
 0x26a   :  { %4498 = vmatpush.bf16.msrb.mxu1 %v6601_v56  ;;  %v4569_v15 = vsel %vm4568_vm2, %v7579_v32, %v4565_v0  ;;  %v4588_v56 = vor.u32 1.1754944e-38, %v4587_v16  ;;  %v4261_v50 = vadd.f32 %v7979_v48, %v4248_v43  ;;  %v2620_v0 = vperm.slane %v8005_v22, 3 }
 0x26b   :  { %v7583_v7 = vpop.eup %7582  ;;  %v4249_v54 = vpop.f32.mrf.mxu1 }
 0x26c   :  { %4532 = vmatmul.bf16.vlgmr.msrb.gmra.mxu3 %v7943_v42  ;;  %v4574_v42 = vsel %vm4571_vm3, %v4573_v25, %v4569_v15  ;;  %v4275_v26 = vpop.f32.mrf.mxu3  ;;  %v4577_v60 = vmul.f32 %v7583_v7, %v4556_v4  ;;  %vm4582_vm4 = vweird.f32 %v7583_v7  ;;  %v4274_v1 = vadd.f32 %v7995_v52, %v4261_v50 }
 0x26d   :  { %v4651_v47 = vmul.f32 %v7602_v46, %v4574_v42  ;;  %vm4583_vm6 = vmor %vm4581_vm5, %vm4582_vm4  ;;  %v4313_v15 = vadd.f32 %v7989_v10, %v2620_v0 }
 0x26e   :  { %4499 = vmatpush.bf16.msrb.mxu1 %v6577_v30  ;;  %v4578_v14 = vsub.f32 1.0, %v4577_v60  ;;  %v4287_v19 = vadd.f32 %v7999_v40, %v4274_v1 }
 0x26f   :  { %4657 = vst [vmem:[#allocation11] sm:$0xff] %v4651_v47 }
 0x270   :  { %v4579_v17 = vmul.f32 %v7583_v7, %v4578_v14 }
 0x272   :  { %4500 = vmatpush.bf16.msrb.mxu1 %v6553_v38  ;;  %v4580_v24 = vadd.f32 %v7583_v7, %v4579_v17 }
 0x274   :  { %v8001_v62 = vpop.f32.mrf.mxu3  ;;  %v4584_v27 = vsel %vm4583_vm6, %v7583_v7, %v4580_v24 }
 0x275   :  { %v4589_v32 = vsel %vm4586_vm7, %v4588_v56, %v4584_v27  ;;  %v4326_v8 = vadd.f32 %v8001_v62, %v4313_v15  ;;  %v7606_v27 = vld [vmem:[#allocation2 + $0x18] sm:$0xff]  ;;  %v2622_v15 = vperm.slane %v8005_v22, 5 }
 0x276   :  { %4501 = vmatpush.bf16.msrb.mxu1 %v6529_v44  ;;  %v4652_v35 = vmul.f32 %v7604_v29, %v4589_v32 }
 0x278   :  { %4658 = vst [vmem:[#allocation11 + $0x8] sm:$0xff] %v4652_v35  ;;  %v2621_v35 = vperm.slane %v8005_v22, 4 }
 0x27a   :  { %4502 = vmatpush.bf16.msrb.mxu1 %v6505_v53 }
 0x27c   :  { %v4327_v61 = vpop.f32.mrf.mxu3  ;;  %v4338_v30 = vpop.f32.mrf.mxu0 }
 0x27d   :  { %v8003_v34 = vpop.f32.mrf.mxu2  ;;  %v4339_v59 = vadd.f32 %v4338_v30, %v4326_v8 }
 0x27e   :  { %4503 = vmatpush.bf16.msrb.mxu1 %v6481_v20 }
 0x282   :  { %4504 = vmatpush.bf16.msrb.mxu1 %v6457_v63 }
 0x284   :  { %v4340_v33 = vpop.f32.mrf.mxu0 }
 0x285   :  { %v4366_v28 = vpop.f32.mrf.mxu2  ;;  %v4299_v21 = vpop.f32.mrf.mxu1 }
 0x286   :  { %4505 = vmatpush.bf16.msrb.mxu1 %v6433_v5  ;;  %v4300_v31 = vadd.f32 %v4299_v21, %v4287_v19 }
 0x288   :  { %v6988_v37 = vmul.f32 -1.442695, %v4300_v31 }
 0x289   :  { %4506 = vmatmul.bf16.vlgmr.msrb.gmra.mxu1 %v7912_v51 }
 0x28a   :  { %7584 = vpow2.f32 %v6988_v37 }
 0x28d   :  { %v4301_v38 = vpop.f32.mrf.mxu1 }
 0x28f   :  { %v4377_v9 = vpop.f32.mrf.mxu3 }
 0x290   :  { %v7585_v36 = vpop.eup %7584 }
 0x291   :  { %v4557_v3 = vadd.f32 1.0, %v7585_v36 }
 0x293   :  { %7586 = vrcp.f32 %v4557_v3  ;;  %v4602_v44 = vand.u32 2147483648, %v4557_v3  ;;  %v4600_v26 = vand.u32 2147483647, %v4557_v3  ;;  %vm4596_vm9 = vweird.f32 %v4557_v3 }
 0x295   :  { %v4603_v46 = vor.u32 1.1754944e-38, %v4602_v44  ;;  %vm4601_vm11 = vcmp.eq.f32.partialorder %v4600_v26, 8.507059e+37 }
 0x297   :  { %v4379_v48 = vpop.f32.mrf.mxu3 }
 0x299   :  { %v7587_v41 = vpop.eup %7586 }
 0x29a   :  { %v4592_v52 = vmul.f32 %v7587_v41, %v4557_v3  ;;  %vm4597_vm8 = vweird.f32 %v7587_v41 }
 0x29b   :  { %vm4598_vm10 = vmor %vm4596_vm9, %vm4597_vm8 }
 0x29c   :  { %v4593_v25 = vsub.f32 1.0, %v4592_v52 }
 0x29d   :  { %v8013_v39 = vpop.f32.mrf.mxu2 }
 0x29e   :  { %v4594_v42 = vmul.f32 %v7587_v41, %v4593_v25 }
 0x2a0   :  { %v4390_v40 = vpop.f32.mrf.mxu0  ;;  %v4595_v45 = vadd.f32 %v7587_v41, %v4594_v42 }
 0x2a1   :  { %v4391_v30 = vadd.f32 %v4390_v40, %v2621_v35 }
 0x2a2   :  { %v4599_v47 = vsel %vm4598_vm10, %v7587_v41, %v4595_v45 }
 0x2a3   :  { %v4604_v49 = vsel %vm4601_vm11, %v4603_v46, %v4599_v47 }
 0x2a4   :  { %v4653_v57 = vmul.f32 %v7605_v55, %v4604_v49 }
 0x2a5   :  { %v4418_v51 = vpop.f32.mrf.mxu2  ;;  %v4351_v4 = vpop.f32.mrf.mxu1 }
 0x2a6   :  { %v4352_v53 = vadd.f32 %v4351_v4, %v4339_v59  ;;  %4659 = vst [vmem:[#allocation11 + $0x10] sm:$0xff] %v4653_v57 }
 0x2a8   :  { %v4392_v58 = vpop.f32.mrf.mxu0  ;;  %v4365_v10 = vadd.f32 %v8003_v34, %v4352_v53 }
 0x2a9   :  { %v7607_v58 = vld [vmem:[#allocation2 + $0x20] sm:$0xff] }
 0x2aa   :  { %v4378_v20 = vadd.f32 %v4377_v9, %v4365_v10 }
 0x2ac   :  { %v6989_v2 = vmul.f32 -1.442695, %v4378_v20 }
 0x2ad   :  { %v4353_v62 = vpop.f32.mrf.mxu1 }
 0x2ae   :  { %7588 = vpow2.f32 %v6989_v2 }
 0x2af   :  { %v4429_v6 = vpop.f32.mrf.mxu3 }
 0x2b4   :  { %v7589_v54 = vpop.eup %7588 }
 0x2b5   :  { %v4558_v63 = vadd.f32 1.0, %v7589_v54 }
 0x2b7   :  { %v4431_v60 = vpop.f32.mrf.mxu3  ;;  %7590 = vrcp.f32 %v4558_v63  ;;  %v4617_v17 = vand.u32 2147483648, %v4558_v63  ;;  %v4615_v34 = vand.u32 2147483647, %v4558_v63  ;;  %vm4611_vm13 = vweird.f32 %v4558_v63 }
 0x2b9   :  { %v4618_v24 = vor.u32 1.1754944e-38, %v4617_v17  ;;  %vm4616_vm15 = vcmp.eq.f32.partialorder %v4615_v34, 8.507059e+37  ;;  %v7608_v34 = vld [vmem:[#allocation2 + $0x28] sm:$0xff] }
 0x2bd   :  { %v4468_v7 = vpop.f32.mrf.mxu2  ;;  %v7591_v13 = vpop.eup %7590 }
 0x2be   :  { %v4607_v14 = vmul.f32 %v7591_v13, %v4558_v63  ;;  %vm4612_vm12 = vweird.f32 %v7591_v13 }
 0x2bf   :  { %vm4613_vm14 = vmor %vm4611_vm13, %vm4612_vm12 }
 0x2c0   :  { %v4442_v12 = vpop.f32.mrf.mxu0  ;;  %v4608_v16 = vsub.f32 1.0, %v4607_v14 }
 0x2c2   :  { %v4609_v18 = vmul.f32 %v7591_v13, %v4608_v16 }
 0x2c4   :  { %v4610_v23 = vadd.f32 %v7591_v13, %v4609_v18 }
 0x2c5   :  { %v4470_v11 = vpop.f32.mrf.mxu2  ;;  %v4403_v5 = vpop.f32.mrf.mxu1 }
 0x2c6   :  { %v4614_v56 = vsel %vm4613_vm14, %v7591_v13, %v4610_v23  ;;  %v4404_v19 = vadd.f32 %v4403_v5, %v4391_v30 }
 0x2c7   :  { %v4619_v43 = vsel %vm4616_vm15, %v4618_v24, %v4614_v56 }
 0x2c8   :  { %v4444_v61 = vpop.f32.mrf.mxu0  ;;  %v4654_v28 = vmul.f32 %v7606_v27, %v4619_v43  ;;  %v4417_v31 = vadd.f32 %v8013_v39, %v4404_v19  ;;  %v4469_v39 = vadd.f32 %v4468_v7, %v2622_v15 }
 0x2ca   :  { %4660 = vst [vmem:[#allocation11 + $0x18] sm:$0xff] %v4654_v28  ;;  %v4430_v37 = vadd.f32 %v4429_v6, %v4417_v31 }
 0x2cc   :  { %v4443_v9 = vadd.f32 %v4442_v12, %v4430_v37 }
 0x2cd   :  { %v4405_v29 = vpop.f32.mrf.mxu1 }
 0x2cf   :  { %v4481_v32 = vpop.f32.mrf.mxu3 }
 0x2d0   :  { %v4482_v59 = vadd.f32 %v4481_v32, %v4469_v39 }
 0x2d7   :  { %v4483_v1 = vpop.f32.mrf.mxu3 }
 0x2dd   :  { %v4520_v50 = vpop.f32.mrf.mxu2 }
 0x2e1   :  { %v4494_v33 = vpop.f32.mrf.mxu0 }
 0x2e2   :  { %v4495_v47 = vadd.f32 %v4494_v33, %v4482_v59 }
 0x2e5   :  { %v4522_v21 = vpop.f32.mrf.mxu2 }
 0x2e6   :  { %v4455_v38 = vpop.f32.mrf.mxu1 }
 0x2e7   :  { %v4456_v36 = vadd.f32 %v4455_v38, %v4443_v9 }
 0x2e9   :  { %v4496_v3 = vpop.f32.mrf.mxu0  ;;  %v6990_v48 = vmul.f32 -1.442695, %v4456_v36 }
 0x2eb   :  { %7592 = vpow2.f32 %v6990_v48 }
 0x2ee   :  { %v4457_v41 = vpop.f32.mrf.mxu1 }
 0x2ef   :  { %v4533_v51 = vpop.f32.mrf.mxu3 }
 0x2f1   :  { %v7593_v0 = vpop.eup %7592 }
 0x2f2   :  { %v4559_v52 = vadd.f32 1.0, %v7593_v0 }
 0x2f4   :  { %7594 = vrcp.f32 %v4559_v52  ;;  %v4632_v26 = vand.u32 2147483648, %v4559_v52  ;;  %v4630_v45 = vand.u32 2147483647, %v4559_v52  ;;  %vm4626_vm1 = vweird.f32 %v4559_v52 }
 0x2f6   :  { %v4633_v4 = vor.u32 1.1754944e-38, %v4632_v26  ;;  %vm4631_vm3 = vcmp.eq.f32.partialorder %v4630_v45, 8.507059e+37 }
 0x2f7   :  { %v4535_v25 = vpop.f32.mrf.mxu3 }
 0x2fa   :  { %v7595_v40 = vpop.eup %7594 }
 0x2fb   :  { %v4622_v44 = vmul.f32 %v7595_v40, %v4559_v52  ;;  %vm4627_vm0 = vweird.f32 %v7595_v40 }
 0x2fc   :  { %vm4628_vm2 = vmor %vm4626_vm1, %vm4627_vm0 }
 0x2fd   :  { %v4623_v42 = vsub.f32 1.0, %v4622_v44 }
 0x2ff   :  { %v4624_v8 = vmul.f32 %v7595_v40, %v4623_v42 }
 0x301   :  { %v4625_v46 = vadd.f32 %v7595_v40, %v4624_v8 }
 0x303   :  { %v4629_v49 = vsel %vm4628_vm2, %v7595_v40, %v4625_v46 }
 0x304   :  { %v4634_v55 = vsel %vm4631_vm3, %v4633_v4, %v4629_v49 }
 0x305   :  { %v4655_v22 = vmul.f32 %v7607_v58, %v4634_v55 }
 0x306   :  { %v4507_v53 = vpop.f32.mrf.mxu1 }
 0x307   :  { %v4508_v57 = vadd.f32 %v4507_v53, %v4495_v47  ;;  %4661 = vst [vmem:[#allocation11 + $0x20] sm:$0xff] %v4655_v22 }
 0x309   :  { %v4521_v10 = vadd.f32 %v4520_v50, %v4508_v57 }
 0x30b   :  { %v4534_v20 = vadd.f32 %v4533_v51, %v4521_v10 }
 0x30d   :  { %v6991_v2 = vmul.f32 -1.442695, %v4534_v20 }
 0x30e   :  { %v4509_v6 = vpop.f32.mrf.mxu1 }
 0x30f   :  { %7596 = vpow2.f32 %v6991_v2 }
 0x315   :  { %v7597_v62 = vpop.eup %7596 }
 0x316   :  { %v4560_v7 = vadd.f32 1.0, %v7597_v62 }
 0x318   :  { %7598 = vrcp.f32 %v4560_v7  ;;  %v4647_v11 = vand.u32 2147483648, %v4560_v7  ;;  %v4645_v13 = vand.u32 2147483647, %v4560_v7  ;;  %vm4641_vm5 = vweird.f32 %v4560_v7 }
 0x31a   :  { %v4648_v16 = vor.u32 1.1754944e-38, %v4647_v11  ;;  %vm4646_vm7 = vcmp.eq.f32.partialorder %v4645_v13, 8.507059e+37 }
 0x31e   :  { %v7599_v54 = vpop.eup %7598 }
 0x31f   :  { %v4637_v60 = vmul.f32 %v7599_v54, %v4560_v7  ;;  %vm4642_vm4 = vweird.f32 %v7599_v54 }
 0x320   :  { %vm4643_vm6 = vmor %vm4641_vm5, %vm4642_vm4 }
 0x321   :  { %v4638_v63 = vsub.f32 1.0, %v4637_v60 }
 0x323   :  { %v4639_v12 = vmul.f32 %v7599_v54, %v4638_v63 }
 0x325   :  { %v4640_v14 = vadd.f32 %v7599_v54, %v4639_v12 }
 0x327   :  { %v4644_v17 = vsel %vm4643_vm6, %v7599_v54, %v4640_v14 }
 0x328   :  { %v4649_v18 = vsel %vm4646_vm7, %v4648_v16, %v4644_v17 }
 0x329   :  { %v4656_v5 = vmul.f32 %v7608_v34, %v4649_v18 }
 0x32b   :  { %4662 = vst [vmem:[#allocation11 + $0x28] sm:$0xff] %v4656_v5 }
 0x32c   :  { %4673 = dma.vmem_to_hbm [thread:$0]  %s4669_s4, 768, %s4671_s19, [#allocation4]  }
 0x32d   :  { %7759 = dma.done.wait [#allocation4], 768  }
 0x32e   :  { %7760 = vsyncadd [#allocation4], 4294966528 }
 0x32f   :  { %4678 = vsyncpa [#allocation3], 1 }
 0x330   :  { %4679 = vsyncpa [#allocation6], 1 }
 0x331   :  { %4680 = vsyncpa [#allocation9], 1 }
 0x332   :  { %4681 = vsyncpa [#allocation4], 1 }

</bundles_post_ra>
